<compile_context>
chip_gen: v7x
topology: tpu7x:2x2x1
jax: 0.10.0
libtpu: 0.0.40
codegen_flags: <defaults>
</compile_context>

<pallas_src>
import functools

import jax
import jax.numpy as jnp
from jax.experimental import pallas as pl
from jax.experimental.pallas import tpu as pltpu

THRESHOLD = 1.25
CURRENT_DECAY = 0.25
VOLTAGE_DECAY = 0.03
POOL_WEIGHT = 1.1  # slayer synapse.Pool fixed weight


# ------------- kernel A: conv matmul + LIF0 + 2x2 pool + LIF1 ---------------

def _conv_pool_lif_kernel(wc_ref, b_ref, s2_ref, cnt_ref,
                          cur0, vol0, prev0, acc0,
                          cur1, vol1, prev1, acc1):
    t = pl.program_id(0)

    @pl.when(t == 0)
    def _init():
        for r in (cur0, vol0, prev0, acc0, cur1, vol1, prev1, acc1):
            r[...] = jnp.zeros_like(r)

    # ---- conv for this timestep: (CO, K) @ (K, 4*NP) on the MXU, f32 acc ----
    z0 = jnp.dot(wc_ref[...], b_ref[...], preferred_element_type=jnp.float32)

    # ---- block 0: delay-shifted spike output (out[t] = spike[t-1]) ----
    s1_t = prev0[...]                       # zeros at t == 0
    acc0[...] = acc0[...] + s1_t

    # ---- block 0 CUBA LIF state update ----
    c0 = (1.0 - CURRENT_DECAY) * cur0[...] + z0
    v0 = (1.0 - VOLTAGE_DECAY) * vol0[...] + c0
    m0 = v0 >= THRESHOLD
    cur0[...] = c0
    vol0[...] = jnp.where(m0, 0.0, v0)      # reset membrane on spike
    prev0[...] = m0.astype(jnp.float32)

    # ---- fused 2x2 sum-pool (weight 1.1): four 128-aligned lane groups ----
    npool = s1_t.shape[1] // 4              # lanes per (dh, dw) group
    pz = POOL_WEIGHT * (s1_t[:, 0 * npool:1 * npool] +
                        s1_t[:, 1 * npool:2 * npool] +
                        s1_t[:, 2 * npool:3 * npool] +
                        s1_t[:, 3 * npool:4 * npool])

    # ---- block 1: delay-shifted spike output (bf16, exact for 0/1) ----
    s2_t = prev1[...]
    acc1[...] = acc1[...] + s2_t
    s2_ref[...] = s2_t.astype(s2_ref.dtype)

    # ---- block 1 CUBA LIF state update ----
    c1 = (1.0 - CURRENT_DECAY) * cur1[...] + pz
    v1 = (1.0 - VOLTAGE_DECAY) * vol1[...] + c1
    m1 = v1 >= THRESHOLD
    cur1[...] = c1
    vol1[...] = jnp.where(m1, 0.0, v1)
    prev1[...] = m1.astype(jnp.float32)

    # ---- last step: emit both blocks' spike-count totals (lane-dense) ----
    @pl.when(t == pl.num_programs(0) - 1)
    def _emit_counts():
        cnt_ref[0:8, :] = jnp.zeros((8, 128), jnp.float32) + jnp.sum(acc0[...])
        cnt_ref[8:16, :] = jnp.zeros((8, 128), jnp.float32) + jnp.sum(acc1[...])


def conv_pool_block(wc, bmat, *, t_steps):
    """wc: (CO, K) bf16; bmat: (K, T*4*NP) bf16, columns (t, dh, dw, n, ph, pw).

    Returns (s2 (T*CO, NP) bf16 delay-shifted block-1 spikes,
             cnt (16, 128) f32 with [0,0]=block-0 count, [8,0]=block-1 count).
    """
    CO, K = wc.shape
    lc = bmat.shape[1] // t_steps           # conv lanes per timestep = 4 * NP
    NP = lc // 4
    assert CO % 8 == 0 and NP % 128 == 0 and bmat.shape[1] == t_steps * lc
    return pl.pallas_call(
        _conv_pool_lif_kernel,
        out_shape=(jax.ShapeDtypeStruct((t_steps * CO, NP), jnp.bfloat16),
                   jax.ShapeDtypeStruct((16, 128), jnp.float32)),
        grid_spec=pltpu.PrefetchScalarGridSpec(
            num_scalar_prefetch=0,
            grid=(t_steps,),
            in_specs=[pl.BlockSpec((CO, K), lambda t: (0, 0)),
                      pl.BlockSpec((K, lc), lambda t: (0, t))],
            out_specs=(pl.BlockSpec((CO, NP), lambda t: (t, 0)),
                       pl.BlockSpec((16, 128), lambda t: (0, 0))),
            scratch_shapes=[pltpu.VMEM((CO, lc), jnp.float32)] * 4
                         + [pltpu.VMEM((CO, NP), jnp.float32)] * 4),
        compiler_params=pltpu.CompilerParams(
            dimension_semantics=("arbitrary",)),   # T carries LIF state
    )(wc, bmat)


# ---------------- kernel B: dense matmul + final CUBA LIF -------------------

def _dense_lif_kernel(a_ref, wt_ref, s_ref, cnt_ref, *, n_batch, n_steps):
    # rows of a / z are ordered (t, n); W is pre-transposed to (K, NO).
    z = jnp.dot(a_ref[...], wt_ref[...], preferred_element_type=jnp.float32)
    no = z.shape[1]
    cur = jnp.zeros((n_batch, no), jnp.float32)
    vol = jnp.zeros((n_batch, no), jnp.float32)
    prev = jnp.zeros((n_batch, no), jnp.float32)
    rows = []
    for t in range(n_steps):                # static & tiny: T*N rows total
        rows.append(prev)                   # delay shift: out[t] = spike[t-1]
        zt = z[t * n_batch:(t + 1) * n_batch, :]
        cur = (1.0 - CURRENT_DECAY) * cur + zt
        vol = (1.0 - VOLTAGE_DECAY) * vol + cur
        m = vol >= THRESHOLD
        vol = jnp.where(m, 0.0, vol)
        prev = m.astype(jnp.float32)
    s = jnp.concatenate(rows, axis=0)       # (T*N, NO): one dense store
    s_ref[...] = s
    cnt_ref[...] = jnp.zeros_like(cnt_ref) + jnp.sum(s)


def dense_lif_block(a, wt, *, n_batch, n_steps):
    """a: (T*N, K) bf16 rows (t, n); wt: (K, NO) bf16 (pre-transposed weight)."""
    M, K = a.shape
    K2, NO = wt.shape
    assert K == K2 and M == n_batch * n_steps and M % 8 == 0 and NO % 128 == 0
    kernel = functools.partial(_dense_lif_kernel,
                               n_batch=n_batch, n_steps=n_steps)
    return pl.pallas_call(
        kernel,
        out_shape=(jax.ShapeDtypeStruct((M, NO), jnp.float32),
                   jax.ShapeDtypeStruct((8, 128), jnp.float32)),
        grid_spec=pltpu.PrefetchScalarGridSpec(
            num_scalar_prefetch=0,
            grid=(1,),                       # single step: W fetched once
            in_specs=[pl.BlockSpec((M, K), lambda i: (0, 0)),
                      pl.BlockSpec((K, NO), lambda i: (0, 0))],
            out_specs=(pl.BlockSpec((M, NO), lambda i: (0, 0)),
                       pl.BlockSpec((8, 128), lambda i: (0, 0)))),
        compiler_params=pltpu.CompilerParams(
            dimension_semantics=("arbitrary",)),
    )(a, wt)


# ------------------------------- forward pass -------------------------------

def network_forward(x, w_conv, w_dense_t):
    """x: (N, C, H, W, T) f32 spikes (slayer NCHWT layout).

    w_conv: (CO, C, 3, 3) bf16; w_dense_t: (CO*(H//4)*(W//4), 128) bf16 --
    the Dense weight PRE-TRANSPOSED (and cast) once outside jit.
    Returns (spikes (N, 128, T) f32, per-block mean spike counts (1, 4) f32).
    """
    N, C, H, W, T = x.shape
    OH, OW = H // 2, W // 2                  # conv k3 s2 p1
    PH, PW = OH // 2, OW // 2                # pool k2 s2
    CO = w_conv.shape[0]
    NO = w_dense_t.shape[1]
    NP = N * PH * PW                         # lanes per timestep after pool
    assert w_dense_t.shape[0] == CO * PH * PW

    # ---- im2col, columns ordered (t, dh, dw, n, ph, pw) so the 2x2 pool is a
    #      sum over four 128-aligned lane groups inside the fused kernel ----
    xt = jnp.transpose(x.astype(jnp.bfloat16), (4, 0, 1, 2, 3))  # (T,N,C,H,W)
    xp = jnp.pad(xt, ((0, 0), (0, 0), (0, 0), (1, 1), (1, 1)))
    taps = []
    for c in range(C):
        for kh in range(3):
            for kw in range(3):
                grp = [xp[:, :, c,
                          (2 * dh + kh):(2 * dh + kh) + 4 * PH:4,
                          (2 * dw + kw):(2 * dw + kw) + 4 * PW:4]
                       for dh in (0, 1) for dw in (0, 1)]  # 4 x (T,N,PH,PW)
                taps.append(jnp.stack(grp, axis=1))        # (T,4,N,PH,PW)
    bmat = jnp.stack(taps, axis=0).reshape(C * 9, T * 4 * NP)
    wc = w_conv.reshape(CO, C * 9).astype(jnp.bfloat16)

    # ---- Blocks 0+1 fused: conv -> LIF -> shift -> pool(1.1) -> LIF -> shift
    s2, cnt_a = conv_pool_block(wc, bmat, t_steps=T)       # s2: (T*CO, NP) bf16

    # ---- Block 2: Flatten (pure reshape; its mean equals block 1's) ----
    # ---- Block 3: Dense(CO*PH*PW -> NO) + CUBA + shift (fused kernel B) ----
    # dense activation rows (t, n), columns (c, ph, pw) to match CHW flatten
    a = (s2.reshape(T, CO, N, PH * PW)
           .transpose(0, 2, 1, 3)
           .reshape(T * N, CO * PH * PW))                  # bf16, ~150 KB
    s4, cnt_b = dense_lif_block(a, w_dense_t, n_batch=N, n_steps=T)
    spike_out = s4.reshape(T, N, NO).transpose(1, 2, 0)    # (N, NO, T) f32

    c1 = cnt_a[0, 0] / (T * CO * 4 * NP)    # mean over (N, CO, OH, OW, T)
    c2 = cnt_a[8, 0] / (T * CO * NP)        # mean over (N, CO, PH, PW, T)
    c4 = cnt_b[0, 0] / (T * N * NO)         # mean over (N, NO, T)
    counts = jnp.stack([c1, c2, c2, c4]).reshape(1, 4).astype(jnp.float32)
    return spike_out, counts


if __name__ == "__main__":
    key = jax.random.PRNGKey(0)
    kc, kd, kx = jax.random.split(key, 3)

    # Spatial 96x96 so Dense in_neurons = 8*24*24 = 4608 matches the module.
    N, C, H, W, T = 2, 2, 96, 96, 8
    CO, NO = 8, 128
    w_conv = jax.random.normal(kc, (CO, C, 3, 3), jnp.float32) * 0.5
    w_dense = jax.random.normal(kd, (NO, CO * (H // 4) * (W // 4)),
                                jnp.float32) * 0.05
    x = (jax.random.uniform(kx, (N, C, H, W, T)) < 0.3).astype(jnp.float32)

    # One-time host-side weight prep, OUTSIDE jit: bf16 cast + Dense transpose
    # (spikes are 0/1 so bf16 operands are exact; matmuls accumulate in f32).
    w_conv_bf = w_conv.astype(jnp.bfloat16)
    w_dense_t = w_dense.T.astype(jnp.bfloat16)             # (K, 128)

    fwd = jax.jit(network_forward)
    spike_out, counts = fwd(x, w_conv_bf, w_dense_t)
    jax.block_until_ready((spike_out, counts))

    assert spike_out.shape == (N, NO, T)
    assert spike_out.dtype == jnp.float32
    assert counts.shape == (1, 4)
    print("KERNEL_OK")
</pallas_src>

<mosaic_0001>
module attributes {stable_mosaic.version = 11 : i64} {
  func.func @_conv_pool_lif_kernel(%arg0: i32, %arg1: memref<8x18xbf16, #tpu.memory_space<vmem>>, %arg2: memref<18x4608xbf16, #tpu.memory_space<vmem>>, %arg3: memref<8x1152xbf16, #tpu.memory_space<vmem>>, %arg4: memref<16x128xf32, #tpu.memory_space<vmem>>, %arg5: memref<8x4608xf32, #tpu.memory_space<vmem>>, %arg6: memref<8x4608xf32, #tpu.memory_space<vmem>>, %arg7: memref<8x4608xf32, #tpu.memory_space<vmem>>, %arg8: memref<8x4608xf32, #tpu.memory_space<vmem>>, %arg9: memref<8x1152xf32, #tpu.memory_space<vmem>>, %arg10: memref<8x1152xf32, #tpu.memory_space<vmem>>, %arg11: memref<8x1152xf32, #tpu.memory_space<vmem>>, %arg12: memref<8x1152xf32, #tpu.memory_space<vmem>>) attributes {dimension_semantics = [#tpu.dimension_semantics<arbitrary>], iteration_bounds = array<i64: 8>, scalar_prefetch = 0 : i64, scratch_operands = 8 : i64, tpu.core_type = #tpu.core_type<tc>, window_params = [{pipeline_mode = #tpu.pipeline_mode<synchronous>, transform_indices = @transform_0, window_bounds = array<i64: 8, 18>}, {transform_indices = @transform_1, window_bounds = array<i64: 18, 4608>}, {transform_indices = @transform_2, window_bounds = array<i64: 8, 1152>}, {pipeline_mode = #tpu.pipeline_mode<synchronous>, transform_indices = @transform_3, window_bounds = array<i64: 16, 128>}]} {
    %c0_i32 = arith.constant 0 : i32
    %0 = arith.cmpi eq, %arg0, %c0_i32 : i32
    %1 = arith.extui %0 : i1 to i32
    %c0_i32_0 = arith.constant 0 : i32
    %2 = arith.cmpi ne, %1, %c0_i32_0 : i32
    scf.if %2 {
      %cst_48 = arith.constant 0.000000e+00 : f32
      %62 = vector.broadcast %cst_48 : f32 to vector<8x4608xf32>
      %c0_49 = arith.constant 0 : index
      %c0_50 = arith.constant 0 : index
      %63 = vector.load %arg5[%c0_49, %c0_50] : memref<8x4608xf32, #tpu.memory_space<vmem>>, vector<8x4608xf32>
      tpu.vector_store %arg5[%c0_49, %c0_50], %62 {strides = array<i32>} : memref<8x4608xf32, #tpu.memory_space<vmem>>, vector<8x4608xf32>,
      %cst_51 = arith.constant 0.000000e+00 : f32
      %64 = vector.broadcast %cst_51 : f32 to vector<8x4608xf32>
      %c0_52 = arith.constant 0 : index
      %c0_53 = arith.constant 0 : index
      %65 = vector.load %arg6[%c0_52, %c0_53] : memref<8x4608xf32, #tpu.memory_space<vmem>>, vector<8x4608xf32>
      tpu.vector_store %arg6[%c0_52, %c0_53], %64 {strides = array<i32>} : memref<8x4608xf32, #tpu.memory_space<vmem>>, vector<8x4608xf32>,
      %cst_54 = arith.constant 0.000000e+00 : f32
      %66 = vector.broadcast %cst_54 : f32 to vector<8x4608xf32>
      %c0_55 = arith.constant 0 : index
      %c0_56 = arith.constant 0 : index
      %67 = vector.load %arg7[%c0_55, %c0_56] : memref<8x4608xf32, #tpu.memory_space<vmem>>, vector<8x4608xf32>
      tpu.vector_store %arg7[%c0_55, %c0_56], %66 {strides = array<i32>} : memref<8x4608xf32, #tpu.memory_space<vmem>>, vector<8x4608xf32>,
      %cst_57 = arith.constant 0.000000e+00 : f32
      %68 = vector.broadcast %cst_57 : f32 to vector<8x4608xf32>
      %c0_58 = arith.constant 0 : index
      %c0_59 = arith.constant 0 : index
      %69 = vector.load %arg8[%c0_58, %c0_59] : memref<8x4608xf32, #tpu.memory_space<vmem>>, vector<8x4608xf32>
      tpu.vector_store %arg8[%c0_58, %c0_59], %68 {strides = array<i32>} : memref<8x4608xf32, #tpu.memory_space<vmem>>, vector<8x4608xf32>,
      %cst_60 = arith.constant 0.000000e+00 : f32
      %70 = vector.broadcast %cst_60 : f32 to vector<8x1152xf32>
      %c0_61 = arith.constant 0 : index
      %c0_62 = arith.constant 0 : index
      %71 = vector.load %arg9[%c0_61, %c0_62] : memref<8x1152xf32, #tpu.memory_space<vmem>>, vector<8x1152xf32>
      tpu.vector_store %arg9[%c0_61, %c0_62], %70 {strides = array<i32>} : memref<8x1152xf32, #tpu.memory_space<vmem>>, vector<8x1152xf32>,
      %cst_63 = arith.constant 0.000000e+00 : f32
      %72 = vector.broadcast %cst_63 : f32 to vector<8x1152xf32>
      %c0_64 = arith.constant 0 : index
      %c0_65 = arith.constant 0 : index
      %73 = vector.load %arg10[%c0_64, %c0_65] : memref<8x1152xf32, #tpu.memory_space<vmem>>, vector<8x1152xf32>
      tpu.vector_store %arg10[%c0_64, %c0_65], %72 {strides = array<i32>} : memref<8x1152xf32, #tpu.memory_space<vmem>>, vector<8x1152xf32>,
      %cst_66 = arith.constant 0.000000e+00 : f32
      %74 = vector.broadcast %cst_66 : f32 to vector<8x1152xf32>
      %c0_67 = arith.constant 0 : index
      %c0_68 = arith.constant 0 : index
      %75 = vector.load %arg11[%c0_67, %c0_68] : memref<8x1152xf32, #tpu.memory_space<vmem>>, vector<8x1152xf32>
      tpu.vector_store %arg11[%c0_67, %c0_68], %74 {strides = array<i32>} : memref<8x1152xf32, #tpu.memory_space<vmem>>, vector<8x1152xf32>,
      %cst_69 = arith.constant 0.000000e+00 : f32
      %76 = vector.broadcast %cst_69 : f32 to vector<8x1152xf32>
      %c0_70 = arith.constant 0 : index
      %c0_71 = arith.constant 0 : index
      %77 = vector.load %arg12[%c0_70, %c0_71] : memref<8x1152xf32, #tpu.memory_space<vmem>>, vector<8x1152xf32>
      tpu.vector_store %arg12[%c0_70, %c0_71], %76 {strides = array<i32>} : memref<8x1152xf32, #tpu.memory_space<vmem>>, vector<8x1152xf32>,
    } else {
    }
    %c0 = arith.constant 0 : index
    %c0_1 = arith.constant 0 : index
    %3 = vector.load %arg1[%c0, %c0_1] : memref<8x18xbf16, #tpu.memory_space<vmem>>, vector<8x18xbf16>
    %c0_2 = arith.constant 0 : index
    %c0_3 = arith.constant 0 : index
    %4 = vector.load %arg2[%c0_2, %c0_3] : memref<18x4608xbf16, #tpu.memory_space<vmem>>, vector<18x4608xbf16>
    %cst = arith.constant dense<0.000000e+00> : vector<8x4608xf32>
    %5 = tpu.matmul %3, %4, %cst {dimension_numbers = #tpu.dot_dimension_numbers<[1], [0], [0], [1], [0, 0, 1, 1], [], []>} : vector<8x18xbf16>, vector<18x4608xbf16>, vector<8x4608xf32> -> vector<8x4608xf32>
    %c0_4 = arith.constant 0 : index
    %c0_5 = arith.constant 0 : index
    %6 = vector.load %arg7[%c0_4, %c0_5] : memref<8x4608xf32, #tpu.memory_space<vmem>>, vector<8x4608xf32>
    %c0_6 = arith.constant 0 : index
    %c0_7 = arith.constant 0 : index
    %7 = vector.load %arg8[%c0_6, %c0_7] : memref<8x4608xf32, #tpu.memory_space<vmem>>, vector<8x4608xf32>
    %8 = arith.addf %7, %6 : vector<8x4608xf32>
    %c0_8 = arith.constant 0 : index
    %c0_9 = arith.constant 0 : index
    %9 = vector.load %arg8[%c0_8, %c0_9] : memref<8x4608xf32, #tpu.memory_space<vmem>>, vector<8x4608xf32>
    tpu.vector_store %arg8[%c0_8, %c0_9], %8 {strides = array<i32>} : memref<8x4608xf32, #tpu.memory_space<vmem>>, vector<8x4608xf32>,
    %c0_10 = arith.constant 0 : index
    %c0_11 = arith.constant 0 : index
    %10 = vector.load %arg5[%c0_10, %c0_11] : memref<8x4608xf32, #tpu.memory_space<vmem>>, vector<8x4608xf32>
    %cst_12 = arith.constant 7.500000e-01 : f32
    %11 = vector.broadcast %cst_12 : f32 to vector<8x4608xf32>
    %12 = arith.mulf %11, %10 : vector<8x4608xf32>
    %13 = arith.addf %12, %5 : vector<8x4608xf32>
    %c0_13 = arith.constant 0 : index
    %c0_14 = arith.constant 0 : index
    %14 = vector.load %arg6[%c0_13, %c0_14] : memref<8x4608xf32, #tpu.memory_space<vmem>>, vector<8x4608xf32>
    %cst_15 = arith.constant 9.700000e-01 : f32
    %15 = vector.broadcast %cst_15 : f32 to vector<8x4608xf32>
    %16 = arith.mulf %15, %14 : vector<8x4608xf32>
    %17 = arith.addf %16, %13 : vector<8x4608xf32>
    %cst_16 = arith.constant 1.250000e+00 : f32
    %18 = vector.broadcast %cst_16 : f32 to vector<8x4608xf32>
    %19 = arith.cmpf oge, %17, %18 : vector<8x4608xf32>
    %c0_17 = arith.constant 0 : index
    %c0_18 = arith.constant 0 : index
    %20 = vector.load %arg5[%c0_17, %c0_18] : memref<8x4608xf32, #tpu.memory_space<vmem>>, vector<8x4608xf32>
    tpu.vector_store %arg5[%c0_17, %c0_18], %13 {strides = array<i32>} : memref<8x4608xf32, #tpu.memory_space<vmem>>, vector<8x4608xf32>,
    %cst_19 = arith.constant 0.000000e+00 : f32
    %21 = vector.broadcast %cst_19 : f32 to vector<8x4608xf32>
    %22 = arith.select %19, %21, %17 : vector<8x4608xi1>, vector<8x4608xf32>
    %c0_20 = arith.constant 0 : index
    %c0_21 = arith.constant 0 : index
    %23 = vector.load %arg6[%c0_20, %c0_21] : memref<8x4608xf32, #tpu.memory_space<vmem>>, vector<8x4608xf32>
    tpu.vector_store %arg6[%c0_20, %c0_21], %22 {strides = array<i32>} : memref<8x4608xf32, #tpu.memory_space<vmem>>, vector<8x4608xf32>,
    %24 = arith.extui %19 : vector<8x4608xi1> to vector<8x4608xi32>
    %25 = arith.sitofp %24 : vector<8x4608xi32> to vector<8x4608xf32>
    %c0_22 = arith.constant 0 : index
    %c0_23 = arith.constant 0 : index
    %26 = vector.load %arg7[%c0_22, %c0_23] : memref<8x4608xf32, #tpu.memory_space<vmem>>, vector<8x4608xf32>
    tpu.vector_store %arg7[%c0_22, %c0_23], %25 {strides = array<i32>} : memref<8x4608xf32, #tpu.memory_space<vmem>>, vector<8x4608xf32>,
    %27 = vector.extract_strided_slice %6 {offsets = [0, 0], sizes = [8, 1152], strides = [1, 1]} : vector<8x4608xf32> to vector<8x1152xf32>
    %28 = vector.extract_strided_slice %6 {offsets = [0, 1152], sizes = [8, 1152], strides = [1, 1]} : vector<8x4608xf32> to vector<8x1152xf32>
    %29 = arith.addf %27, %28 : vector<8x1152xf32>
    %30 = vector.extract_strided_slice %6 {offsets = [0, 2304], sizes = [8, 1152], strides = [1, 1]} : vector<8x4608xf32> to vector<8x1152xf32>
    %31 = arith.addf %29, %30 : vector<8x1152xf32>
    %32 = vector.extract_strided_slice %6 {offsets = [0, 3456], sizes = [8, 1152], strides = [1, 1]} : vector<8x4608xf32> to vector<8x1152xf32>
    %33 = arith.addf %31, %32 : vector<8x1152xf32>
    %cst_24 = arith.constant 1.100000e+00 : f32
    %34 = vector.broadcast %cst_24 : f32 to vector<8x1152xf32>
    %35 = arith.mulf %34, %33 : vector<8x1152xf32>
    %c0_25 = arith.constant 0 : index
    %c0_26 = arith.constant 0 : index
    %36 = vector.load %arg11[%c0_25, %c0_26] : memref<8x1152xf32, #tpu.memory_space<vmem>>, vector<8x1152xf32>
    %c0_27 = arith.constant 0 : index
    %c0_28 = arith.constant 0 : index
    %37 = vector.load %arg12[%c0_27, %c0_28] : memref<8x1152xf32, #tpu.memory_space<vmem>>, vector<8x1152xf32>
    %38 = arith.addf %37, %36 : vector<8x1152xf32>
    %c0_29 = arith.constant 0 : index
    %c0_30 = arith.constant 0 : index
    %39 = vector.load %arg12[%c0_29, %c0_30] : memref<8x1152xf32, #tpu.memory_space<vmem>>, vector<8x1152xf32>
    tpu.vector_store %arg12[%c0_29, %c0_30], %38 {strides = array<i32>} : memref<8x1152xf32, #tpu.memory_space<vmem>>, vector<8x1152xf32>,
    %40 = arith.truncf %36 : vector<8x1152xf32> to vector<8x1152xbf16>
    %c0_31 = arith.constant 0 : index
    %c0_32 = arith.constant 0 : index
    %41 = vector.load %arg3[%c0_31, %c0_32] : memref<8x1152xbf16, #tpu.memory_space<vmem>>, vector<8x1152xbf16>
    tpu.vector_store %arg3[%c0_31, %c0_32], %40 {strides = array<i32>} : memref<8x1152xbf16, #tpu.memory_space<vmem>>, vector<8x1152xbf16>,
    %c0_33 = arith.constant 0 : index
    %c0_34 = arith.constant 0 : index
    %42 = vector.load %arg9[%c0_33, %c0_34] : memref<8x1152xf32, #tpu.memory_space<vmem>>, vector<8x1152xf32>
    %cst_35 = arith.constant 7.500000e-01 : f32
    %43 = vector.broadcast %cst_35 : f32 to vector<8x1152xf32>
    %44 = arith.mulf %43, %42 : vector<8x1152xf32>
    %45 = arith.addf %44, %35 : vector<8x1152xf32>
    %c0_36 = arith.constant 0 : index
    %c0_37 = arith.constant 0 : index
    %46 = vector.load %arg10[%c0_36, %c0_37] : memref<8x1152xf32, #tpu.memory_space<vmem>>, vector<8x1152xf32>
    %cst_38 = arith.constant 9.700000e-01 : f32
    %47 = vector.broadcast %cst_38 : f32 to vector<8x1152xf32>
    %48 = arith.mulf %47, %46 : vector<8x1152xf32>
    %49 = arith.addf %48, %45 : vector<8x1152xf32>
    %cst_39 = arith.constant 1.250000e+00 : f32
    %50 = vector.broadcast %cst_39 : f32 to vector<8x1152xf32>
    %51 = arith.cmpf oge, %49, %50 : vector<8x1152xf32>
    %c0_40 = arith.constant 0 : index
    %c0_41 = arith.constant 0 : index
    %52 = vector.load %arg9[%c0_40, %c0_41] : memref<8x1152xf32, #tpu.memory_space<vmem>>, vector<8x1152xf32>
    tpu.vector_store %arg9[%c0_40, %c0_41], %45 {strides = array<i32>} : memref<8x1152xf32, #tpu.memory_space<vmem>>, vector<8x1152xf32>,
    %cst_42 = arith.constant 0.000000e+00 : f32
    %53 = vector.broadcast %cst_42 : f32 to vector<8x1152xf32>
    %54 = arith.select %51, %53, %49 : vector<8x1152xi1>, vector<8x1152xf32>
    %c0_43 = arith.constant 0 : index
    %c0_44 = arith.constant 0 : index
    %55 = vector.load %arg10[%c0_43, %c0_44] : memref<8x1152xf32, #tpu.memory_space<vmem>>, vector<8x1152xf32>
    tpu.vector_store %arg10[%c0_43, %c0_44], %54 {strides = array<i32>} : memref<8x1152xf32, #tpu.memory_space<vmem>>, vector<8x1152xf32>,
    %56 = arith.extui %51 : vector<8x1152xi1> to vector<8x1152xi32>
    %57 = arith.sitofp %56 : vector<8x1152xi32> to vector<8x1152xf32>
    %c0_45 = arith.constant 0 : index
    %c0_46 = arith.constant 0 : index
    %58 = vector.load %arg11[%c0_45, %c0_46] : memref<8x1152xf32, #tpu.memory_space<vmem>>, vector<8x1152xf32>
    tpu.vector_store %arg11[%c0_45, %c0_46], %57 {strides = array<i32>} : memref<8x1152xf32, #tpu.memory_space<vmem>>, vector<8x1152xf32>,
    %c7_i32 = arith.constant 7 : i32
    %59 = arith.cmpi eq, %arg0, %c7_i32 : i32
    %60 = arith.extui %59 : i1 to i32
    %c0_i32_47 = arith.constant 0 : i32
    %61 = arith.cmpi ne, %60, %c0_i32_47 : i32
    scf.if %61 {
      %cst_48 = arith.constant 0.000000e+00 : f32
      %62 = vector.broadcast %cst_48 : f32 to vector<8x128xf32>
      %c0_49 = arith.constant 0 : index
      %c0_50 = arith.constant 0 : index
      %63 = vector.load %arg8[%c0_49, %c0_50] : memref<8x4608xf32, #tpu.memory_space<vmem>>, vector<8x4608xf32>
      %64 = vector.shape_cast %63 : vector<8x4608xf32> to vector<1x8x4608xf32>
      %cst_51 = arith.constant dense<0.000000e+00> : vector<1xf32>
      %65 = vector.multi_reduction <add>, %64, %cst_51 [1, 2] : vector<1x8x4608xf32> to vector<1xf32>
      %66 = vector.shape_cast %65 : vector<1xf32> to vector<1x1x1xf32>
      %67 = vector.extract %66[0, 0, 0] : f32 from vector<1x1x1xf32>
      %68 = vector.broadcast %67 : f32 to vector<8x128xf32>
      %69 = arith.addf %62, %68 : vector<8x128xf32>
      %c0_52 = arith.constant 0 : index
      %c0_53 = arith.constant 0 : index
      %70 = vector.load %arg4[%c0_52, %c0_53] : memref<16x128xf32, #tpu.memory_space<vmem>>, vector<8x128xf32>
      tpu.vector_store %arg4[%c0_52, %c0_53], %69 {strides = array<i32>} : memref<16x128xf32, #tpu.memory_space<vmem>>, vector<8x128xf32>,
      %cst_54 = arith.constant 0.000000e+00 : f32
      %71 = vector.broadcast %cst_54 : f32 to vector<8x128xf32>
      %c0_55 = arith.constant 0 : index
      %c0_56 = arith.constant 0 : index
      %72 = vector.load %arg12[%c0_55, %c0_56] : memref<8x1152xf32, #tpu.memory_space<vmem>>, vector<8x1152xf32>
      %73 = vector.shape_cast %72 : vector<8x1152xf32> to vector<1x8x1152xf32>
      %cst_57 = arith.constant dense<0.000000e+00> : vector<1xf32>
      %74 = vector.multi_reduction <add>, %73, %cst_57 [1, 2] : vector<1x8x1152xf32> to vector<1xf32>
      %75 = vector.shape_cast %74 : vector<1xf32> to vector<1x1x1xf32>
      %76 = vector.extract %75[0, 0, 0] : f32 from vector<1x1x1xf32>
      %77 = vector.broadcast %76 : f32 to vector<8x128xf32>
      %78 = arith.addf %71, %77 : vector<8x128xf32>
      %c8 = arith.constant 8 : index
      %c0_58 = arith.constant 0 : index
      %79 = vector.load %arg4[%c8, %c0_58] : memref<16x128xf32, #tpu.memory_space<vmem>>, vector<8x128xf32>
      tpu.vector_store %arg4[%c8, %c0_58], %78 {strides = array<i32>} : memref<16x128xf32, #tpu.memory_space<vmem>>, vector<8x128xf32>,
    } else {
    }
    return
  }
  func.func @transform_0(%arg0: i32) -> (i32, i32) {
    %c0_i32 = arith.constant 0 : i32
    %c0_i32_0 = arith.constant 0 : i32
    %c0_i32_1 = arith.constant 0 : i32
    return %c0_i32, %c0_i32_0 : i32, i32
  }
  func.func @transform_1(%arg0: i32) -> (i32, i32) {
    %c0_i32 = arith.constant 0 : i32
    %c0_i32_0 = arith.constant 0 : i32
    return %c0_i32, %arg0 : i32, i32
  }
  func.func @transform_2(%arg0: i32) -> (i32, i32) {
    %c0_i32 = arith.constant 0 : i32
    %c0_i32_0 = arith.constant 0 : i32
    return %arg0, %c0_i32 : i32, i32
  }
  func.func @transform_3(%arg0: i32) -> (i32, i32) {
    %c0_i32 = arith.constant 0 : i32
    %c0_i32_0 = arith.constant 0 : i32
    %c0_i32_1 = arith.constant 0 : i32
    return %c0_i32, %c0_i32_0 : i32, i32
  }
}

module attributes {stable_mosaic.version = 11 : i64} {
  func.func @_dense_lif_kernel(%arg0: i32, %arg1: memref<16x4608xbf16, #tpu.memory_space<vmem>>, %arg2: memref<4608x128xbf16, #tpu.memory_space<vmem>>, %arg3: memref<16x128xf32, #tpu.memory_space<vmem>>, %arg4: memref<8x128xf32, #tpu.memory_space<vmem>>) attributes {dimension_semantics = [#tpu.dimension_semantics<arbitrary>], iteration_bounds = array<i64: 1>, scalar_prefetch = 0 : i64, scratch_operands = 0 : i64, tpu.core_type = #tpu.core_type<tc>, window_params = [{pipeline_mode = #tpu.pipeline_mode<synchronous>, transform_indices = @transform_0, window_bounds = array<i64: 16, 4608>}, {pipeline_mode = #tpu.pipeline_mode<synchronous>, transform_indices = @transform_1, window_bounds = array<i64: 4608, 128>}, {pipeline_mode = #tpu.pipeline_mode<synchronous>, transform_indices = @transform_2, window_bounds = array<i64: 16, 128>}, {pipeline_mode = #tpu.pipeline_mode<synchronous>, transform_indices = @transform_3, window_bounds = array<i64: 8, 128>}]} {
    %c0 = arith.constant 0 : index
    %c0_0 = arith.constant 0 : index
    %0 = vector.load %arg1[%c0, %c0_0] : memref<16x4608xbf16, #tpu.memory_space<vmem>>, vector<16x4608xbf16>
    %c0_1 = arith.constant 0 : index
    %c0_2 = arith.constant 0 : index
    %1 = vector.load %arg2[%c0_1, %c0_2] : memref<4608x128xbf16, #tpu.memory_space<vmem>>, vector<4608x128xbf16>
    %cst = arith.constant dense<0.000000e+00> : vector<16x128xf32>
    %2 = tpu.matmul %0, %1, %cst {dimension_numbers = #tpu.dot_dimension_numbers<[1], [0], [0], [1], [0, 0, 1, 1], [], []>} : vector<16x4608xbf16>, vector<4608x128xbf16>, vector<16x128xf32> -> vector<16x128xf32>
    %cst_3 = arith.constant 0.000000e+00 : f32
    %3 = vector.broadcast %cst_3 : f32 to vector<2x128xf32>
    %cst_4 = arith.constant 0.000000e+00 : f32
    %4 = vector.broadcast %cst_4 : f32 to vector<2x128xf32>
    %cst_5 = arith.constant 0.000000e+00 : f32
    %5 = vector.broadcast %cst_5 : f32 to vector<2x128xf32>
    %6 = vector.extract_strided_slice %2 {offsets = [0, 0], sizes = [2, 128], strides = [1, 1]} : vector<16x128xf32> to vector<2x128xf32>
    %cst_6 = arith.constant 7.500000e-01 : f32
    %7 = vector.broadcast %cst_6 : f32 to vector<2x128xf32>
    %8 = arith.mulf %7, %3 : vector<2x128xf32>
    %9 = arith.addf %8, %6 : vector<2x128xf32>
    %cst_7 = arith.constant 9.700000e-01 : f32
    %10 = vector.broadcast %cst_7 : f32 to vector<2x128xf32>
    %11 = arith.mulf %10, %4 : vector<2x128xf32>
    %12 = arith.addf %11, %9 : vector<2x128xf32>
    %cst_8 = arith.constant 1.250000e+00 : f32
    %13 = vector.broadcast %cst_8 : f32 to vector<2x128xf32>
    %14 = arith.cmpf oge, %12, %13 : vector<2x128xf32>
    %cst_9 = arith.constant 0.000000e+00 : f32
    %15 = vector.broadcast %cst_9 : f32 to vector<2x128xf32>
    %16 = arith.select %14, %15, %12 : vector<2x128xi1>, vector<2x128xf32>
    %17 = arith.extui %14 : vector<2x128xi1> to vector<2x128xi32>
    %18 = arith.sitofp %17 : vector<2x128xi32> to vector<2x128xf32>
    %19 = vector.extract_strided_slice %2 {offsets = [2, 0], sizes = [2, 128], strides = [1, 1]} : vector<16x128xf32> to vector<2x128xf32>
    %cst_10 = arith.constant 7.500000e-01 : f32
    %20 = vector.broadcast %cst_10 : f32 to vector<2x128xf32>
    %21 = arith.mulf %20, %9 : vector<2x128xf32>
    %22 = arith.addf %21, %19 : vector<2x128xf32>
    %cst_11 = arith.constant 9.700000e-01 : f32
    %23 = vector.broadcast %cst_11 : f32 to vector<2x128xf32>
    %24 = arith.mulf %23, %16 : vector<2x128xf32>
    %25 = arith.addf %24, %22 : vector<2x128xf32>
    %cst_12 = arith.constant 1.250000e+00 : f32
    %26 = vector.broadcast %cst_12 : f32 to vector<2x128xf32>
    %27 = arith.cmpf oge, %25, %26 : vector<2x128xf32>
    %cst_13 = arith.constant 0.000000e+00 : f32
    %28 = vector.broadcast %cst_13 : f32 to vector<2x128xf32>
    %29 = arith.select %27, %28, %25 : vector<2x128xi1>, vector<2x128xf32>
    %30 = arith.extui %27 : vector<2x128xi1> to vector<2x128xi32>
    %31 = arith.sitofp %30 : vector<2x128xi32> to vector<2x128xf32>
    %32 = vector.extract_strided_slice %2 {offsets = [4, 0], sizes = [2, 128], strides = [1, 1]} : vector<16x128xf32> to vector<2x128xf32>
    %cst_14 = arith.constant 7.500000e-01 : f32
    %33 = vector.broadcast %cst_14 : f32 to vector<2x128xf32>
    %34 = arith.mulf %33, %22 : vector<2x128xf32>
    %35 = arith.addf %34, %32 : vector<2x128xf32>
    %cst_15 = arith.constant 9.700000e-01 : f32
    %36 = vector.broadcast %cst_15 : f32 to vector<2x128xf32>
    %37 = arith.mulf %36, %29 : vector<2x128xf32>
    %38 = arith.addf %37, %35 : vector<2x128xf32>
    %cst_16 = arith.constant 1.250000e+00 : f32
    %39 = vector.broadcast %cst_16 : f32 to vector<2x128xf32>
    %40 = arith.cmpf oge, %38, %39 : vector<2x128xf32>
    %cst_17 = arith.constant 0.000000e+00 : f32
    %41 = vector.broadcast %cst_17 : f32 to vector<2x128xf32>
    %42 = arith.select %40, %41, %38 : vector<2x128xi1>, vector<2x128xf32>
    %43 = arith.extui %40 : vector<2x128xi1> to vector<2x128xi32>
    %44 = arith.sitofp %43 : vector<2x128xi32> to vector<2x128xf32>
    %45 = vector.extract_strided_slice %2 {offsets = [6, 0], sizes = [2, 128], strides = [1, 1]} : vector<16x128xf32> to vector<2x128xf32>
    %cst_18 = arith.constant 7.500000e-01 : f32
    %46 = vector.broadcast %cst_18 : f32 to vector<2x128xf32>
    %47 = arith.mulf %46, %35 : vector<2x128xf32>
    %48 = arith.addf %47, %45 : vector<2x128xf32>
    %cst_19 = arith.constant 9.700000e-01 : f32
    %49 = vector.broadcast %cst_19 : f32 to vector<2x128xf32>
    %50 = arith.mulf %49, %42 : vector<2x128xf32>
    %51 = arith.addf %50, %48 : vector<2x128xf32>
    %cst_20 = arith.constant 1.250000e+00 : f32
    %52 = vector.broadcast %cst_20 : f32 to vector<2x128xf32>
    %53 = arith.cmpf oge, %51, %52 : vector<2x128xf32>
    %cst_21 = arith.constant 0.000000e+00 : f32
    %54 = vector.broadcast %cst_21 : f32 to vector<2x128xf32>
    %55 = arith.select %53, %54, %51 : vector<2x128xi1>, vector<2x128xf32>
    %56 = arith.extui %53 : vector<2x128xi1> to vector<2x128xi32>
    %57 = arith.sitofp %56 : vector<2x128xi32> to vector<2x128xf32>
    %58 = vector.extract_strided_slice %2 {offsets = [8, 0], sizes = [2, 128], strides = [1, 1]} : vector<16x128xf32> to vector<2x128xf32>
    %cst_22 = arith.constant 7.500000e-01 : f32
    %59 = vector.broadcast %cst_22 : f32 to vector<2x128xf32>
    %60 = arith.mulf %59, %48 : vector<2x128xf32>
    %61 = arith.addf %60, %58 : vector<2x128xf32>
    %cst_23 = arith.constant 9.700000e-01 : f32
    %62 = vector.broadcast %cst_23 : f32 to vector<2x128xf32>
    %63 = arith.mulf %62, %55 : vector<2x128xf32>
    %64 = arith.addf %63, %61 : vector<2x128xf32>
    %cst_24 = arith.constant 1.250000e+00 : f32
    %65 = vector.broadcast %cst_24 : f32 to vector<2x128xf32>
    %66 = arith.cmpf oge, %64, %65 : vector<2x128xf32>
    %cst_25 = arith.constant 0.000000e+00 : f32
    %67 = vector.broadcast %cst_25 : f32 to vector<2x128xf32>
    %68 = arith.select %66, %67, %64 : vector<2x128xi1>, vector<2x128xf32>
    %69 = arith.extui %66 : vector<2x128xi1> to vector<2x128xi32>
    %70 = arith.sitofp %69 : vector<2x128xi32> to vector<2x128xf32>
    %71 = vector.extract_strided_slice %2 {offsets = [10, 0], sizes = [2, 128], strides = [1, 1]} : vector<16x128xf32> to vector<2x128xf32>
    %cst_26 = arith.constant 7.500000e-01 : f32
    %72 = vector.broadcast %cst_26 : f32 to vector<2x128xf32>
    %73 = arith.mulf %72, %61 : vector<2x128xf32>
    %74 = arith.addf %73, %71 : vector<2x128xf32>
    %cst_27 = arith.constant 9.700000e-01 : f32
    %75 = vector.broadcast %cst_27 : f32 to vector<2x128xf32>
    %76 = arith.mulf %75, %68 : vector<2x128xf32>
    %77 = arith.addf %76, %74 : vector<2x128xf32>
    %cst_28 = arith.constant 1.250000e+00 : f32
    %78 = vector.broadcast %cst_28 : f32 to vector<2x128xf32>
    %79 = arith.cmpf oge, %77, %78 : vector<2x128xf32>
    %cst_29 = arith.constant 0.000000e+00 : f32
    %80 = vector.broadcast %cst_29 : f32 to vector<2x128xf32>
    %81 = arith.select %79, %80, %77 : vector<2x128xi1>, vector<2x128xf32>
    %82 = arith.extui %79 : vector<2x128xi1> to vector<2x128xi32>
    %83 = arith.sitofp %82 : vector<2x128xi32> to vector<2x128xf32>
    %84 = vector.extract_strided_slice %2 {offsets = [12, 0], sizes = [2, 128], strides = [1, 1]} : vector<16x128xf32> to vector<2x128xf32>
    %cst_30 = arith.constant 7.500000e-01 : f32
    %85 = vector.broadcast %cst_30 : f32 to vector<2x128xf32>
    %86 = arith.mulf %85, %74 : vector<2x128xf32>
    %87 = arith.addf %86, %84 : vector<2x128xf32>
    %cst_31 = arith.constant 9.700000e-01 : f32
    %88 = vector.broadcast %cst_31 : f32 to vector<2x128xf32>
    %89 = arith.mulf %88, %81 : vector<2x128xf32>
    %90 = arith.addf %89, %87 : vector<2x128xf32>
    %cst_32 = arith.constant 1.250000e+00 : f32
    %91 = vector.broadcast %cst_32 : f32 to vector<2x128xf32>
    %92 = arith.cmpf oge, %90, %91 : vector<2x128xf32>
    %93 = arith.extui %92 : vector<2x128xi1> to vector<2x128xi32>
    %94 = arith.sitofp %93 : vector<2x128xi32> to vector<2x128xf32>
    %95 = tpu.concatenate %5, %18, %31, %44, %57, %70, %83, %94 in 0 : vector<2x128xf32>, vector<2x128xf32>, vector<2x128xf32>, vector<2x128xf32>, vector<2x128xf32>, vector<2x128xf32>, vector<2x128xf32>, vector<2x128xf32> -> vector<16x128xf32>
    %c0_33 = arith.constant 0 : index
    %c0_34 = arith.constant 0 : index
    %96 = vector.load %arg3[%c0_33, %c0_34] : memref<16x128xf32, #tpu.memory_space<vmem>>, vector<16x128xf32>
    tpu.vector_store %arg3[%c0_33, %c0_34], %95 {strides = array<i32>} : memref<16x128xf32, #tpu.memory_space<vmem>>, vector<16x128xf32>,
    %cst_35 = arith.constant 0.000000e+00 : f32
    %97 = vector.broadcast %cst_35 : f32 to vector<8x128xf32>
    %98 = vector.shape_cast %95 : vector<16x128xf32> to vector<1x16x128xf32>
    %cst_36 = arith.constant dense<0.000000e+00> : vector<1xf32>
    %99 = vector.multi_reduction <add>, %98, %cst_36 [1, 2] : vector<1x16x128xf32> to vector<1xf32>
    %100 = vector.shape_cast %99 : vector<1xf32> to vector<1x1x1xf32>
    %101 = vector.extract %100[0, 0, 0] : f32 from vector<1x1x1xf32>
    %102 = vector.broadcast %101 : f32 to vector<8x128xf32>
    %103 = arith.addf %97, %102 : vector<8x128xf32>
    %c0_37 = arith.constant 0 : index
    %c0_38 = arith.constant 0 : index
    %104 = vector.load %arg4[%c0_37, %c0_38] : memref<8x128xf32, #tpu.memory_space<vmem>>, vector<8x128xf32>
    tpu.vector_store %arg4[%c0_37, %c0_38], %103 {strides = array<i32>} : memref<8x128xf32, #tpu.memory_space<vmem>>, vector<8x128xf32>,
    return
  }
  func.func @transform_0(%arg0: i32) -> (i32, i32) {
    %c0_i32 = arith.constant 0 : i32
    %c0_i32_0 = arith.constant 0 : i32
    %c0_i32_1 = arith.constant 0 : i32
    return %c0_i32, %c0_i32_0 : i32, i32
  }
  func.func @transform_1(%arg0: i32) -> (i32, i32) {
    %c0_i32 = arith.constant 0 : i32
    %c0_i32_0 = arith.constant 0 : i32
    %c0_i32_1 = arith.constant 0 : i32
    return %c0_i32, %c0_i32_0 : i32, i32
  }
  func.func @transform_2(%arg0: i32) -> (i32, i32) {
    %c0_i32 = arith.constant 0 : i32
    %c0_i32_0 = arith.constant 0 : i32
    %c0_i32_1 = arith.constant 0 : i32
    return %c0_i32, %c0_i32_0 : i32, i32
  }
  func.func @transform_3(%arg0: i32) -> (i32, i32) {
    %c0_i32 = arith.constant 0 : i32
    %c0_i32_0 = arith.constant 0 : i32
    %c0_i32_1 = arith.constant 0 : i32
    return %c0_i32, %c0_i32_0 : i32, i32
  }
}

</mosaic_0001>

<bundles_post_ra>
// kernel: network_forward.2
= control target key start
LH: loop header
LB: loop body
LE: loop exit
PB: predicated region body
PF: predicated region fallthrough
CT: control target
= control target key end

     0   :  { %s3029_s12 = smov 0   ;;  %s3031_s13 = smov 0   ;;  %s3665_s0 = inlined_call_operand.vmem [shape: bf16[8,18], index: 0, kind: input, shape index: {}]   ;;  %s3666_s1 = inlined_call_operand.vmem [shape: bf16[18,36864], index: 1, kind: input, shape index: {}]   ;;  %s3667_s2 = inlined_call_operand.vmem [shape: bf16[64,1152], index: 2, kind: output, shape index: {0}]   ;;  %s3668_s3 = inlined_call_operand.vmem [shape: f32[16,128], index: 3, kind: output, shape index: {1}]  }
   0x1   :  { %s3033_s14 = smov 0  }
   0x2 LB: > { %s3045_s15 = sadd.s32 4294967295, %s3004_s14   ;;  %s3048_s16 = sadd.s32 1, %s3004_s14   ;;  %s3004_s14 = sphi %s3033_s14, %s3671_s14   ;;  %s3000_s13 = sphi %s3031_s13, %s3670_s13   ;;  %s2996_s12 = sphi %s3029_s12, %s3669_s12  }
   0x3   : > { %s39_s17 = ssub.s32 %s3004_s14, %s3048_s16  ;;  %s42_s18 = sadd.s32 1, %s3000_s13 }
   0x4   : > { %p40_p0 = scmp.eq.s32.totalorder %s39_s17, 0  ;;  %p49_p1 = scmp.ne.s32.totalorder %s3000_s13, %s2996_s12 }
   0x5   : > { %p50_p2 = scmp.eq.s32.totalorder %s3004_s14, 0  ;;  %p2686_p4 = scmp.ge.s32.totalorder %s3004_s14, 8 }
   0x6   : > { %s3057_s19 = scalar_select %p40_p0, %s3000_s13, %s42_s18  }
   0x7   : > { %p51_p3 = por %p50_p2, %p49_p1  ;;  %125 = sbr.rel (%p2686_p4) target bundleno = 46 (0x2e), region = 20 }
   0xe   : > { %128 = sbr.rel (!%p51_p3) target bundleno = 46 (0x2e), region = 24  ;;  %s130_s20 = sand.u32 (%p51_p3), 1, %s3000_s13  }
   0xf   : > { %s2852_s21 = smul.u32 (%p51_p3), 144, %s3004_s14 }
  0x10   : > { %s2858_s22 = smul.u32 (%p51_p3), 432, %s130_s20 }
  0x11   : > { %s3065_s25 = scalar_lea.vmem (%p51_p3), %s3666_s1, %s2852_s21 }
  0x12   : > { %v148_v0 = vld [vmem:[%s3065_s25] sm:$0xff] (%p51_p3)  ;;  %v150_v1 = vld [vmem:[%s3065_s25 + $0x8] sm:$0xff] (%p51_p3)  ;;  %v152_v2 = vld [vmem:[%s3065_s25 + $0x10] sm:$0xff] (%p51_p3)  ;;  %s3070_s26 = scalar_lea.vmem (%p51_p3), [#allocation10], %s2858_s22 }
  0x13   : > { %149 = vst [vmem:[%s3070_s26] sm:$0xff] (%p51_p3), %v148_v0  ;;  %151 = vst [vmem:[%s3070_s26 + $0x8] sm:$0xff] (%p51_p3), %v150_v1  ;;  %v154_v3 = vld [vmem:[%s3065_s25 + $0x18] sm:$0xff] (%p51_p3)  ;;  %v156_v4 = vld [vmem:[%s3065_s25 + $0x20] sm:$0xff] (%p51_p3) }
  0x14   : > { %153 = vst [vmem:[%s3070_s26 + $0x10] sm:$0xff] (%p51_p3), %v152_v2  ;;  %v158_v5 = vld [vmem:[%s3065_s25 + $0x28] sm:$0xff] (%p51_p3)  ;;  %155 = vst [vmem:[%s3070_s26 + $0x18] sm:$0xff] (%p51_p3), %v154_v3  ;;  %v160_v6 = vld [vmem:[%s3065_s25 + $0x30] sm:$0xff] (%p51_p3) }
  0x15   : > { %157 = vst [vmem:[%s3070_s26 + $0x20] sm:$0xff] %v156_v4  ;;  %159 = vst [vmem:[%s3070_s26 + $0x28] sm:$0xff] %v158_v5  ;;  %v162_v7 = vld [vmem:[%s3065_s25 + $0x38] sm:$0xff]  ;;  %v164_v8 = vld [vmem:[%s3065_s25 + $0x40] sm:$0xff] }
  0x16   : > { %161 = vst [vmem:[%s3070_s26 + $0x30] sm:$0xff] %v160_v6  ;;  %163 = vst [vmem:[%s3070_s26 + $0x38] sm:$0xff] %v162_v7  ;;  %v166_v9 = vld [vmem:[%s3065_s25 + $0x48] sm:$0xff]  ;;  %v168_v10 = vld [vmem:[%s3065_s25 + $0x50] sm:$0xff] }
  0x17   : > { %165 = vst [vmem:[%s3070_s26 + $0x40] sm:$0xff] %v164_v8  ;;  %v170_v11 = vld [vmem:[%s3065_s25 + $0x58] sm:$0xff]  ;;  %167 = vst [vmem:[%s3070_s26 + $0x48] sm:$0xff] %v166_v9  ;;  %v172_v12 = vld [vmem:[%s3065_s25 + $0x60] sm:$0xff] }
  0x18   : > { %169 = vst [vmem:[%s3070_s26 + $0x50] sm:$0xff] %v168_v10  ;;  %171 = vst [vmem:[%s3070_s26 + $0x58] sm:$0xff] %v170_v11  ;;  %v174_v13 = vld [vmem:[%s3065_s25 + $0x68] sm:$0xff]  ;;  %v176_v14 = vld [vmem:[%s3065_s25 + $0x70] sm:$0xff] }
  0x19   : > { %173 = vst [vmem:[%s3070_s26 + $0x60] sm:$0xff] %v172_v12  ;;  %175 = vst [vmem:[%s3070_s26 + $0x68] sm:$0xff] %v174_v13  ;;  %v178_v15 = vld [vmem:[%s3065_s25 + $0x78] sm:$0xff]  ;;  %v180_v16 = vld [vmem:[%s3065_s25 + $0x80] sm:$0xff] }
  0x1a   : > { %177 = vst [vmem:[%s3070_s26 + $0x70] sm:$0xff] %v176_v14  ;;  %v182_v17 = vld [vmem:[%s3065_s25 + $0x88] sm:$0xff]  ;;  %179 = vst [vmem:[%s3070_s26 + $0x78] sm:$0xff] %v178_v15  ;;  %v184_v18 = vld [vmem:[%s3065_s25 + $0x480] sm:$0xff] }
  0x1b   : > { %181 = vst [vmem:[%s3070_s26 + $0x80] sm:$0xff] %v180_v16  ;;  %183 = vst [vmem:[%s3070_s26 + $0x88] sm:$0xff] %v182_v17  ;;  %v186_v19 = vld [vmem:[%s3065_s25 + $0x488] sm:$0xff]  ;;  %v188_v20 = vld [vmem:[%s3065_s25 + $0x490] sm:$0xff] }
  0x1c   : > { %185 = vst [vmem:[%s3070_s26 + $0x90] sm:$0xff] %v184_v18  ;;  %187 = vst [vmem:[%s3070_s26 + $0x98] sm:$0xff] %v186_v19  ;;  %v190_v21 = vld [vmem:[%s3065_s25 + $0x498] sm:$0xff]  ;;  %v192_v22 = vld [vmem:[%s3065_s25 + $0x4a0] sm:$0xff] }
  0x1d   : > { %189 = vst [vmem:[%s3070_s26 + $0xa0] sm:$0xff] %v188_v20  ;;  %v194_v23 = vld [vmem:[%s3065_s25 + $0x4a8] sm:$0xff]  ;;  %191 = vst [vmem:[%s3070_s26 + $0xa8] sm:$0xff] %v190_v21  ;;  %v196_v24 = vld [vmem:[%s3065_s25 + $0x4b0] sm:$0xff] }
  0x1e   : > { %193 = vst [vmem:[%s3070_s26 + $0xb0] sm:$0xff] %v192_v22  ;;  %195 = vst [vmem:[%s3070_s26 + $0xb8] sm:$0xff] %v194_v23  ;;  %v198_v25 = vld [vmem:[%s3065_s25 + $0x4b8] sm:$0xff]  ;;  %v200_v26 = vld [vmem:[%s3065_s25 + $0x4c0] sm:$0xff] }
  0x1f   : > { %197 = vst [vmem:[%s3070_s26 + $0xc0] sm:$0xff] %v196_v24  ;;  %199 = vst [vmem:[%s3070_s26 + $0xc8] sm:$0xff] %v198_v25  ;;  %v202_v27 = vld [vmem:[%s3065_s25 + $0x4c8] sm:$0xff]  ;;  %v204_v28 = vld [vmem:[%s3065_s25 + $0x4d0] sm:$0xff] }
  0x20   : > { %201 = vst [vmem:[%s3070_s26 + $0xd0] sm:$0xff] %v200_v26  ;;  %v206_v29 = vld [vmem:[%s3065_s25 + $0x4d8] sm:$0xff]  ;;  %203 = vst [vmem:[%s3070_s26 + $0xd8] sm:$0xff] %v202_v27  ;;  %v208_v30 = vld [vmem:[%s3065_s25 + $0x4e0] sm:$0xff] }
  0x21   : > { %205 = vst [vmem:[%s3070_s26 + $0xe0] sm:$0xff] %v204_v28  ;;  %207 = vst [vmem:[%s3070_s26 + $0xe8] sm:$0xff] %v206_v29  ;;  %v210_v31 = vld [vmem:[%s3065_s25 + $0x4e8] sm:$0xff]  ;;  %v212_v32 = vld [vmem:[%s3065_s25 + $0x4f0] sm:$0xff] }
  0x22   : > { %209 = vst [vmem:[%s3070_s26 + $0xf0] sm:$0xff] %v208_v30  ;;  %211 = vst [vmem:[%s3070_s26 + $0xf8] sm:$0xff] %v210_v31  ;;  %v214_v33 = vld [vmem:[%s3065_s25 + $0x4f8] sm:$0xff]  ;;  %v216_v34 = vld [vmem:[%s3065_s25 + $0x500] sm:$0xff] }
  0x23   : > { %213 = vst [vmem:[%s3070_s26 + $0x100] sm:$0xff] %v212_v32  ;;  %v218_v35 = vld [vmem:[%s3065_s25 + $0x508] sm:$0xff]  ;;  %215 = vst [vmem:[%s3070_s26 + $0x108] sm:$0xff] %v214_v33  ;;  %v220_v36 = vld [vmem:[%s3065_s25 + $0x900] sm:$0xff] }
  0x24   : > { %217 = vst [vmem:[%s3070_s26 + $0x110] sm:$0xff] %v216_v34  ;;  %219 = vst [vmem:[%s3070_s26 + $0x118] sm:$0xff] %v218_v35  ;;  %v222_v37 = vld [vmem:[%s3065_s25 + $0x908] sm:$0xff]  ;;  %v224_v38 = vld [vmem:[%s3065_s25 + $0x910] sm:$0xff] }
  0x25   : > { %221 = vst [vmem:[%s3070_s26 + $0x120] sm:$0xff] %v220_v36  ;;  %223 = vst [vmem:[%s3070_s26 + $0x128] sm:$0xff] %v222_v37  ;;  %v226_v39 = vld [vmem:[%s3065_s25 + $0x918] sm:$0xff]  ;;  %v228_v40 = vld [vmem:[%s3065_s25 + $0x920] sm:$0xff] }
  0x26   : > { %225 = vst [vmem:[%s3070_s26 + $0x130] sm:$0xff] %v224_v38  ;;  %v230_v41 = vld [vmem:[%s3065_s25 + $0x928] sm:$0xff]  ;;  %227 = vst [vmem:[%s3070_s26 + $0x138] sm:$0xff] %v226_v39  ;;  %v232_v42 = vld [vmem:[%s3065_s25 + $0x930] sm:$0xff] }
  0x27   : > { %229 = vst [vmem:[%s3070_s26 + $0x140] sm:$0xff] %v228_v40  ;;  %231 = vst [vmem:[%s3070_s26 + $0x148] sm:$0xff] %v230_v41  ;;  %v234_v43 = vld [vmem:[%s3065_s25 + $0x938] sm:$0xff]  ;;  %v236_v44 = vld [vmem:[%s3065_s25 + $0x940] sm:$0xff] }
  0x28   : > { %233 = vst [vmem:[%s3070_s26 + $0x150] sm:$0xff] %v232_v42  ;;  %235 = vst [vmem:[%s3070_s26 + $0x158] sm:$0xff] %v234_v43  ;;  %v238_v45 = vld [vmem:[%s3065_s25 + $0x948] sm:$0xff]  ;;  %v240_v46 = vld [vmem:[%s3065_s25 + $0x950] sm:$0xff] }
  0x29   : > { %237 = vst [vmem:[%s3070_s26 + $0x160] sm:$0xff] %v236_v44  ;;  %v242_v47 = vld [vmem:[%s3065_s25 + $0x958] sm:$0xff]  ;;  %239 = vst [vmem:[%s3070_s26 + $0x168] sm:$0xff] %v238_v45  ;;  %v244_v48 = vld [vmem:[%s3065_s25 + $0x960] sm:$0xff] }
  0x2a   : > { %241 = vst [vmem:[%s3070_s26 + $0x170] sm:$0xff] %v240_v46  ;;  %243 = vst [vmem:[%s3070_s26 + $0x178] sm:$0xff] %v242_v47  ;;  %v246_v49 = vld [vmem:[%s3065_s25 + $0x968] sm:$0xff]  ;;  %v248_v50 = vld [vmem:[%s3065_s25 + $0x970] sm:$0xff] }
  0x2b   : > { %245 = vst [vmem:[%s3070_s26 + $0x180] sm:$0xff] %v244_v48  ;;  %247 = vst [vmem:[%s3070_s26 + $0x188] sm:$0xff] %v246_v49  ;;  %v250_v51 = vld [vmem:[%s3065_s25 + $0x978] sm:$0xff]  ;;  %v252_v52 = vld [vmem:[%s3065_s25 + $0x980] sm:$0xff] }
  0x2c   : > { %249 = vst [vmem:[%s3070_s26 + $0x190] sm:$0xff] %v248_v50  ;;  %v254_v53 = vld [vmem:[%s3065_s25 + $0x988] sm:$0xff]  ;;  %251 = vst [vmem:[%s3070_s26 + $0x198] sm:$0xff] %v250_v51 }
  0x2d   : > { %253 = vst [vmem:[%s3070_s26 + $0x1a0] sm:$0xff] %v252_v52  ;;  %255 = vst [vmem:[%s3070_s26 + $0x1a8] sm:$0xff] %v254_v53 }
  0x2e PF: > { %p2688_p5 = scmp.ge.s32.totalorder %s3004_s14, 1  ;;  %p260_p6 = scmp.lt.s32.totalorder %s3004_s14, 9 }
  0x30   : > { %p261_p7 = pnand %p2688_p5, %p260_p6 }
  0x31   : > { %s267_s27 = sand.u32 (!%p261_p7), 1, %s2996_s12   ;;  %p291_p8 = scmp.lt.s32.totalorder (!%p261_p7), %s3045_s15, 7 }
  0x32   : > { %264 = sbr.rel (%p261_p7) target bundleno = 715 (0x2cb), region = 47  ;;  %p2690_p9 = scmp.ne.s32.totalorder (!%p261_p7), %s3045_s15, 0 }
  0x33   : > { %s2859_s28 = smul.u32 (!%p261_p7), 432, %s267_s27 }
  0x35   : > { %s3187_s7 = scalar_lea.vmem (!%p261_p7), [#allocation10], %s2859_s28 }
  0x39   : > { %s292_s29 = scalar_select %p291_p8, %s3045_s15, 7 }
  0x3a   : > { %300 = sbr.rel (%p2690_p9) target bundleno = 149 (0x95), region = 55  ;;  %v3006_v54 = vmov (!%p2690_p9), 0.0  }
  0x3b   : > { %s2860_s30 = smul.u32 36, %s292_s29  ;;  %301 = vst [vmem:[#allocation2] sm:$0xff] (!%p2690_p9), %v3006_v54  ;;  %302 = vst [vmem:[#allocation2 + $0x8] sm:$0xff] (!%p2690_p9), %v3006_v54 }
  0x3c   : > { %303 = vst [vmem:[#allocation2 + $0x10] sm:$0xff] (!%p2690_p9), %v3006_v54  ;;  %304 = vst [vmem:[#allocation2 + $0x18] sm:$0xff] (!%p2690_p9), %v3006_v54 }
  0x3d   : > { %s3185_s6 = scalar_lea.vmem %s3667_s2, %s2860_s30  ;;  %305 = vst [vmem:[#allocation2 + $0x20] sm:$0xff] (!%p2690_p9), %v3006_v54  ;;  %306 = vst [vmem:[#allocation2 + $0x28] sm:$0xff] (!%p2690_p9), %v3006_v54 }
  0x3e   : > { %307 = vst [vmem:[#allocation2 + $0x30] sm:$0xff] (!%p2690_p9), %v3006_v54  ;;  %308 = vst [vmem:[#allocation2 + $0x38] sm:$0xff] (!%p2690_p9), %v3006_v54 }
  0x3f   : > { %309 = vst [vmem:[#allocation2 + $0x40] sm:$0xff] (!%p2690_p9), %v3006_v54  ;;  %310 = vst [vmem:[#allocation2 + $0x48] sm:$0xff] (!%p2690_p9), %v3006_v54 }
  0x40   : > { %311 = vst [vmem:[#allocation2 + $0x50] sm:$0xff] (!%p2690_p9), %v3006_v54  ;;  %312 = vst [vmem:[#allocation2 + $0x58] sm:$0xff] (!%p2690_p9), %v3006_v54 }
  0x41   : > { %313 = vst [vmem:[#allocation2 + $0x60] sm:$0xff] %v3006_v54  ;;  %314 = vst [vmem:[#allocation2 + $0x68] sm:$0xff] %v3006_v54 }
  0x42   : > { %315 = vst [vmem:[#allocation2 + $0x70] sm:$0xff] %v3006_v54  ;;  %316 = vst [vmem:[#allocation2 + $0x78] sm:$0xff] %v3006_v54 }
  0x43   : > { %317 = vst [vmem:[#allocation2 + $0x80] sm:$0xff] %v3006_v54  ;;  %318 = vst [vmem:[#allocation2 + $0x88] sm:$0xff] %v3006_v54 }
  0x44   : > { %319 = vst [vmem:[#allocation2 + $0x90] sm:$0xff] %v3006_v54  ;;  %320 = vst [vmem:[#allocation2 + $0x98] sm:$0xff] %v3006_v54 }
  0x45   : > { %321 = vst [vmem:[#allocation2 + $0xa0] sm:$0xff] %v3006_v54  ;;  %322 = vst [vmem:[#allocation2 + $0xa8] sm:$0xff] %v3006_v54 }
  0x46   : > { %323 = vst [vmem:[#allocation2 + $0xb0] sm:$0xff] %v3006_v54  ;;  %324 = vst [vmem:[#allocation2 + $0xb8] sm:$0xff] %v3006_v54 }
  0x47   : > { %325 = vst [vmem:[#allocation2 + $0xc0] sm:$0xff] %v3006_v54  ;;  %326 = vst [vmem:[#allocation2 + $0xc8] sm:$0xff] %v3006_v54 }
  0x48   : > { %327 = vst [vmem:[#allocation2 + $0xd0] sm:$0xff] %v3006_v54  ;;  %328 = vst [vmem:[#allocation2 + $0xd8] sm:$0xff] %v3006_v54 }
  0x49   : > { %329 = vst [vmem:[#allocation2 + $0xe0] sm:$0xff] %v3006_v54  ;;  %330 = vst [vmem:[#allocation2 + $0xe8] sm:$0xff] %v3006_v54 }
  0x4a   : > { %331 = vst [vmem:[#allocation2 + $0xf0] sm:$0xff] %v3006_v54  ;;  %332 = vst [vmem:[#allocation2 + $0xf8] sm:$0xff] %v3006_v54 }
  0x4b   : > { %333 = vst [vmem:[#allocation2 + $0x100] sm:$0xff] %v3006_v54  ;;  %334 = vst [vmem:[#allocation2 + $0x108] sm:$0xff] %v3006_v54 }
  0x4c   : > { %335 = vst [vmem:[#allocation2 + $0x110] sm:$0xff] %v3006_v54  ;;  %336 = vst [vmem:[#allocation2 + $0x118] sm:$0xff] %v3006_v54 }
  0x4d   : > { %337 = vst [vmem:[#allocation3] sm:$0xff] %v3006_v54  ;;  %338 = vst [vmem:[#allocation3 + $0x8] sm:$0xff] %v3006_v54 }
  0x4e   : > { %339 = vst [vmem:[#allocation3 + $0x10] sm:$0xff] %v3006_v54  ;;  %340 = vst [vmem:[#allocation3 + $0x18] sm:$0xff] %v3006_v54 }
  0x4f   : > { %341 = vst [vmem:[#allocation3 + $0x20] sm:$0xff] %v3006_v54  ;;  %342 = vst [vmem:[#allocation3 + $0x28] sm:$0xff] %v3006_v54 }
  0x50   : > { %343 = vst [vmem:[#allocation3 + $0x30] sm:$0xff] %v3006_v54  ;;  %344 = vst [vmem:[#allocation3 + $0x38] sm:$0xff] %v3006_v54 }
  0x51   : > { %345 = vst [vmem:[#allocation3 + $0x40] sm:$0xff] %v3006_v54  ;;  %346 = vst [vmem:[#allocation3 + $0x48] sm:$0xff] %v3006_v54 }
  0x52   : > { %347 = vst [vmem:[#allocation3 + $0x50] sm:$0xff] %v3006_v54  ;;  %348 = vst [vmem:[#allocation3 + $0x58] sm:$0xff] %v3006_v54 }
  0x53   : > { %349 = vst [vmem:[#allocation3 + $0x60] sm:$0xff] %v3006_v54  ;;  %350 = vst [vmem:[#allocation3 + $0x68] sm:$0xff] %v3006_v54 }
  0x54   : > { %351 = vst [vmem:[#allocation3 + $0x70] sm:$0xff] %v3006_v54  ;;  %352 = vst [vmem:[#allocation3 + $0x78] sm:$0xff] %v3006_v54 }
  0x55   : > { %353 = vst [vmem:[#allocation3 + $0x80] sm:$0xff] %v3006_v54  ;;  %354 = vst [vmem:[#allocation3 + $0x88] sm:$0xff] %v3006_v54 }
  0x56   : > { %355 = vst [vmem:[#allocation3 + $0x90] sm:$0xff] %v3006_v54  ;;  %356 = vst [vmem:[#allocation3 + $0x98] sm:$0xff] %v3006_v54 }
  0x57   : > { %357 = vst [vmem:[#allocation3 + $0xa0] sm:$0xff] %v3006_v54  ;;  %358 = vst [vmem:[#allocation3 + $0xa8] sm:$0xff] %v3006_v54 }
  0x58   : > { %359 = vst [vmem:[#allocation3 + $0xb0] sm:$0xff] %v3006_v54  ;;  %360 = vst [vmem:[#allocation3 + $0xb8] sm:$0xff] %v3006_v54 }
  0x59   : > { %361 = vst [vmem:[#allocation3 + $0xc0] sm:$0xff] %v3006_v54  ;;  %362 = vst [vmem:[#allocation3 + $0xc8] sm:$0xff] %v3006_v54 }
  0x5a   : > { %363 = vst [vmem:[#allocation3 + $0xd0] sm:$0xff] %v3006_v54  ;;  %364 = vst [vmem:[#allocation3 + $0xd8] sm:$0xff] %v3006_v54 }
  0x5b   : > { %365 = vst [vmem:[#allocation3 + $0xe0] sm:$0xff] %v3006_v54  ;;  %366 = vst [vmem:[#allocation3 + $0xe8] sm:$0xff] %v3006_v54 }
  0x5c   : > { %367 = vst [vmem:[#allocation3 + $0xf0] sm:$0xff] %v3006_v54  ;;  %368 = vst [vmem:[#allocation3 + $0xf8] sm:$0xff] %v3006_v54 }
  0x5d   : > { %369 = vst [vmem:[#allocation3 + $0x100] sm:$0xff] %v3006_v54  ;;  %370 = vst [vmem:[#allocation3 + $0x108] sm:$0xff] %v3006_v54 }
  0x5e   : > { %371 = vst [vmem:[#allocation3 + $0x110] sm:$0xff] %v3006_v54  ;;  %372 = vst [vmem:[#allocation3 + $0x118] sm:$0xff] %v3006_v54 }
  0x5f   : > { %373 = vst [vmem:[#allocation4] sm:$0xff] %v3006_v54  ;;  %374 = vst [vmem:[#allocation4 + $0x8] sm:$0xff] %v3006_v54 }
  0x60   : > { %375 = vst [vmem:[#allocation4 + $0x10] sm:$0xff] %v3006_v54  ;;  %376 = vst [vmem:[#allocation4 + $0x18] sm:$0xff] %v3006_v54 }
  0x61   : > { %377 = vst [vmem:[#allocation4 + $0x20] sm:$0xff] %v3006_v54  ;;  %378 = vst [vmem:[#allocation4 + $0x28] sm:$0xff] %v3006_v54 }
  0x62   : > { %379 = vst [vmem:[#allocation4 + $0x30] sm:$0xff] %v3006_v54  ;;  %380 = vst [vmem:[#allocation4 + $0x38] sm:$0xff] %v3006_v54 }
  0x63   : > { %381 = vst [vmem:[#allocation4 + $0x40] sm:$0xff] %v3006_v54  ;;  %382 = vst [vmem:[#allocation4 + $0x48] sm:$0xff] %v3006_v54 }
  0x64   : > { %383 = vst [vmem:[#allocation4 + $0x50] sm:$0xff] %v3006_v54  ;;  %384 = vst [vmem:[#allocation4 + $0x58] sm:$0xff] %v3006_v54 }
  0x65   : > { %385 = vst [vmem:[#allocation4 + $0x60] sm:$0xff] %v3006_v54  ;;  %386 = vst [vmem:[#allocation4 + $0x68] sm:$0xff] %v3006_v54 }
  0x66   : > { %387 = vst [vmem:[#allocation4 + $0x70] sm:$0xff] %v3006_v54  ;;  %388 = vst [vmem:[#allocation4 + $0x78] sm:$0xff] %v3006_v54 }
  0x67   : > { %389 = vst [vmem:[#allocation4 + $0x80] sm:$0xff] %v3006_v54  ;;  %390 = vst [vmem:[#allocation4 + $0x88] sm:$0xff] %v3006_v54 }
  0x68   : > { %391 = vst [vmem:[#allocation4 + $0x90] sm:$0xff] %v3006_v54  ;;  %392 = vst [vmem:[#allocation4 + $0x98] sm:$0xff] %v3006_v54 }
  0x69   : > { %393 = vst [vmem:[#allocation4 + $0xa0] sm:$0xff] %v3006_v54  ;;  %394 = vst [vmem:[#allocation4 + $0xa8] sm:$0xff] %v3006_v54 }
  0x6a   : > { %395 = vst [vmem:[#allocation4 + $0xb0] sm:$0xff] %v3006_v54  ;;  %396 = vst [vmem:[#allocation4 + $0xb8] sm:$0xff] %v3006_v54 }
  0x6b   : > { %397 = vst [vmem:[#allocation4 + $0xc0] sm:$0xff] %v3006_v54  ;;  %398 = vst [vmem:[#allocation4 + $0xc8] sm:$0xff] %v3006_v54 }
  0x6c   : > { %399 = vst [vmem:[#allocation4 + $0xd0] sm:$0xff] %v3006_v54  ;;  %400 = vst [vmem:[#allocation4 + $0xd8] sm:$0xff] %v3006_v54 }
  0x6d   : > { %401 = vst [vmem:[#allocation4 + $0xe0] sm:$0xff] %v3006_v54  ;;  %402 = vst [vmem:[#allocation4 + $0xe8] sm:$0xff] %v3006_v54 }
  0x6e   : > { %403 = vst [vmem:[#allocation4 + $0xf0] sm:$0xff] %v3006_v54  ;;  %404 = vst [vmem:[#allocation4 + $0xf8] sm:$0xff] %v3006_v54 }
  0x6f   : > { %405 = vst [vmem:[#allocation4 + $0x100] sm:$0xff] %v3006_v54  ;;  %406 = vst [vmem:[#allocation4 + $0x108] sm:$0xff] %v3006_v54 }
  0x70   : > { %407 = vst [vmem:[#allocation4 + $0x110] sm:$0xff] %v3006_v54  ;;  %408 = vst [vmem:[#allocation4 + $0x118] sm:$0xff] %v3006_v54 }
  0x71   : > { %409 = vst [vmem:[#allocation5] sm:$0xff] %v3006_v54  ;;  %410 = vst [vmem:[#allocation5 + $0x8] sm:$0xff] %v3006_v54 }
  0x72   : > { %411 = vst [vmem:[#allocation5 + $0x10] sm:$0xff] %v3006_v54  ;;  %412 = vst [vmem:[#allocation5 + $0x18] sm:$0xff] %v3006_v54 }
  0x73   : > { %413 = vst [vmem:[#allocation5 + $0x20] sm:$0xff] %v3006_v54  ;;  %414 = vst [vmem:[#allocation5 + $0x28] sm:$0xff] %v3006_v54 }
  0x74   : > { %415 = vst [vmem:[#allocation5 + $0x30] sm:$0xff] %v3006_v54  ;;  %416 = vst [vmem:[#allocation5 + $0x38] sm:$0xff] %v3006_v54 }
  0x75   : > { %417 = vst [vmem:[#allocation5 + $0x40] sm:$0xff] %v3006_v54  ;;  %418 = vst [vmem:[#allocation5 + $0x48] sm:$0xff] %v3006_v54 }
  0x76   : > { %419 = vst [vmem:[#allocation5 + $0x50] sm:$0xff] %v3006_v54  ;;  %420 = vst [vmem:[#allocation5 + $0x58] sm:$0xff] %v3006_v54 }
  0x77   : > { %421 = vst [vmem:[#allocation5 + $0x60] sm:$0xff] %v3006_v54  ;;  %422 = vst [vmem:[#allocation5 + $0x68] sm:$0xff] %v3006_v54 }
  0x78   : > { %423 = vst [vmem:[#allocation5 + $0x70] sm:$0xff] %v3006_v54  ;;  %424 = vst [vmem:[#allocation5 + $0x78] sm:$0xff] %v3006_v54 }
  0x79   : > { %425 = vst [vmem:[#allocation5 + $0x80] sm:$0xff] %v3006_v54  ;;  %426 = vst [vmem:[#allocation5 + $0x88] sm:$0xff] %v3006_v54 }
  0x7a   : > { %427 = vst [vmem:[#allocation5 + $0x90] sm:$0xff] %v3006_v54  ;;  %428 = vst [vmem:[#allocation5 + $0x98] sm:$0xff] %v3006_v54 }
  0x7b   : > { %429 = vst [vmem:[#allocation5 + $0xa0] sm:$0xff] %v3006_v54  ;;  %430 = vst [vmem:[#allocation5 + $0xa8] sm:$0xff] %v3006_v54 }
  0x7c   : > { %431 = vst [vmem:[#allocation5 + $0xb0] sm:$0xff] %v3006_v54  ;;  %432 = vst [vmem:[#allocation5 + $0xb8] sm:$0xff] %v3006_v54 }
  0x7d   : > { %433 = vst [vmem:[#allocation5 + $0xc0] sm:$0xff] %v3006_v54  ;;  %434 = vst [vmem:[#allocation5 + $0xc8] sm:$0xff] %v3006_v54 }
  0x7e   : > { %435 = vst [vmem:[#allocation5 + $0xd0] sm:$0xff] %v3006_v54  ;;  %436 = vst [vmem:[#allocation5 + $0xd8] sm:$0xff] %v3006_v54 }
  0x7f   : > { %437 = vst [vmem:[#allocation5 + $0xe0] sm:$0xff] %v3006_v54  ;;  %438 = vst [vmem:[#allocation5 + $0xe8] sm:$0xff] %v3006_v54 }
  0x80   : > { %439 = vst [vmem:[#allocation5 + $0xf0] sm:$0xff] %v3006_v54  ;;  %440 = vst [vmem:[#allocation5 + $0xf8] sm:$0xff] %v3006_v54 }
  0x81   : > { %441 = vst [vmem:[#allocation5 + $0x100] sm:$0xff] %v3006_v54  ;;  %442 = vst [vmem:[#allocation5 + $0x108] sm:$0xff] %v3006_v54 }
  0x82   : > { %443 = vst [vmem:[#allocation5 + $0x110] sm:$0xff] %v3006_v54  ;;  %444 = vst [vmem:[#allocation5 + $0x118] sm:$0xff] %v3006_v54 }
  0x83   : > { %445 = vst [vmem:[#allocation6] sm:$0xff] %v3006_v54  ;;  %446 = vst [vmem:[#allocation6 + $0x8] sm:$0xff] %v3006_v54 }
  0x84   : > { %447 = vst [vmem:[#allocation6 + $0x10] sm:$0xff] %v3006_v54  ;;  %448 = vst [vmem:[#allocation6 + $0x18] sm:$0xff] %v3006_v54 }
  0x85   : > { %449 = vst [vmem:[#allocation6 + $0x20] sm:$0xff] %v3006_v54  ;;  %450 = vst [vmem:[#allocation6 + $0x28] sm:$0xff] %v3006_v54 }
  0x86   : > { %451 = vst [vmem:[#allocation6 + $0x30] sm:$0xff] %v3006_v54  ;;  %452 = vst [vmem:[#allocation6 + $0x38] sm:$0xff] %v3006_v54 }
  0x87   : > { %453 = vst [vmem:[#allocation6 + $0x40] sm:$0xff] %v3006_v54  ;;  %454 = vst [vmem:[#allocation7] sm:$0xff] %v3006_v54 }
  0x88   : > { %455 = vst [vmem:[#allocation7 + $0x8] sm:$0xff] %v3006_v54  ;;  %456 = vst [vmem:[#allocation7 + $0x10] sm:$0xff] %v3006_v54 }
  0x89   : > { %457 = vst [vmem:[#allocation7 + $0x18] sm:$0xff] %v3006_v54  ;;  %458 = vst [vmem:[#allocation7 + $0x20] sm:$0xff] %v3006_v54 }
  0x8a   : > { %459 = vst [vmem:[#allocation7 + $0x28] sm:$0xff] %v3006_v54  ;;  %460 = vst [vmem:[#allocation7 + $0x30] sm:$0xff] %v3006_v54 }
  0x8b   : > { %461 = vst [vmem:[#allocation7 + $0x38] sm:$0xff] %v3006_v54  ;;  %462 = vst [vmem:[#allocation7 + $0x40] sm:$0xff] %v3006_v54 }
  0x8c   : > { %463 = vst [vmem:[#allocation8] sm:$0xff] %v3006_v54  ;;  %464 = vst [vmem:[#allocation8 + $0x8] sm:$0xff] %v3006_v54 }
  0x8d   : > { %465 = vst [vmem:[#allocation8 + $0x10] sm:$0xff] %v3006_v54  ;;  %466 = vst [vmem:[#allocation8 + $0x18] sm:$0xff] %v3006_v54 }
  0x8e   : > { %467 = vst [vmem:[#allocation8 + $0x20] sm:$0xff] %v3006_v54  ;;  %468 = vst [vmem:[#allocation8 + $0x28] sm:$0xff] %v3006_v54 }
  0x8f   : > { %469 = vst [vmem:[#allocation8 + $0x30] sm:$0xff] %v3006_v54  ;;  %470 = vst [vmem:[#allocation8 + $0x38] sm:$0xff] %v3006_v54 }
  0x90   : > { %471 = vst [vmem:[#allocation8 + $0x40] sm:$0xff] %v3006_v54  ;;  %472 = vst [vmem:[#allocation9] sm:$0xff] %v3006_v54 }
  0x91   : > { %473 = vst [vmem:[#allocation9 + $0x8] sm:$0xff] %v3006_v54  ;;  %474 = vst [vmem:[#allocation9 + $0x10] sm:$0xff] %v3006_v54 }
  0x92   : > { %475 = vst [vmem:[#allocation9 + $0x18] sm:$0xff] %v3006_v54  ;;  %476 = vst [vmem:[#allocation9 + $0x20] sm:$0xff] %v3006_v54 }
  0x93   : > { %477 = vst [vmem:[#allocation9 + $0x28] sm:$0xff] %v3006_v54  ;;  %478 = vst [vmem:[#allocation9 + $0x30] sm:$0xff] %v3006_v54 }
  0x94   : > { %479 = vst [vmem:[#allocation9 + $0x38] sm:$0xff] %v3006_v54  ;;  %480 = vst [vmem:[#allocation9 + $0x40] sm:$0xff] %v3006_v54 }
  0x95 PF: > { %v2892_v55 = vld [vmem:[%s3187_s7 + $0x4] ss:$144 sps:$4 sm:$0xff]   ;;  %v2894_v56 = vld [vmem:[%s3187_s7 + $0xc] ss:$144 sps:$4 sm:$0xff]   ;;  %vm810_vm0 = vcmask 1040384   ;;  %v3007_v57 = vmov 0  }
  0x96   : > { %951 = vmatprep.mubr.bf16.mxu0 %v3007_v57  ;;  %992 = vmatprep.mubr.bf16.mxu1 %v3007_v57  ;;  %v2896_v58 = vld [vmem:[%s3187_s7] ss:$144 sps:$4 sm:$0xff]   ;;  %v2897_v59 = vld [vmem:[%s3187_s7 + $0x8] ss:$144 sps:$4 sm:$0xff]   ;;  %v2904_v3 = vld [vmem:[%s3187_s7 + $0x14] ss:$144 sps:$4 sm:$0xff]  }
  0x97   : > { %919 = vmatprep.subr.bf16.mxu0 %v2892_v55  ;;  %v518_v60 = vld [vmem:[%s3187_s7 + $0x120] sm:$0x11]  ;;  %960 = vmatprep.subr.bf16.mxu1 %v2894_v56  ;;  %v519_v62 = vld [vmem:[%s3187_s7 + $0x128] sm:$0x11]  ;;  %v520_v7 = vld [vmem:[%s3187_s7 + $0x130] sm:$0x11] }
  0x98   : > { %v2728_v61 = vcombine.high %v518_v60, %v518_v60  ;;  %v2727_v63 = vcombine.low %v518_v60, %v518_v60  ;;  %920 = vmatpush1.bf16.msra.mxu0 %v2896_v58  ;;  %961 = vmatpush1.bf16.msra.mxu1 %v2897_v59  ;;  %v2730_v0 = vcombine.high %v519_v62, %v519_v62  ;;  %v3386_v5 = vld [vmem:[%s3665_s0] sm:$0xf]  ;;  %v2907_v6 = vld [vmem:[%s3187_s7 + $0x1c] ss:$144 sps:$4 sm:$0xff]   ;;  %vm806_vm1 = vcmask 146432   ;;  %p2849_p10 = scmp.ne.s32.totalorder %s3045_s15, 7 }
  0x99   : > { %v2729_v1 = vcombine.low %v519_v62, %v519_v62  ;;  %v2902_v8 = vld [vmem:[%s3187_s7 + $0x10] ss:$144 sps:$4 sm:$0xff]   ;;  %v521_v9 = vld [vmem:[%s3187_s7 + $0x138] sm:$0x11]  ;;  %v2731_v11 = vcombine.low %v520_v7, %v520_v7  ;;  %v2732_v12 = vcombine.high %v520_v7, %v520_v7  ;;  %v2914_v16 = vld [vmem:[%s3187_s7 + $0x24] ss:$144 sps:$4 sm:$0xff]  }
  0x9a   : > { %2763 = vmatprep.subr.msk.bf16.mxu0 %vm810_vm0, %v2728_v61  ;;  %v812_v2 = vsel %vm810_vm0, %v2727_v63, 0  ;;  %2765 = vmatprep.subr.msk.bf16.mxu1 %vm810_vm0, %v2730_v0  ;;  %v2905_v10 = vld [vmem:[%s3187_s7 + $0x18] ss:$144 sps:$4 sm:$0xff]   ;;  %v2734_v13 = vcombine.high %v521_v9, %v521_v9  ;;  %v2733_v14 = vcombine.low %v521_v9, %v521_v9  ;;  %v2917_v18 = vld [vmem:[%s3187_s7 + $0x2c] ss:$144 sps:$4 sm:$0xff]  }
  0x9b   : > { %v818_v4 = vsel %vm810_vm0, %v2729_v1, 0  ;;  %v824_v15 = vsel %vm810_vm0, %v2731_v11, 0  ;;  %v522_v19 = vld [vmem:[%s3187_s7 + $0x140] sm:$0x11]  ;;  %v523_v20 = vld [vmem:[%s3187_s7 + $0x148] sm:$0x11] }
  0x9c   : > { %922 = vmatpush1.bf16.msra.mxu0 %v812_v2  ;;  %963 = vmatpush1.bf16.msra.mxu1 %v818_v4  ;;  %v830_v17 = vsel %vm810_vm0, %v2733_v14, 0  ;;  %v2912_v21 = vld [vmem:[%s3187_s7 + $0x20] ss:$144 sps:$4 sm:$0xff]   ;;  %v2915_v22 = vld [vmem:[%s3187_s7 + $0x28] ss:$144 sps:$4 sm:$0xff]   ;;  %v2736_v23 = vcombine.high %v522_v19, %v522_v19  ;;  %v2738_v24 = vcombine.high %v523_v20, %v523_v20  ;;  %v2735_v25 = vcombine.low %v522_v19, %v522_v19 }
  0x9d   : > { %1001 = vmatprep.subr.bf16.mxu0 %v2904_v3  ;;  %1042 = vmatprep.subr.bf16.mxu1 %v2907_v6  ;;  %v2737_v26 = vcombine.low %v523_v20, %v523_v20  ;;  %v2924_v27 = vld [vmem:[%s3187_s7 + $0x34] ss:$144 sps:$4 sm:$0xff]   ;;  %v2927_v28 = vld [vmem:[%s3187_s7 + $0x3c] ss:$144 sps:$4 sm:$0xff]   ;;  %v2922_v33 = vld [vmem:[%s3187_s7 + $0x30] ss:$144 sps:$4 sm:$0xff]  }
  0x9e   : > { %v836_v29 = vsel %vm810_vm0, %v2735_v25, 0  ;;  %v524_v31 = vld [vmem:[%s3187_s7 + $0x150] sm:$0x11]  ;;  %v525_v32 = vld [vmem:[%s3187_s7 + $0x158] sm:$0x11] }
  0x9f   : > { %2764 = vmatmul.mubr.msk.bf16.vlgmr.msra.gmra.mrb[0].mxu0 %vm806_vm1, %v3386_v5  ;;  %2766 = vmatmul.mubr.msk.bf16.vlgmr.msra.gmra.mrb[0].mxu1 %vm806_vm1, %v3386_v5  ;;  %v842_v30 = vsel %vm810_vm0, %v2737_v26, 0  ;;  %v2925_v34 = vld [vmem:[%s3187_s7 + $0x38] ss:$144 sps:$4 sm:$0xff]   ;;  %v2740_v35 = vcombine.high %v524_v31, %v524_v31  ;;  %v2742_v36 = vcombine.high %v525_v32, %v525_v32  ;;  %v2739_v37 = vcombine.low %v524_v31, %v524_v31  ;;  %v2934_v39 = vld [vmem:[%s3187_s7 + $0x44] ss:$144 sps:$4 sm:$0xff]  }
  0xa0   : > { %1002 = vmatpush1.bf16.msra.mxu0 %v2902_v8  ;;  %1043 = vmatpush1.bf16.msra.mxu1 %v2905_v10  ;;  %v2741_v38 = vcombine.low %v525_v32, %v525_v32  ;;  %v2937_v42 = vld [vmem:[%s3187_s7 + $0x4c] ss:$144 sps:$4 sm:$0xff]   ;;  %v526_v43 = vld [vmem:[%s3187_s7 + $0x160] sm:$0x11]  ;;  %v2935_v46 = vld [vmem:[%s3187_s7 + $0x48] ss:$144 sps:$4 sm:$0xff]  }
  0xa1   : > { %2767 = vmatprep.subr.msk.bf16.mxu0 %vm810_vm0, %v2732_v12  ;;  %2769 = vmatprep.subr.msk.bf16.mxu1 %vm810_vm0, %v2734_v13  ;;  %v848_v40 = vsel %vm810_vm0, %v2739_v37, 0  ;;  %v527_v44 = vld [vmem:[%s3187_s7 + $0x168] sm:$0x11]  ;;  %v2932_v45 = vld [vmem:[%s3187_s7 + $0x40] ss:$144 sps:$4 sm:$0xff]   ;;  %v2744_v47 = vcombine.high %v526_v43, %v526_v43  ;;  %v2743_v49 = vcombine.low %v526_v43, %v526_v43 }
  0xa2   : > { %1033 = vmatprep.mubr.bf16.mxu0 %v3007_v57  ;;  %1074 = vmatprep.mubr.bf16.mxu1 %v3007_v57  ;;  %v854_v41 = vsel %vm810_vm0, %v2741_v38, 0  ;;  %v2746_v48 = vcombine.high %v527_v44, %v527_v44  ;;  %v2745_v50 = vcombine.low %v527_v44, %v527_v44  ;;  %v2944_v51 = vld [vmem:[%s3187_s7 + $0x54] ss:$144 sps:$4 sm:$0xff]   ;;  %v2947_v54 = vld [vmem:[%s3187_s7 + $0x5c] ss:$144 sps:$4 sm:$0xff]  }
  0xa3   : > { %v860_v52 = vsel %vm810_vm0, %v2743_v49, 0  ;;  %v528_v55 = vld [vmem:[%s3187_s7 + $0x170] sm:$0x11]  ;;  %v529_v56 = vld [vmem:[%s3187_s7 + $0x178] sm:$0x11] }
  0xa4   : > { %1004 = vmatpush1.bf16.msra.mxu0 %v824_v15  ;;  %1045 = vmatpush1.bf16.msra.mxu1 %v830_v17  ;;  %v866_v53 = vsel %vm810_vm0, %v2745_v50, 0  ;;  %v2942_v58 = vld [vmem:[%s3187_s7 + $0x50] ss:$144 sps:$4 sm:$0xff]   ;;  %v2945_v59 = vld [vmem:[%s3187_s7 + $0x58] ss:$144 sps:$4 sm:$0xff]   ;;  %v2748_v60 = vcombine.high %v528_v55, %v528_v55  ;;  %v2750_v61 = vcombine.high %v529_v56, %v529_v56  ;;  %v2747_v62 = vcombine.low %v528_v55, %v528_v55 }
  0xa5   : > { %1083 = vmatprep.subr.bf16.mxu0 %v2914_v16  ;;  %1124 = vmatprep.subr.bf16.mxu1 %v2917_v18  ;;  %v2749_v63 = vcombine.low %v529_v56, %v529_v56  ;;  %v2954_v0 = vld [vmem:[%s3187_s7 + $0x64] ss:$144 sps:$4 sm:$0xff]   ;;  %v2957_v3 = vld [vmem:[%s3187_s7 + $0x6c] ss:$144 sps:$4 sm:$0xff]   ;;  %v2952_v7 = vld [vmem:[%s3187_s7 + $0x60] ss:$144 sps:$4 sm:$0xff]  }
  0xa6   : > { %v872_v1 = vsel %vm810_vm0, %v2747_v62, 0  ;;  %v530_v4 = vld [vmem:[%s3187_s7 + $0x180] sm:$0x11]  ;;  %v531_v6 = vld [vmem:[%s3187_s7 + $0x188] sm:$0x11] }
  0xa7   : > { %2768 = vmatmul.mubr.msk.bf16.vlgmr.msra.gmra.mrb[4].mxu0 %vm806_vm1, %v3386_v5  ;;  %2770 = vmatmul.mubr.msk.bf16.vlgmr.msra.gmra.mrb[4].mxu1 %vm806_vm1, %v3386_v5  ;;  %v878_v2 = vsel %vm810_vm0, %v2749_v63, 0  ;;  %v2955_v8 = vld [vmem:[%s3187_s7 + $0x68] ss:$144 sps:$4 sm:$0xff]   ;;  %v2752_v9 = vcombine.high %v530_v4, %v530_v4  ;;  %v2754_v10 = vcombine.high %v531_v6, %v531_v6  ;;  %v2751_v11 = vcombine.low %v530_v4, %v530_v4  ;;  %v2964_v13 = vld [vmem:[%s3187_s7 + $0x74] ss:$144 sps:$4 sm:$0xff]  }
  0xa8   : > { %1084 = vmatpush1.bf16.msra.mxu0 %v2912_v21  ;;  %1125 = vmatpush1.bf16.msra.mxu1 %v2915_v22  ;;  %v2753_v12 = vcombine.low %v531_v6, %v531_v6  ;;  %v2967_v16 = vld [vmem:[%s3187_s7 + $0x7c] ss:$144 sps:$4 sm:$0xff]   ;;  %v532_v17 = vld [vmem:[%s3187_s7 + $0x190] sm:$0x11]  ;;  %v2965_v20 = vld [vmem:[%s3187_s7 + $0x78] ss:$144 sps:$4 sm:$0xff]  }
  0xa9   : > { %2771 = vmatprep.subr.msk.bf16.mxu0 %vm810_vm0, %v2736_v23  ;;  %2773 = vmatprep.subr.msk.bf16.mxu1 %vm810_vm0, %v2738_v24  ;;  %v884_v14 = vsel %vm810_vm0, %v2751_v11, 0  ;;  %v533_v18 = vld [vmem:[%s3187_s7 + $0x198] sm:$0x11]  ;;  %v2962_v19 = vld [vmem:[%s3187_s7 + $0x70] ss:$144 sps:$4 sm:$0xff]   ;;  %v2756_v21 = vcombine.high %v532_v17, %v532_v17  ;;  %v2755_v23 = vcombine.low %v532_v17, %v532_v17 }
  0xaa   : > { %1115 = vmatprep.mubr.bf16.mxu0 %v3007_v57  ;;  %1156 = vmatprep.mubr.bf16.mxu1 %v3007_v57  ;;  %v890_v15 = vsel %vm810_vm0, %v2753_v12, 0  ;;  %v2758_v22 = vcombine.high %v533_v18, %v533_v18  ;;  %v2757_v24 = vcombine.low %v533_v18, %v533_v18  ;;  %v2974_v25 = vld [vmem:[%s3187_s7 + $0x84] ss:$144 sps:$4 sm:$0xff]   ;;  %v2972_v31 = vld [vmem:[%s3187_s7 + $0x80] ss:$144 sps:$4 sm:$0xff]   ;;  %v3524_v44 = vld [vmem:[#allocation4 + $0x8] sm:$0xff] }
  0xab   : > { %v896_v26 = vsel %vm810_vm0, %v2755_v23, 0  ;;  %v2975_v32 = vld [vmem:[%s3187_s7 + $0x88] ss:$144 sps:$4 sm:$0xff]   ;;  %v1695_v43 = vld [vmem:[#allocation5 + $0x10] sm:$0xff]  ;;  %v1697_v49 = vld [vmem:[#allocation5 + $0x20] sm:$0xff] }
  0xac   : > { %1086 = vmatpush1.bf16.msra.mxu0 %v836_v29  ;;  %1127 = vmatpush1.bf16.msra.mxu1 %v842_v30  ;;  %v534_v29 = vld [vmem:[%s3187_s7 + $0x1a0] sm:$0x11]  ;;  %v535_v30 = vld [vmem:[%s3187_s7 + $0x1a8] sm:$0x11] }
  0xad   : > { %1165 = vmatprep.subr.bf16.mxu0 %v2924_v27  ;;  %1206 = vmatprep.subr.bf16.mxu1 %v2927_v28  ;;  %v902_v27 = vsel %vm810_vm0, %v2757_v24, 0  ;;  %v2977_v28 = vld [vmem:[%s3187_s7 + $0x8c] ss:$144 sps:$4 sm:$0xff]   ;;  %v1701_v62 = vld [vmem:[#allocation5 + $0x40] sm:$0xff] }
  0xae   : > { %v3537_v55 = vld [vmem:[#allocation4 + $0x28] sm:$0xff]  ;;  %v1705_v11 = vld [vmem:[#allocation5 + $0x60] sm:$0xff] }
  0xaf   : > { %2772 = vmatmul.mubr.msk.bf16.vlgmr.msra.gmra.mrb[8].mxu0 %vm806_vm1, %v3386_v5  ;;  %2774 = vmatmul.mubr.msk.bf16.vlgmr.msra.gmra.mrb[8].mxu1 %vm806_vm1, %v3386_v5  ;;  %v1698_v56 = vld [vmem:[#allocation5 + $0x28] sm:$0xff]  ;;  %v1709_v23 = vld [vmem:[#allocation5 + $0x80] sm:$0xff] }
  0xb0   : > { %1166 = vmatpush1.bf16.msra.mxu0 %v2922_v33  ;;  %1207 = vmatpush1.bf16.msra.mxu1 %v2925_v34  ;;  %v2760_v33 = vcombine.high %v534_v29, %v534_v29  ;;  %v2762_v34 = vcombine.high %v535_v30, %v535_v30  ;;  %v1666_v4 = vld [vmem:[#allocation4 + $0x48] sm:$0xff] }
  0xb1   : > { %2775 = vmatprep.subr.msk.bf16.mxu0 %vm810_vm0, %v2740_v35  ;;  %2777 = vmatprep.subr.msk.bf16.mxu1 %vm810_vm0, %v2742_v36  ;;  %v2759_v35 = vcombine.low %v534_v29, %v534_v29  ;;  %v2761_v36 = vcombine.low %v535_v30, %v535_v30  ;;  %v1702_v6 = vld [vmem:[#allocation5 + $0x48] sm:$0xff] }
  0xb2   : > { %1197 = vmatprep.mubr.bf16.mxu0 %v3007_v57  ;;  %1238 = vmatprep.mubr.bf16.mxu1 %v3007_v57  ;;  %v1670_v17 = vld [vmem:[#allocation4 + $0x68] sm:$0xff] }
  0xb3   : > { %v908_v37 = vsel %vm810_vm0, %v2759_v35, 0  ;;  %v914_v38 = vsel %vm810_vm0, %v2761_v36, 0  ;;  %v1706_v18 = vld [vmem:[#allocation5 + $0x68] sm:$0xff]  ;;  %v1713_v35 = vld [vmem:[#allocation5 + $0xa0] sm:$0xff] }
  0xb4   : > { %1168 = vmatpush1.bf16.msra.mxu0 %v848_v40  ;;  %1209 = vmatpush1.bf16.msra.mxu1 %v854_v41  ;;  %v1693_v40 = vld [vmem:[#allocation5] sm:$0xff]  ;;  %v3561_v29 = vld [vmem:[#allocation4 + $0x88] sm:$0xff] }
  0xb5   : > { %1247 = vmatprep.subr.bf16.mxu0 %v2934_v39  ;;  %1288 = vmatprep.subr.bf16.mxu1 %v2937_v42  ;;  %v3519_v39 = vld [vmem:[#allocation4] sm:$0xff]  ;;  %v3522_v42 = vld [vmem:[#allocation4 + $0x10] sm:$0xff]  ;;  %v1710_v30 = vld [vmem:[#allocation5 + $0x88] sm:$0xff] }
  0xb6   : > { %v1729_v41 = vadd.f32 %v1693_v40, %v3519_v39  ;;  %v1715_v40 = vld [vmem:[#allocation5 + $0xb0] sm:$0xff] }
  0xb7   : > { %2776 = vmatmul.mubr.msk.bf16.vlgmr.msra.gmra.mrb[12].mxu0 %vm806_vm1, %v3386_v5  ;;  %2778 = vmatmul.mubr.msk.bf16.vlgmr.msra.gmra.mrb[12].mxu1 %vm806_vm1, %v3386_v5 }
  0xb8   : > { %1248 = vmatpush1.bf16.msra.mxu0 %v2932_v45  ;;  %1289 = vmatpush1.bf16.msra.mxu1 %v2935_v46  ;;  %1765 = vst [vmem:[#allocation5] sm:$0xff] %v1729_v41  ;;  %v1731_v45 = vadd.f32 %v1695_v43, %v3522_v42  ;;  %v1678_v43 = vld [vmem:[#allocation4 + $0xa8] sm:$0xff] }
  0xb9   : > { %2779 = vmatprep.subr.msk.bf16.mxu0 %vm810_vm0, %v2744_v47  ;;  %2781 = vmatprep.subr.msk.bf16.mxu1 %vm810_vm0, %v2746_v48  ;;  %v3528_v47 = vld [vmem:[#allocation4 + $0x18] sm:$0xff] }
  0xba   : > { %1279 = vmatprep.mubr.bf16.mxu0 %v3007_v57  ;;  %1320 = vmatprep.mubr.bf16.mxu1 %v3007_v57  ;;  %v1696_v48 = vld [vmem:[#allocation5 + $0x18] sm:$0xff]  ;;  %1767 = vst [vmem:[#allocation5 + $0x10] sm:$0xff] %v1731_v45 }
  0xbb   : > { %v1732_v50 = vadd.f32 %v1696_v48, %v3528_v47  ;;  %v3564_v45 = vld [vmem:[#allocation4 + $0xb8] sm:$0xff] }
  0xbc   : > { %1250 = vmatpush1.bf16.msra.mxu0 %v860_v52  ;;  %1291 = vmatpush1.bf16.msra.mxu1 %v866_v53  ;;  %v3534_v52 = vld [vmem:[#allocation4 + $0x30] sm:$0xff] }
  0xbd   : > { %1329 = vmatprep.subr.bf16.mxu0 %v2944_v51  ;;  %1370 = vmatprep.subr.bf16.mxu1 %v2947_v54  ;;  %1768 = vst [vmem:[#allocation5 + $0x18] sm:$0xff] %v1732_v50  ;;  %v1699_v53 = vld [vmem:[#allocation5 + $0x30] sm:$0xff]  ;;  %v3567_v50 = vld [vmem:[#allocation4 + $0xc0] sm:$0xff] }
  0xbe   : > { %v1735_v54 = vadd.f32 %v1699_v53, %v3534_v52 }
  0xbf   : > { %2780 = vmatmul.mubr.msk.bf16.vlgmr.msra.gmra.mrb[16].mxu0 %vm806_vm1, %v3386_v5  ;;  %2782 = vmatmul.mubr.msk.bf16.vlgmr.msra.gmra.mrb[16].mxu1 %vm806_vm1, %v3386_v5 }
  0xc0   : > { %1330 = vmatpush1.bf16.msra.mxu0 %v2942_v58  ;;  %1371 = vmatpush1.bf16.msra.mxu1 %v2945_v59  ;;  %v3539_v58 = vld [vmem:[#allocation4 + $0x38] sm:$0xff]  ;;  %v1734_v59 = vadd.f32 %v1698_v56, %v3537_v55  ;;  %1771 = vst [vmem:[#allocation5 + $0x30] sm:$0xff] %v1735_v54 }
  0xc1   : > { %2783 = vmatprep.subr.msk.bf16.mxu0 %vm810_vm0, %v2748_v60  ;;  %2785 = vmatprep.subr.msk.bf16.mxu1 %vm810_vm0, %v2750_v61  ;;  %v1700_v60 = vld [vmem:[#allocation5 + $0x38] sm:$0xff]  ;;  %v3542_v61 = vld [vmem:[#allocation4 + $0x40] sm:$0xff] }
  0xc2   : > { %1361 = vmatprep.mubr.bf16.mxu0 %v3007_v57  ;;  %1402 = vmatprep.mubr.bf16.mxu1 %v3007_v57  ;;  %v1736_v63 = vadd.f32 %v1700_v60, %v3539_v58  ;;  %1770 = vst [vmem:[#allocation5 + $0x28] sm:$0xff] %v1734_v59 }
  0xc4   : > { %1332 = vmatpush1.bf16.msra.mxu0 %v872_v1  ;;  %1373 = vmatpush1.bf16.msra.mxu1 %v878_v2  ;;  %1772 = vst [vmem:[#allocation5 + $0x38] sm:$0xff] %v1736_v63  ;;  %v3546_v1 = vld [vmem:[#allocation4 + $0x50] sm:$0xff] }
  0xc5   : > { %1411 = vmatprep.subr.bf16.mxu0 %v2954_v0  ;;  %1452 = vmatprep.subr.bf16.mxu1 %v2957_v3  ;;  %v1737_v0 = vadd.f32 %v1701_v62, %v3542_v61  ;;  %v1703_v2 = vld [vmem:[#allocation5 + $0x50] sm:$0xff]  ;;  %v2270_v59 = vadd.f32 %v3546_v1, %v3524_v44 }
  0xc6   : > { %v1739_v3 = vadd.f32 %v1703_v2, %v3546_v1  ;;  %v1719_v62 = vld [vmem:[#allocation5 + $0xd0] sm:$0xff]  ;;  %v3579_v2 = vld [vmem:[#allocation4 + $0xc8] sm:$0xff] }
  0xc7   : > { %2784 = vmatmul.mubr.msk.bf16.vlgmr.msra.gmra.mrb[20].mxu0 %vm806_vm1, %v3386_v5  ;;  %2786 = vmatmul.mubr.msk.bf16.vlgmr.msra.gmra.mrb[20].mxu1 %vm806_vm1, %v3386_v5  ;;  %1773 = vst [vmem:[#allocation5 + $0x40] sm:$0xff] %v1737_v0 }
  0xc8   : > { %1412 = vmatpush1.bf16.msra.mxu0 %v2952_v7  ;;  %1453 = vmatpush1.bf16.msra.mxu1 %v2955_v8  ;;  %v3549_v7 = vld [vmem:[#allocation4 + $0x58] sm:$0xff]  ;;  %v1738_v8 = vadd.f32 %v1702_v6, %v1666_v4  ;;  %1775 = vst [vmem:[#allocation5 + $0x50] sm:$0xff] %v1739_v3  ;;  %v1718_v3 = vld [vmem:[#allocation5 + $0xc8] sm:$0xff] }
  0xc9   : > { %2787 = vmatprep.subr.msk.bf16.mxu0 %vm810_vm0, %v2752_v9  ;;  %2789 = vmatprep.subr.msk.bf16.mxu1 %vm810_vm0, %v2754_v10  ;;  %v1704_v9 = vld [vmem:[#allocation5 + $0x58] sm:$0xff]  ;;  %v1669_v10 = vld [vmem:[#allocation4 + $0x60] sm:$0xff]  ;;  %v2271_v63 = vadd.f32 %v3549_v7, %v3522_v42  ;;  %v1754_v6 = vadd.f32 %v1718_v3, %v3579_v2  ;;  %v2410_v42 = vld [vmem:[#allocation7] sm:$0xff] }
  0xca   : > { %1443 = vmatprep.mubr.bf16.mxu0 %v3007_v57  ;;  %1484 = vmatprep.mubr.bf16.mxu1 %v3007_v57  ;;  %v1740_v12 = vadd.f32 %v1704_v9, %v3549_v7  ;;  %1774 = vst [vmem:[#allocation5 + $0x48] sm:$0xff] %v1738_v8  ;;  %v2272_v60 = vadd.f32 %v1669_v10, %v3528_v47  ;;  %v1720_v8 = vld [vmem:[#allocation5 + $0xd8] sm:$0xff]  ;;  %v1685_v7 = vld [vmem:[#allocation4 + $0xe0] sm:$0xff] }
  0xcb   : > { %1790 = vst [vmem:[#allocation5 + $0xc8] sm:$0xff] %v1754_v6 }
  0xcc   : > { %1414 = vmatpush1.bf16.msra.mxu0 %v884_v14  ;;  %1455 = vmatpush1.bf16.msra.mxu1 %v890_v15  ;;  %1776 = vst [vmem:[#allocation5 + $0x58] sm:$0xff] %v1740_v12  ;;  %v3552_v14 = vld [vmem:[#allocation4 + $0x70] sm:$0xff] }
  0xcd   : > { %1493 = vmatprep.subr.bf16.mxu0 %v2964_v13  ;;  %1534 = vmatprep.subr.bf16.mxu1 %v2967_v16  ;;  %v1741_v13 = vadd.f32 %v1705_v11, %v1669_v10  ;;  %v1707_v15 = vld [vmem:[#allocation5 + $0x70] sm:$0xff] }
  0xce   : > { %v1743_v16 = vadd.f32 %v1707_v15, %v3552_v14  ;;  %v2305_v11 = vld [vmem:[#allocation8] sm:$0xff]  ;;  %v2281_v15 = vadd.f32 %v2272_v60, %v1678_v43  ;;  %v2413_v60 = vld [vmem:[#allocation7 + $0x18] sm:$0xff] }
  0xcf   : > { %2788 = vmatmul.mubr.msk.bf16.vlgmr.msra.gmra.mrb[24].mxu0 %vm806_vm1, %v3386_v5  ;;  %2790 = vmatmul.mubr.msk.bf16.vlgmr.msra.gmra.mrb[24].mxu1 %vm806_vm1, %v3386_v5  ;;  %1777 = vst [vmem:[#allocation5 + $0x60] sm:$0xff] %v1741_v13  ;;  %v2383_v13 = vld [vmem:[#allocation6] sm:$0xff]  ;;  %v2422_v3 = vmul.f32 0.97, %v2413_v60  ;;  %v2321_v60 = vld [vmem:[#allocation9 + $0x38] sm:$0xff] }
  0xd0   : > { %1494 = vmatpush1.bf16.msra.mxu0 %v2962_v19  ;;  %1535 = vmatpush1.bf16.msra.mxu1 %v2965_v20  ;;  %v3555_v19 = vld [vmem:[#allocation4 + $0x78] sm:$0xff]  ;;  %v1742_v20 = vadd.f32 %v1706_v18, %v1670_v17  ;;  %1779 = vst [vmem:[#allocation5 + $0x70] sm:$0xff] %v1743_v16  ;;  %v2392_v18 = vmul.f32 0.75, %v2383_v13 }
  0xd1   : > { %2791 = vmatprep.subr.msk.bf16.mxu0 %vm810_vm0, %v2756_v21  ;;  %2793 = vmatprep.subr.msk.bf16.mxu1 %vm810_vm0, %v2758_v22  ;;  %v1708_v21 = vld [vmem:[#allocation5 + $0x78] sm:$0xff]  ;;  %v3557_v22 = vld [vmem:[#allocation4 + $0x80] sm:$0xff]  ;;  %v3589_v6 = vadd.f32 %v3555_v19, %v3534_v52 }
  0xd2   : > { %1525 = vmatprep.mubr.bf16.mxu0 %v3007_v57  ;;  %1566 = vmatprep.mubr.bf16.mxu1 %v3007_v57  ;;  %v1744_v24 = vadd.f32 %v1708_v21, %v3555_v19  ;;  %1778 = vst [vmem:[#allocation5 + $0x68] sm:$0xff] %v1742_v20  ;;  %v2419_v20 = vmul.f32 0.97, %v2410_v42  ;;  %v1721_v21 = vld [vmem:[#allocation5 + $0xe0] sm:$0xff]  ;;  %v1688_v13 = vld [vmem:[#allocation4 + $0xf8] sm:$0xff] }
  0xd3   : > { %v1724_v42 = vld [vmem:[#allocation5 + $0xf8] sm:$0xff] }
  0xd4   : > { %1496 = vmatpush1.bf16.msra.mxu0 %v896_v26  ;;  %1537 = vmatpush1.bf16.msra.mxu1 %v902_v27  ;;  %1780 = vst [vmem:[#allocation5 + $0x78] sm:$0xff] %v1744_v24  ;;  %v1675_v26 = vld [vmem:[#allocation4 + $0x90] sm:$0xff]  ;;  %v1757_v24 = vadd.f32 %v1721_v21, %v1685_v7  ;;  %v1760_v52 = vadd.f32 %v1724_v42, %v1688_v13  ;;  %v2311_v42 = vld [vmem:[#allocation8 + $0x30] sm:$0xff] }
  0xd5   : > { %1575 = vmatprep.subr.bf16.mxu0 %v2974_v25  ;;  %1616 = vmatprep.subr.bf16.mxu1 %v2977_v28  ;;  %v1745_v25 = vadd.f32 %v1709_v23, %v3557_v22  ;;  %v1711_v27 = vld [vmem:[#allocation5 + $0x90] sm:$0xff] }
  0xd6   : > { %v1747_v28 = vadd.f32 %v1711_v27, %v1675_v26  ;;  %1793 = vst [vmem:[#allocation5 + $0xe0] sm:$0xff] %v1757_v24  ;;  %v2387_v24 = vld [vmem:[#allocation6 + $0x20] sm:$0xff]  ;;  %1796 = vst [vmem:[#allocation5 + $0xf8] sm:$0xff] %v1760_v52 }
  0xd7   : > { %2792 = vmatmul.mubr.msk.bf16.vlgmr.msra.gmra.mrb[28].mxu0 %vm806_vm1, %v3386_v5  ;;  %2794 = vmatmul.mubr.msk.bf16.vlgmr.msra.gmra.mrb[28].mxu1 %vm806_vm1, %v3386_v5  ;;  %1781 = vst [vmem:[#allocation5 + $0x80] sm:$0xff] %v1745_v25 }
  0xd8   : > { %1576 = vmatpush1.bf16.msra.mxu0 %v2972_v31  ;;  %1617 = vmatpush1.bf16.msra.mxu1 %v2975_v32  ;;  %v1676_v31 = vld [vmem:[#allocation4 + $0x98] sm:$0xff]  ;;  %v1746_v32 = vadd.f32 %v1710_v30, %v3561_v29  ;;  %1783 = vst [vmem:[#allocation5 + $0x90] sm:$0xff] %v1747_v28 }
  0xd9   : > { %2795 = vmatprep.subr.msk.bf16.mxu0 %vm810_vm0, %v2760_v33  ;;  %2797 = vmatprep.subr.msk.bf16.mxu1 %vm810_vm0, %v2762_v34  ;;  %v1712_v33 = vld [vmem:[#allocation5 + $0x98] sm:$0xff]  ;;  %v1677_v34 = vld [vmem:[#allocation4 + $0xa0] sm:$0xff]  ;;  %v2279_v1 = vadd.f32 %v2270_v59, %v1676_v31 }
  0xda   : > { %1607 = vmatprep.mubr.bf16.mxu0 %v3007_v57  ;;  %1648 = vmatprep.mubr.bf16.mxu1 %v3007_v57  ;;  %v1694_v57 = vld [vmem:[#allocation5 + $0x8] sm:$0xff]  ;;  %v1748_v36 = vadd.f32 %v1712_v33, %v1676_v31  ;;  %1782 = vst [vmem:[#allocation5 + $0x88] sm:$0xff] %v1746_v32  ;;  %v2280_v23 = vadd.f32 %v2271_v63, %v1677_v34  ;;  %v2306_v30 = vld [vmem:[#allocation8 + $0x8] sm:$0xff]  ;;  %v2315_v31 = vld [vmem:[#allocation9 + $0x8] sm:$0xff] }
  0xdb   : > { %v1730_v46 = vadd.f32 %v1694_v57, %v3524_v44  ;;  %v1714_v57 = vld [vmem:[#allocation5 + $0xa8] sm:$0xff]  ;;  %v2314_v44 = vld [vmem:[#allocation9] sm:$0xff]  ;;  %v2288_v28 = vadd.f32 %v2279_v1, %v1685_v7 }
  0xdc   : > { %1578 = vmatpush1.bf16.msra.mxu0 %v908_v37  ;;  %1619 = vmatpush1.bf16.msra.mxu1 %v914_v38  ;;  %v1749_v37 = vadd.f32 %v1713_v35, %v1677_v34  ;;  %1784 = vst [vmem:[#allocation5 + $0x98] sm:$0xff] %v1748_v36  ;;  %v1679_v38 = vld [vmem:[#allocation4 + $0xb0] sm:$0xff]  ;;  %v1750_v48 = vadd.f32 %v1714_v57, %v1678_v43  ;;  %v2384_v32 = vld [vmem:[#allocation6 + $0x8] sm:$0xff]  ;;  %v2386_v59 = vld [vmem:[#allocation6 + $0x18] sm:$0xff] }
  0xdd   : > { %1766 = vst [vmem:[#allocation5 + $0x8] sm:$0xff] %v1730_v46  ;;  %v1751_v41 = vadd.f32 %v1715_v40, %v1679_v38  ;;  %v2269_v46 = vadd.f32 %v1666_v4, %v3519_v39  ;;  %v3574_v39 = vld [vmem:[#allocation4 + $0xd0] sm:$0xff]  ;;  %v1684_v4 = vld [vmem:[#allocation4 + $0xd8] sm:$0xff]  ;;  %v2323_v12 = vadd.f32 %v2314_v44, %v2305_v11  ;;  %v2324_v35 = vadd.f32 %v2315_v31, %v2306_v30  ;;  %v2316_v44 = vld [vmem:[#allocation9 + $0x10] sm:$0xff] }
  0xde   : > { %1785 = vst [vmem:[#allocation5 + $0xa0] sm:$0xff] %v1749_v37  ;;  %1786 = vst [vmem:[#allocation5 + $0xa8] sm:$0xff] %v1750_v48  ;;  %v1755_v0 = vadd.f32 %v1719_v62, %v3574_v39  ;;  %v1756_v10 = vadd.f32 %v1720_v8, %v1684_v4  ;;  %v2853_v36 = vpack.c.bf16 %v2306_v30, %v2305_v11  ;;  %v2393_v37 = vmul.f32 0.75, %v2384_v32  ;;  %v2411_v34 = vld [vmem:[#allocation7 + $0x8] sm:$0xff]  ;;  %v2307_v11 = vld [vmem:[#allocation8 + $0x10] sm:$0xff] }
  0xdf   : > { %2796 = vmatmul.mubr.msk.bf16.vlgmr.msra.gmra.mrb[32].mxu0 %vm806_vm1, %v3386_v5  ;;  %2798 = vmatmul.mubr.msk.bf16.vlgmr.msra.gmra.mrb[32].mxu1 %vm806_vm1, %v3386_v5  ;;  %v3530_v5 = vld [vmem:[#allocation4 + $0x20] sm:$0xff]  ;;  %1787 = vst [vmem:[#allocation5 + $0xb0] sm:$0xff] %v1751_v41  ;;  %v2278_v56 = vadd.f32 %v2269_v46, %v1675_v26  ;;  %2332 = vst [vmem:[#allocation9] sm:$0xff] %v2323_v12  ;;  %v1723_v40 = vld [vmem:[#allocation5 + $0xf0] sm:$0xff]  ;;  %v2297_v57 = vmul.f32 1.1, %v2288_v28  ;;  %v2274_v62 = vadd.f32 %v3552_v14, %v3537_v55 }
  0xe0   : > { %v1733_v51 = vadd.f32 %v1697_v49, %v3530_v5  ;;  %v1716_v49 = vld [vmem:[#allocation5 + $0xb8] sm:$0xff]  ;;  %v2273_v47 = vadd.f32 %v1670_v17, %v3530_v5  ;;  %1791 = vst [vmem:[#allocation5 + $0xd0] sm:$0xff] %v1755_v0  ;;  %1792 = vst [vmem:[#allocation5 + $0xd8] sm:$0xff] %v1756_v10  ;;  %v1687_v5 = vld [vmem:[#allocation4 + $0xf0] sm:$0xff]  ;;  %v2420_v46 = vmul.f32 0.97, %v2411_v34  ;;  %v2325_v14 = vadd.f32 %v2316_v44, %v2307_v11 }
  0xe1   : > { %v1752_v53 = vadd.f32 %v1716_v49, %v3564_v45  ;;  %v2287_v9 = vadd.f32 %v2278_v56, %v1684_v4  ;;  %v1686_v17 = vld [vmem:[#allocation4 + $0xe8] sm:$0xff]  ;;  %v2290_v33 = vadd.f32 %v2281_v15, %v1687_v5  ;;  %v1759_v48 = vadd.f32 %v1723_v40, %v1687_v5  ;;  %2333 = vst [vmem:[#allocation9 + $0x8] sm:$0xff] %v2324_v35  ;;  %v2412_v12 = vld [vmem:[#allocation7 + $0x10] sm:$0xff]  ;;  %v1689_v28 = vld [vmem:[#allocation4 + $0x100] sm:$0xff] }
  0xe2   : > { %1769 = vst [vmem:[#allocation5 + $0x20] sm:$0xff] %v1733_v51  ;;  %v1717_v51 = vld [vmem:[#allocation5 + $0xc0] sm:$0xff]  ;;  %v2282_v26 = vadd.f32 %v2273_v47, %v1679_v38  ;;  %v2308_v41 = vld [vmem:[#allocation8 + $0x18] sm:$0xff]  ;;  %v2289_v43 = vadd.f32 %v2280_v23, %v1686_v17  ;;  %v2317_v38 = vld [vmem:[#allocation9 + $0x18] sm:$0xff]  ;;  %v2402_v63 = vadd.f32 %v2393_v37, %v2297_v57  ;;  %v2395_v0 = vmul.f32 0.75, %v2386_v59 }
  0xe3   : > { %v1753_v54 = vadd.f32 %v1717_v51, %v3567_v50  ;;  %1788 = vst [vmem:[#allocation5 + $0xb8] sm:$0xff] %v1752_v53  ;;  %v2296_v16 = vmul.f32 1.1, %v2287_v9  ;;  %v3008_v51 = vmov 0.0   ;;  %2378 = vst [vmem:[%s3185_s6] sm:$0xff] %v2853_v36  ;;  %v2326_v56 = vadd.f32 %v2317_v38, %v2308_v41  ;;  %v1722_v4 = vld [vmem:[#allocation5 + $0xe8] sm:$0xff]  ;;  %v2385_v47 = vld [vmem:[#allocation6 + $0x10] sm:$0xff] }
  0xe4   : > { %1795 = vst [vmem:[#allocation5 + $0xf0] sm:$0xff] %v1759_v48  ;;  %v1758_v8 = vadd.f32 %v1722_v4, %v1686_v17  ;;  %v2298_v9 = vmul.f32 1.1, %v2289_v43  ;;  %v2429_v1 = vadd.f32 %v2420_v46, %v2402_v63  ;;  %2447 = vst [vmem:[#allocation6 + $0x8] sm:$0xff] %v2402_v63  ;;  %v2854_v10 = vpack.c.bf16 %v2308_v41, %v2307_v11  ;;  %v2318_v23 = vld [vmem:[#allocation9 + $0x20] sm:$0xff]  ;;  %v1725_v30 = vld [vmem:[#allocation5 + $0x100] sm:$0xff] }
  0xe5   : > { %1789 = vst [vmem:[#allocation5 + $0xc0] sm:$0xff] %v1753_v54  ;;  %v2401_v25 = vadd.f32 %v2392_v18, %v2296_v16  ;;  %v2299_v54 = vmul.f32 1.1, %v2290_v33  ;;  %2335 = vst [vmem:[#allocation9 + $0x18] sm:$0xff] %v2326_v56  ;;  %v2394_v7 = vmul.f32 0.75, %v2385_v47  ;;  %v2291_v19 = vadd.f32 %v2282_v26, %v1688_v13  ;;  %v2309_v16 = vld [vmem:[#allocation8 + $0x20] sm:$0xff] }
  0xe6   : > { %1794 = vst [vmem:[#allocation5 + $0xe8] sm:$0xff] %v1758_v8  ;;  %v2421_v15 = vmul.f32 0.97, %v2412_v12  ;;  %v2276_v18 = vadd.f32 %v3557_v22, %v3539_v58  ;;  %vm2438_vm3 = vcmp.ge.f32.partialorder %v2429_v1, 1.25  ;;  %2334 = vst [vmem:[#allocation9 + $0x10] sm:$0xff] %v2325_v14  ;;  %v2414_v26 = vld [vmem:[#allocation7 + $0x20] sm:$0xff]  ;;  %v2327_v58 = vadd.f32 %v2318_v23, %v2309_v16 }
  0xe7   : > { %v2428_v27 = vadd.f32 %v2419_v20, %v2401_v25  ;;  %2446 = vst [vmem:[#allocation6] sm:$0xff] %v2401_v25  ;;  %v2404_v55 = vadd.f32 %v2395_v0, %v2299_v54  ;;  %v2283_v20 = vadd.f32 %v2274_v62, %v3564_v45  ;;  %2379 = vst [vmem:[%s3185_s6 + $0x8] sm:$0xff] %v2854_v10  ;;  %v2456_v25 = vsel %vm2438_vm3, 0.0, %v2429_v1  ;;  %v2310_v36 = vld [vmem:[#allocation8 + $0x28] sm:$0xff]  ;;  %v2319_v37 = vld [vmem:[#allocation9 + $0x28] sm:$0xff] }
  0xe8   : > { %v2841_v5 = vsel %vm2438_vm3, 1.0, %v3008_v51  ;;  %v2403_v17 = vadd.f32 %v2394_v7, %v2298_v9  ;;  %2465 = vst [vmem:[#allocation7 + $0x8] sm:$0xff] %v2456_v25  ;;  %v2396_v22 = vmul.f32 0.75, %v2387_v24  ;;  %v2423_v45 = vmul.f32 0.97, %v2414_v26  ;;  %2336 = vst [vmem:[#allocation9 + $0x20] sm:$0xff] %v2327_v58 }
  0xe9   : > { %vm2437_vm2 = vcmp.ge.f32.partialorder %v2428_v27, 1.25  ;;  %v2431_v21 = vadd.f32 %v2422_v3, %v2404_v55  ;;  %2449 = vst [vmem:[#allocation6 + $0x18] sm:$0xff] %v2404_v55  ;;  %2492 = vst [vmem:[#allocation8 + $0x8] sm:$0xff] %v2841_v5  ;;  %v1761_v35 = vadd.f32 %v1725_v30, %v1689_v28  ;;  %v2277_v34 = vadd.f32 %v3561_v29, %v3542_v61  ;;  %v2388_v57 = vld [vmem:[#allocation6 + $0x28] sm:$0xff]  ;;  %v2415_v46 = vld [vmem:[#allocation7 + $0x28] sm:$0xff] }
  0xea   : > { %v2455_v49 = vsel %vm2437_vm2, 0.0, %v2428_v27  ;;  %v2840_v53 = vsel %vm2437_vm2, 1.0, %v3008_v51  ;;  %v2300_v27 = vmul.f32 1.1, %v2291_v19  ;;  %v2430_v33 = vadd.f32 %v2421_v15, %v2403_v17  ;;  %2448 = vst [vmem:[#allocation6 + $0x10] sm:$0xff] %v2403_v17  ;;  %v1727_v54 = vld [vmem:[#allocation5 + $0x110] sm:$0xff] }
  0xeb   : > { %2464 = vst [vmem:[#allocation7] sm:$0xff] %v2455_v49  ;;  %2491 = vst [vmem:[#allocation8] sm:$0xff] %v2840_v53  ;;  %vm2440_vm4 = vcmp.ge.f32.partialorder %v2431_v21, 1.25  ;;  %v2285_v40 = vadd.f32 %v2276_v18, %v3579_v2  ;;  %v2292_v43 = vadd.f32 %v2283_v20, %v1689_v28  ;;  %v2328_v48 = vadd.f32 %v2319_v37, %v2310_v36  ;;  %v1691_v53 = vld [vmem:[#allocation4 + $0x110] sm:$0xff]  ;;  %v2312_v59 = vld [vmem:[#allocation8 + $0x38] sm:$0xff] }
  0xec   : > { %v2458_v31 = vsel %vm2440_vm4, 0.0, %v2431_v21  ;;  %v2843_v32 = vsel %vm2440_vm4, 1.0, %v3008_v51  ;;  %v2405_v41 = vadd.f32 %v2396_v22, %v2300_v27  ;;  %vm2439_vm5 = vcmp.ge.f32.partialorder %v2430_v33, 1.25  ;;  %1797 = vst [vmem:[#allocation5 + $0x100] sm:$0xff] %v1761_v35  ;;  %v2390_v3 = vld [vmem:[#allocation6 + $0x38] sm:$0xff]  ;;  %v2417_v11 = vld [vmem:[#allocation7 + $0x38] sm:$0xff] }
  0xed   : > { %2467 = vst [vmem:[#allocation7 + $0x18] sm:$0xff] %v2458_v31  ;;  %2494 = vst [vmem:[#allocation8 + $0x18] sm:$0xff] %v2843_v32  ;;  %v2855_v38 = vpack.c.bf16 %v2310_v36, %v2309_v16  ;;  %v2397_v49 = vmul.f32 0.75, %v2388_v57  ;;  %v2457_v56 = vsel %vm2439_vm5, 0.0, %v2430_v33  ;;  %v2842_v61 = vsel %vm2439_vm5, 1.0, %v3008_v51  ;;  %v1690_v44 = vld [vmem:[#allocation4 + $0x108] sm:$0xff] }
  0xee   : > { %v2432_v29 = vadd.f32 %v2423_v45, %v2405_v41  ;;  %2450 = vst [vmem:[#allocation6 + $0x20] sm:$0xff] %v2405_v41  ;;  %v2301_v2 = vmul.f32 1.1, %v2292_v43  ;;  %v2284_v62 = vadd.f32 %v3589_v6, %v3567_v50  ;;  %2466 = vst [vmem:[#allocation7 + $0x10] sm:$0xff] %v2457_v56  ;;  %v2424_v63 = vmul.f32 0.97, %v2415_v46 }
  0xef   : > { %2493 = vst [vmem:[#allocation8 + $0x10] sm:$0xff] %v2842_v61  ;;  %2337 = vst [vmem:[#allocation9 + $0x28] sm:$0xff] %v2328_v48  ;;  %v1763_v0 = vadd.f32 %v1727_v54, %v1691_v53  ;;  %v2294_v8 = vadd.f32 %v2285_v40, %v1691_v53  ;;  %v2330_v9 = vadd.f32 %v2321_v60, %v2312_v59  ;;  %v1726_v47 = vld [vmem:[#allocation5 + $0x108] sm:$0xff]  ;;  %v2399_v50 = vmul.f32 0.75, %v2390_v3  ;;  %v2416_v16 = vld [vmem:[#allocation7 + $0x30] sm:$0xff] }
  0xf0   : > { %2380 = vst [vmem:[%s3185_s6 + $0x10] sm:$0xff] %v2855_v38  ;;  %vm2441_vm6 = vcmp.ge.f32.partialorder %v2432_v29, 1.25  ;;  %v2406_v4 = vadd.f32 %v2397_v49, %v2301_v2  ;;  %v2286_v1 = vadd.f32 %v2277_v34, %v3574_v39  ;;  %v2426_v12 = vmul.f32 0.97, %v2417_v11  ;;  %v2320_v7 = vld [vmem:[#allocation9 + $0x30] sm:$0xff]  ;;  %v2389_v39 = vld [vmem:[#allocation6 + $0x30] sm:$0xff] }
  0xf1   : > { %v2459_v55 = vsel %vm2441_vm6, 0.0, %v2432_v29  ;;  %v2844_v14 = vsel %vm2441_vm6, 1.0, %v3008_v51  ;;  %1799 = vst [vmem:[#allocation5 + $0x110] sm:$0xff] %v1763_v0  ;;  %v2303_v10 = vmul.f32 1.1, %v2294_v8  ;;  %2339 = vst [vmem:[#allocation9 + $0x38] sm:$0xff] %v2330_v9  ;;  %v1762_v13 = vadd.f32 %v1726_v47, %v1690_v44 }
  0xf2   : > { %2468 = vst [vmem:[#allocation7 + $0x20] sm:$0xff] %v2459_v55  ;;  %2495 = vst [vmem:[#allocation8 + $0x20] sm:$0xff] %v2844_v14  ;;  %v2433_v6 = vadd.f32 %v2424_v63, %v2406_v4  ;;  %v2293_v15 = vadd.f32 %v2284_v62, %v1690_v44  ;;  %v2329_v52 = vadd.f32 %v2320_v7, %v2311_v42  ;;  %v1692_v18 = vld [vmem:[#allocation4 + $0x118] sm:$0xff]  ;;  %v2398_v21 = vmul.f32 0.75, %v2389_v39  ;;  %v2313_v26 = vld [vmem:[#allocation8 + $0x40] sm:$0xff] }
  0xf3   : > { %2451 = vst [vmem:[#allocation6 + $0x28] sm:$0xff] %v2406_v4  ;;  %v2856_v19 = vpack.c.bf16 %v2312_v59, %v2311_v42  ;;  %v2408_v20 = vadd.f32 %v2399_v50, %v2303_v10  ;;  %1798 = vst [vmem:[#allocation5 + $0x108] sm:$0xff] %v1762_v13  ;;  %v2425_v23 = vmul.f32 0.97, %v2416_v16  ;;  %v1728_v24 = vld [vmem:[#allocation5 + $0x118] sm:$0xff]  ;;  %v2295_v58 = vadd.f32 %v2286_v1, %v1692_v18  ;;  %v2391_v45 = vld [vmem:[#allocation6 + $0x40] sm:$0xff] }
  0xf4   : > { %vm2442_vm7 = vcmp.ge.f32.partialorder %v2433_v6, 1.25  ;;  %v2302_v17 = vmul.f32 1.1, %v2293_v15  ;;  %2338 = vst [vmem:[#allocation9 + $0x30] sm:$0xff] %v2329_v52  ;;  %v1764_v27 = vadd.f32 %v1728_v24, %v1692_v18  ;;  %v2322_v22 = vld [vmem:[#allocation9 + $0x40] sm:$0xff]  ;;  %v2418_v30 = vld [vmem:[#allocation7 + $0x40] sm:$0xff]  ;;  %v2857_v33 = vpack.c.bf16 %v2313_v26, %v2313_v26 }
  0xf5   : > { %v2460_v25 = vsel %vm2442_vm7, 0.0, %v2433_v6  ;;  %v2845_v5 = vsel %vm2442_vm7, 1.0, %v3008_v51  ;;  %2381 = vst [vmem:[%s3185_s6 + $0x18] sm:$0xff] %v2856_v19  ;;  %v2435_v28 = vadd.f32 %v2426_v12, %v2408_v20  ;;  %2453 = vst [vmem:[#allocation6 + $0x38] sm:$0xff] %v2408_v20  ;;  %v2331_v32 = vadd.f32 %v2322_v22, %v2313_v26  ;;  %v1801_v53 = vld [vmem:[#allocation2] sm:$0xff]  ;;  %v1803_v54 = vld [vmem:[#allocation2 + $0x10] sm:$0xff] }
  0xf6   : > { %2469 = vst [vmem:[#allocation7 + $0x28] sm:$0xff] %v2460_v25  ;;  %2496 = vst [vmem:[#allocation8 + $0x28] sm:$0xff] %v2845_v5  ;;  %v2407_v31 = vadd.f32 %v2398_v21, %v2302_v17  ;;  %v2400_v35 = vmul.f32 0.75, %v2391_v45  ;;  %v2304_v36 = vmul.f32 1.1, %v2295_v58  ;;  %v1909_v56 = vld [vmem:[#allocation3] sm:$0xff] }
  0xf7   : > { %1800 = vst [vmem:[#allocation5 + $0x118] sm:$0xff] %v1764_v27  ;;  %vm2444_vm8 = vcmp.ge.f32.partialorder %v2435_v28, 1.25  ;;  %v2427_v37 = vmul.f32 0.97, %v2418_v30  ;;  %2340 = vst [vmem:[#allocation9 + $0x40] sm:$0xff] %v2331_v32  ;;  %v1802_v61 = vld [vmem:[#allocation2 + $0x8] sm:$0xff] }
  0xf8   : > { %v2462_v34 = vsel %vm2444_vm8, 0.0, %v2435_v28  ;;  %v2847_v40 = vsel %vm2444_vm8, 1.0, %v3008_v51  ;;  %v2434_v41 = vadd.f32 %v2425_v23, %v2407_v31  ;;  %2452 = vst [vmem:[#allocation6 + $0x30] sm:$0xff] %v2407_v31  ;;  %2382 = vst [vmem:[%s3185_s6 + $0x20] sm:$0xf] %v2857_v33  ;;  %v2409_v43 = vadd.f32 %v2400_v35, %v2304_v36  ;;  %v1804_v29 = vld [vmem:[#allocation2 + $0x18] sm:$0xff] }
  0xf9   : > { %2471 = vst [vmem:[#allocation7 + $0x38] sm:$0xff] %v2462_v34  ;;  %2498 = vst [vmem:[#allocation8 + $0x38] sm:$0xff] %v2847_v40  ;;  %v1911_v2 = vld [vmem:[#allocation3 + $0x10] sm:$0xff]  ;;  %v1910_v59 = vld [vmem:[#allocation3 + $0x8] sm:$0xff]  ;;  %v1837_v60 = vmul.f32 0.75, %v1801_v53  ;;  %v1839_v62 = vmul.f32 0.75, %v1803_v54 }
  0xfa   : > { %vm2443_vm9 = vcmp.ge.f32.partialorder %v2434_v41, 1.25  ;;  %v2436_v48 = vadd.f32 %v2427_v37, %v2409_v43  ;;  %2454 = vst [vmem:[#allocation6 + $0x40] sm:$0xff] %v2409_v43  ;;  %v1912_v63 = vld [vmem:[#allocation3 + $0x18] sm:$0xff]  ;;  %v1945_v0 = vmul.f32 0.97, %v1909_v56  ;;  %v1838_v3 = vmul.f32 0.75, %v1802_v61 }
  0xfb   : > { %v2461_v57 = vsel %vm2443_vm9, 0.0, %v2434_v41  ;;  %v2846_v46 = vsel %vm2443_vm9, 1.0, %v3008_v51  ;;  %v1840_v4 = vmul.f32 0.75, %v1804_v29  ;;  %v1947_v8 = vmul.f32 0.97, %v1911_v2  ;;  %v1805_v11 = vld [vmem:[#allocation2 + $0x20] sm:$0xff] }
  0xfc   : > { %2470 = vst [vmem:[#allocation7 + $0x30] sm:$0xff] %v2461_v57  ;;  %2497 = vst [vmem:[#allocation8 + $0x30] sm:$0xff] %v2846_v46  ;;  %vm2445_vm10 = vcmp.ge.f32.partialorder %v2436_v48, 1.25  ;;  %v1946_v9 = vmul.f32 0.97, %v1910_v59  ;;  %v1807_v44 = vld [vmem:[#allocation2 + $0x30] sm:$0xff] }
  0xfd   : > { %v2463_v38 = vsel %vm2445_vm10, 0.0, %v2436_v48  ;;  %v2848_v49 = vsel %vm2445_vm10, 1.0, %v3008_v51  ;;  %v1948_v55 = vmul.f32 0.97, %v1912_v63  ;;  %v1913_v14 = vld [vmem:[#allocation3 + $0x20] sm:$0xff]  ;;  %v1915_v50 = vld [vmem:[#allocation3 + $0x30] sm:$0xff] }
  0xfe   : > { %2472 = vst [vmem:[#allocation7 + $0x40] sm:$0xff] %v2463_v38  ;;  %2499 = vst [vmem:[#allocation8 + $0x40] sm:$0xff] %v2848_v49  ;;  %v1806_v42 = vld [vmem:[#allocation2 + $0x28] sm:$0xff]  ;;  %v1841_v16 = vmul.f32 0.75, %v1805_v11  ;;  %v1843_v18 = vmul.f32 0.75, %v1807_v44  ;;  %v1808_v20 = vld [vmem:[#allocation2 + $0x38] sm:$0xff] }
  0xff   : > { %v1914_v7 = vld [vmem:[#allocation3 + $0x28] sm:$0xff]  ;;  %v1916_v21 = vld [vmem:[#allocation3 + $0x38] sm:$0xff]  ;;  %v1949_v17 = vmul.f32 0.97, %v1913_v14  ;;  %v1951_v27 = vmul.f32 0.97, %v1915_v50 }
 0x100   : > { %v1842_v58 = vmul.f32 0.75, %v1806_v42  ;;  %v1950_v22 = vmul.f32 0.97, %v1914_v7  ;;  %v1844_v45 = vmul.f32 0.75, %v1808_v20  ;;  %v1952_v30 = vmul.f32 0.97, %v1916_v21 }
 0x101   : > { %v1809_v36 = vld [vmem:[#allocation2 + $0x40] sm:$0xff]  ;;  %v1811_v34 = vld [vmem:[#allocation2 + $0x50] sm:$0xff]  ;;  %v1810_v29 = vld [vmem:[#allocation2 + $0x48] sm:$0xff] }
 0x102   : > { %v1917_v37 = vld [vmem:[#allocation3 + $0x40] sm:$0xff]  ;;  %v1919_v40 = vld [vmem:[#allocation3 + $0x50] sm:$0xff]  ;;  %v1845_v61 = vmul.f32 0.75, %v1809_v36  ;;  %v1918_v2 = vld [vmem:[#allocation3 + $0x48] sm:$0xff]  ;;  %v1846_v50 = vmul.f32 0.75, %v1810_v29 }
 0x103   : > { %v1924_v36 = vld [vmem:[#allocation3 + $0x78] sm:$0xff] }
 0x172   : > { %v953_v47 = vpop.f32.mrb[0].mxu0  ;;  %v994_v1 = vpop.f32.mrb[0].mxu1 }
 0x173   : > { %v1873_v6 = vadd.f32 %v1837_v60, %v953_v47  ;;  %v1875_v10 = vadd.f32 %v1839_v62, %v994_v1  ;;  %v955_v12 = vpop.f32.mrb[1].mxu0  ;;  %v996_v13 = vpop.f32.mrb[1].mxu1  ;;  %v1847_v47 = vmul.f32 0.75, %v1811_v34  ;;  %v1955_v1 = vmul.f32 0.97, %v1919_v40 }
 0x174   : > { %v1874_v15 = vadd.f32 %v1838_v3, %v955_v12  ;;  %v1876_v52 = vadd.f32 %v1840_v4, %v996_v13  ;;  %v957_v19 = vpop.f32.mrb[2].mxu0  ;;  %v998_v39 = vpop.f32.mrb[2].mxu1  ;;  %v1812_v3 = vld [vmem:[#allocation2 + $0x58] sm:$0xff] }
 0x175   : > { %v1981_v23 = vadd.f32 %v1945_v0, %v1873_v6  ;;  %2053 = vst [vmem:[#allocation2] sm:$0xff] %v1873_v6  ;;  %v1983_v24 = vadd.f32 %v1947_v8, %v1875_v10  ;;  %2055 = vst [vmem:[#allocation2 + $0x10] sm:$0xff] %v1875_v10  ;;  %v958_v25 = vpop.f32.mrb[3].mxu0  ;;  %v999_v5 = vpop.f32.mrb[3].mxu1  ;;  %v1953_v0 = vmul.f32 0.97, %v1917_v37 }
 0x176   : > { %v1982_v26 = vadd.f32 %v1946_v9, %v1874_v15  ;;  %2054 = vst [vmem:[#allocation2 + $0x8] sm:$0xff] %v1874_v15  ;;  %v1984_v28 = vadd.f32 %v1948_v55, %v1876_v52  ;;  %2056 = vst [vmem:[#allocation2 + $0x18] sm:$0xff] %v1876_v52  ;;  %v1920_v4 = vld [vmem:[#allocation3 + $0x58] sm:$0xff]  ;;  %v1954_v6 = vmul.f32 0.97, %v1918_v2  ;;  %v1848_v10 = vmul.f32 0.75, %v1812_v3 }
 0x177   : > { %vm2017_vm11 = vcmp.ge.f32.partialorder %v1981_v23, 1.25  ;;  %vm2019_vm12 = vcmp.ge.f32.partialorder %v1983_v24, 1.25  ;;  %v1956_v12 = vmul.f32 0.97, %v1920_v4  ;;  %v1813_v52 = vld [vmem:[#allocation2 + $0x60] sm:$0xff]  ;;  %v1815_v39 = vld [vmem:[#allocation2 + $0x70] sm:$0xff] }
 0x178   : > { %v2089_v31 = vsel %vm2017_vm11, 0.0, %v1981_v23  ;;  %v2799_v32 = vsel %vm2017_vm11, 1.0, %v3008_v51  ;;  %v2091_v33 = vsel %vm2019_vm12, 0.0, %v1983_v24  ;;  %v2801_v35 = vsel %vm2019_vm12, 1.0, %v3008_v51  ;;  %v1921_v19 = vld [vmem:[#allocation3 + $0x60] sm:$0xff] }
 0x179   : > { %2125 = vst [vmem:[#allocation3] sm:$0xff] %v2089_v31  ;;  %2233 = vst [vmem:[#allocation4] sm:$0xff] %v2799_v32  ;;  %vm2018_vm13 = vcmp.ge.f32.partialorder %v1982_v26, 1.25  ;;  %vm2020_vm14 = vcmp.ge.f32.partialorder %v1984_v28, 1.25 }
 0x17a   : > { %2127 = vst [vmem:[#allocation3 + $0x10] sm:$0xff] %v2091_v33  ;;  %2235 = vst [vmem:[#allocation4 + $0x10] sm:$0xff] %v2801_v35  ;;  %v2090_v41 = vsel %vm2018_vm13, 0.0, %v1982_v26  ;;  %v2800_v43 = vsel %vm2018_vm13, 1.0, %v3008_v51  ;;  %v2092_v57 = vsel %vm2020_vm14, 0.0, %v1984_v28  ;;  %v2802_v46 = vsel %vm2020_vm14, 1.0, %v3008_v51 }
 0x17b   : > { %v1035_v48 = vpop.f32.mrb[4].mxu0  ;;  %v1076_v38 = vpop.f32.mrb[4].mxu1  ;;  %2126 = vst [vmem:[#allocation3 + $0x8] sm:$0xff] %v2090_v41  ;;  %2234 = vst [vmem:[#allocation4 + $0x8] sm:$0xff] %v2800_v43  ;;  %v1849_v28 = vmul.f32 0.75, %v1813_v52  ;;  %v1816_v35 = vld [vmem:[#allocation2 + $0x78] sm:$0xff] }
 0x17c   : > { %2128 = vst [vmem:[#allocation3 + $0x18] sm:$0xff] %v2092_v57  ;;  %2236 = vst [vmem:[#allocation4 + $0x18] sm:$0xff] %v2802_v46  ;;  %v1877_v49 = vadd.f32 %v1841_v16, %v1035_v48  ;;  %v1879_v53 = vadd.f32 %v1843_v18, %v1076_v38  ;;  %v1037_v54 = vpop.f32.mrb[5].mxu0  ;;  %v1078_v56 = vpop.f32.mrb[5].mxu1  ;;  %v1923_v16 = vld [vmem:[#allocation3 + $0x70] sm:$0xff]  ;;  %v1851_v43 = vmul.f32 0.75, %v1815_v39 }
 0x17d   : > { %v1878_v59 = vadd.f32 %v1842_v58, %v1037_v54  ;;  %v1880_v60 = vadd.f32 %v1844_v45, %v1078_v56  ;;  %v1039_v62 = vpop.f32.mrb[6].mxu0  ;;  %v1080_v63 = vpop.f32.mrb[6].mxu1  ;;  %v1814_v58 = vld [vmem:[#allocation2 + $0x68] sm:$0xff]  ;;  %v1957_v33 = vmul.f32 0.97, %v1921_v19  ;;  %v1928_v52 = vld [vmem:[#allocation3 + $0x98] sm:$0xff] }
 0x17e   : > { %v1985_v8 = vadd.f32 %v1949_v17, %v1877_v49  ;;  %2057 = vst [vmem:[#allocation2 + $0x20] sm:$0xff] %v1877_v49  ;;  %v1987_v9 = vadd.f32 %v1951_v27, %v1879_v53  ;;  %2059 = vst [vmem:[#allocation2 + $0x30] sm:$0xff] %v1879_v53  ;;  %v1040_v11 = vpop.f32.mrb[7].mxu0  ;;  %v1081_v44 = vpop.f32.mrb[7].mxu1  ;;  %v1959_v57 = vmul.f32 0.97, %v1923_v16 }
 0x17f   : > { %v1986_v55 = vadd.f32 %v1950_v22, %v1878_v59  ;;  %2058 = vst [vmem:[#allocation2 + $0x28] sm:$0xff] %v1878_v59  ;;  %v1988_v14 = vadd.f32 %v1952_v30, %v1880_v60  ;;  %2060 = vst [vmem:[#allocation2 + $0x38] sm:$0xff] %v1880_v60  ;;  %v1922_v22 = vld [vmem:[#allocation3 + $0x68] sm:$0xff]  ;;  %v1850_v38 = vmul.f32 0.75, %v1814_v58  ;;  %v1852_v53 = vmul.f32 0.75, %v1816_v35  ;;  %v1817_v59 = vld [vmem:[#allocation2 + $0x80] sm:$0xff] }
 0x180   : > { %vm2021_vm15 = vcmp.ge.f32.partialorder %v1985_v8, 1.25  ;;  %vm2023_vm0 = vcmp.ge.f32.partialorder %v1987_v9, 1.25  ;;  %v1958_v49 = vmul.f32 0.97, %v1922_v22  ;;  %v1960_v54 = vmul.f32 0.97, %v1924_v36 }
 0x181   : > { %v2093_v13 = vsel %vm2021_vm15, 0.0, %v1985_v8  ;;  %v2803_v42 = vsel %vm2021_vm15, 1.0, %v3008_v51  ;;  %v2095_v7 = vsel %vm2023_vm0, 0.0, %v1987_v9  ;;  %v2805_v15 = vsel %vm2023_vm0, 1.0, %v3008_v51  ;;  %v1925_v60 = vld [vmem:[#allocation3 + $0x80] sm:$0xff]  ;;  %v1819_v62 = vld [vmem:[#allocation2 + $0x90] sm:$0xff] }
 0x182   : > { %2129 = vst [vmem:[#allocation3 + $0x20] sm:$0xff] %v2093_v13  ;;  %2237 = vst [vmem:[#allocation4 + $0x20] sm:$0xff] %v2803_v42  ;;  %vm2022_vm1 = vcmp.ge.f32.partialorder %v1986_v55, 1.25  ;;  %vm2024_vm2 = vcmp.ge.f32.partialorder %v1988_v14, 1.25  ;;  %v1117_v24 = vpop.f32.mrb[8].mxu0  ;;  %v1158_v25 = vpop.f32.mrb[8].mxu1 }
 0x183   : > { %2131 = vst [vmem:[#allocation3 + $0x30] sm:$0xff] %v2095_v7  ;;  %2239 = vst [vmem:[#allocation4 + $0x30] sm:$0xff] %v2805_v15  ;;  %v2094_v18 = vsel %vm2022_vm1, 0.0, %v1986_v55  ;;  %v2804_v20 = vsel %vm2022_vm1, 1.0, %v3008_v51  ;;  %v2096_v21 = vsel %vm2024_vm2, 0.0, %v1988_v14  ;;  %v2806_v23 = vsel %vm2024_vm2, 1.0, %v3008_v51 }
 0x184   : > { %2130 = vst [vmem:[#allocation3 + $0x28] sm:$0xff] %v2094_v18  ;;  %2238 = vst [vmem:[#allocation4 + $0x28] sm:$0xff] %v2804_v20  ;;  %v1881_v5 = vadd.f32 %v1845_v61, %v1117_v24  ;;  %v1883_v17 = vadd.f32 %v1847_v47, %v1158_v25  ;;  %v1119_v27 = vpop.f32.mrb[9].mxu0  ;;  %v1160_v26 = vpop.f32.mrb[9].mxu1  ;;  %v1927_v63 = vld [vmem:[#allocation3 + $0x90] sm:$0xff]  ;;  %v1853_v14 = vmul.f32 0.75, %v1817_v59 }
 0x185   : > { %2132 = vst [vmem:[#allocation3 + $0x38] sm:$0xff] %v2096_v21  ;;  %2240 = vst [vmem:[#allocation4 + $0x38] sm:$0xff] %v2806_v23  ;;  %v1882_v45 = vadd.f32 %v1846_v50, %v1119_v27  ;;  %v1884_v30 = vadd.f32 %v1848_v10, %v1160_v26  ;;  %v1121_v31 = vpop.f32.mrb[10].mxu0  ;;  %v1162_v32 = vpop.f32.mrb[10].mxu1  ;;  %v1818_v50 = vld [vmem:[#allocation2 + $0x88] sm:$0xff]  ;;  %v1820_v15 = vld [vmem:[#allocation2 + $0x98] sm:$0xff] }
 0x186   : > { %v1989_v37 = vadd.f32 %v1953_v0, %v1881_v5  ;;  %2061 = vst [vmem:[#allocation2 + $0x40] sm:$0xff] %v1881_v5  ;;  %v1991_v34 = vadd.f32 %v1955_v1, %v1883_v17  ;;  %2063 = vst [vmem:[#allocation2 + $0x50] sm:$0xff] %v1883_v17  ;;  %v1122_v40 = vpop.f32.mrb[11].mxu0  ;;  %v1163_v41 = vpop.f32.mrb[11].mxu1  ;;  %v1961_v7 = vmul.f32 0.97, %v1925_v60 }
 0x187   : > { %v1990_v46 = vadd.f32 %v1954_v6, %v1882_v45  ;;  %2062 = vst [vmem:[#allocation2 + $0x48] sm:$0xff] %v1882_v45  ;;  %v1992_v48 = vadd.f32 %v1956_v12, %v1884_v30  ;;  %2064 = vst [vmem:[#allocation2 + $0x58] sm:$0xff] %v1884_v30  ;;  %v1926_v6 = vld [vmem:[#allocation3 + $0x88] sm:$0xff]  ;;  %v1855_v20 = vmul.f32 0.75, %v1819_v62  ;;  %v1963_v21 = vmul.f32 0.97, %v1927_v63 }
 0x188   : > { %vm2025_vm3 = vcmp.ge.f32.partialorder %v1989_v37, 1.25  ;;  %vm2027_vm4 = vcmp.ge.f32.partialorder %v1991_v34, 1.25  ;;  %v1854_v25 = vmul.f32 0.75, %v1818_v50  ;;  %v1962_v5 = vmul.f32 0.97, %v1926_v6  ;;  %v1821_v45 = vld [vmem:[#allocation2 + $0xa0] sm:$0xff] }
 0x189   : > { %v2097_v56 = vsel %vm2025_vm3, 0.0, %v1989_v37  ;;  %v2807_v61 = vsel %vm2025_vm3, 1.0, %v3008_v51  ;;  %v2099_v29 = vsel %vm2027_vm4, 0.0, %v1991_v34  ;;  %v2809_v2 = vsel %vm2027_vm4, 1.0, %v3008_v51  ;;  %v1929_v30 = vld [vmem:[#allocation3 + $0xa0] sm:$0xff]  ;;  %v1823_v31 = vld [vmem:[#allocation2 + $0xb0] sm:$0xff] }
 0x18a   : > { %2133 = vst [vmem:[#allocation3 + $0x40] sm:$0xff] %v2097_v56  ;;  %2241 = vst [vmem:[#allocation4 + $0x40] sm:$0xff] %v2807_v61  ;;  %vm2026_vm5 = vcmp.ge.f32.partialorder %v1990_v46, 1.25  ;;  %vm2028_vm6 = vcmp.ge.f32.partialorder %v1992_v48, 1.25  ;;  %v1199_v9 = vpop.f32.mrb[12].mxu0  ;;  %v1240_v11 = vpop.f32.mrb[12].mxu1 }
 0x18b   : > { %2135 = vst [vmem:[#allocation3 + $0x50] sm:$0xff] %v2099_v29  ;;  %2243 = vst [vmem:[#allocation4 + $0x50] sm:$0xff] %v2809_v2  ;;  %v2098_v0 = vsel %vm2026_vm5, 0.0, %v1990_v46  ;;  %v2808_v3 = vsel %vm2026_vm5, 1.0, %v3008_v51  ;;  %v2100_v4 = vsel %vm2028_vm6, 0.0, %v1992_v48  ;;  %v2810_v8 = vsel %vm2028_vm6, 1.0, %v3008_v51 }
 0x18c   : > { %2134 = vst [vmem:[#allocation3 + $0x48] sm:$0xff] %v2098_v0  ;;  %2242 = vst [vmem:[#allocation4 + $0x48] sm:$0xff] %v2808_v3  ;;  %v1885_v44 = vadd.f32 %v1849_v28, %v1199_v9  ;;  %v1887_v47 = vadd.f32 %v1851_v43, %v1240_v11  ;;  %v1201_v1 = vpop.f32.mrb[13].mxu0  ;;  %v1242_v55 = vpop.f32.mrb[13].mxu1  ;;  %v1856_v17 = vmul.f32 0.75, %v1820_v15  ;;  %v1931_v32 = vld [vmem:[#allocation3 + $0xb0] sm:$0xff] }
 0x18d   : > { %2136 = vst [vmem:[#allocation3 + $0x58] sm:$0xff] %v2100_v4  ;;  %2244 = vst [vmem:[#allocation4 + $0x58] sm:$0xff] %v2810_v8  ;;  %v1886_v10 = vadd.f32 %v1850_v38, %v1201_v1  ;;  %v1888_v12 = vadd.f32 %v1852_v53, %v1242_v55  ;;  %v1203_v13 = vpop.f32.mrb[14].mxu0  ;;  %v1244_v42 = vpop.f32.mrb[14].mxu1  ;;  %v1964_v27 = vmul.f32 0.97, %v1928_v52 }
 0x18e   : > { %v1993_v19 = vadd.f32 %v1957_v33, %v1885_v44  ;;  %2065 = vst [vmem:[#allocation2 + $0x60] sm:$0xff] %v1885_v44  ;;  %v1995_v39 = vadd.f32 %v1959_v57, %v1887_v47  ;;  %2067 = vst [vmem:[#allocation2 + $0x70] sm:$0xff] %v1887_v47  ;;  %v1204_v16 = vpop.f32.mrb[15].mxu0  ;;  %v1245_v18 = vpop.f32.mrb[15].mxu1  ;;  %v1857_v48 = vmul.f32 0.75, %v1821_v45  ;;  %v1822_v38 = vld [vmem:[#allocation2 + $0xa8] sm:$0xff] }
 0x18f   : > { %v1994_v23 = vadd.f32 %v1958_v49, %v1886_v10  ;;  %2066 = vst [vmem:[#allocation2 + $0x68] sm:$0xff] %v1886_v10  ;;  %v1996_v24 = vadd.f32 %v1960_v54, %v1888_v12  ;;  %2068 = vst [vmem:[#allocation2 + $0x78] sm:$0xff] %v1888_v12  ;;  %v1930_v49 = vld [vmem:[#allocation3 + $0xa8] sm:$0xff]  ;;  %v1965_v29 = vmul.f32 0.97, %v1929_v30  ;;  %v1824_v2 = vld [vmem:[#allocation2 + $0xb8] sm:$0xff] }
 0x190   : > { %vm2029_vm7 = vcmp.ge.f32.partialorder %v1993_v19, 1.25  ;;  %vm2031_vm8 = vcmp.ge.f32.partialorder %v1995_v39, 1.25  ;;  %v1932_v59 = vld [vmem:[#allocation3 + $0xb8] sm:$0xff]  ;;  %v1859_v3 = vmul.f32 0.75, %v1823_v31  ;;  %v1967_v4 = vmul.f32 0.97, %v1931_v32 }
 0x191   : > { %v2101_v26 = vsel %vm2029_vm7, 0.0, %v1993_v19  ;;  %v2811_v28 = vsel %vm2029_vm7, 1.0, %v3008_v51  ;;  %v2103_v58 = vsel %vm2031_vm8, 0.0, %v1995_v39  ;;  %v2813_v22 = vsel %vm2031_vm8, 1.0, %v3008_v51  ;;  %v1825_v10 = vld [vmem:[#allocation2 + $0xc0] sm:$0xff]  ;;  %v1827_v13 = vld [vmem:[#allocation2 + $0xd0] sm:$0xff] }
 0x192   : > { %2137 = vst [vmem:[#allocation3 + $0x60] sm:$0xff] %v2101_v26  ;;  %2245 = vst [vmem:[#allocation4 + $0x60] sm:$0xff] %v2811_v28  ;;  %vm2030_vm9 = vcmp.ge.f32.partialorder %v1994_v23, 1.25  ;;  %vm2032_vm10 = vcmp.ge.f32.partialorder %v1996_v24, 1.25  ;;  %v1281_v34 = vpop.f32.mrb[16].mxu0  ;;  %v1322_v40 = vpop.f32.mrb[16].mxu1 }
 0x193   : > { %2139 = vst [vmem:[#allocation3 + $0x70] sm:$0xff] %v2103_v58  ;;  %2247 = vst [vmem:[#allocation4 + $0x70] sm:$0xff] %v2813_v22  ;;  %v2102_v33 = vsel %vm2030_vm9, 0.0, %v1994_v23  ;;  %v2812_v35 = vsel %vm2030_vm9, 1.0, %v3008_v51  ;;  %v2104_v36 = vsel %vm2032_vm10, 0.0, %v1996_v24  ;;  %v2814_v37 = vsel %vm2032_vm10, 1.0, %v3008_v51 }
 0x194   : > { %2138 = vst [vmem:[#allocation3 + $0x68] sm:$0xff] %v2102_v33  ;;  %2246 = vst [vmem:[#allocation4 + $0x68] sm:$0xff] %v2812_v35  ;;  %v1889_v41 = vadd.f32 %v1853_v14, %v1281_v34  ;;  %v1891_v43 = vadd.f32 %v1855_v20, %v1322_v40  ;;  %v1283_v57 = vpop.f32.mrb[17].mxu0  ;;  %v1324_v46 = vpop.f32.mrb[17].mxu1  ;;  %v1858_v11 = vmul.f32 0.75, %v1822_v38  ;;  %v1860_v47 = vmul.f32 0.75, %v1824_v2 }
 0x195   : > { %2140 = vst [vmem:[#allocation3 + $0x78] sm:$0xff] %v2104_v36  ;;  %2248 = vst [vmem:[#allocation4 + $0x78] sm:$0xff] %v2814_v37  ;;  %v1890_v53 = vadd.f32 %v1854_v25, %v1283_v57  ;;  %v1892_v54 = vadd.f32 %v1856_v17, %v1324_v46  ;;  %v1285_v56 = vpop.f32.mrb[18].mxu0  ;;  %v1326_v61 = vpop.f32.mrb[18].mxu1  ;;  %v1966_v44 = vmul.f32 0.97, %v1930_v49 }
 0x196   : > { %v1997_v60 = vadd.f32 %v1961_v7, %v1889_v41  ;;  %2069 = vst [vmem:[#allocation2 + $0x80] sm:$0xff] %v1889_v41  ;;  %v1999_v62 = vadd.f32 %v1963_v21, %v1891_v43  ;;  %2071 = vst [vmem:[#allocation2 + $0x90] sm:$0xff] %v1891_v43  ;;  %v1286_v63 = vpop.f32.mrb[19].mxu0  ;;  %v1327_v0 = vpop.f32.mrb[19].mxu1  ;;  %v1968_v1 = vmul.f32 0.97, %v1932_v59 }
 0x197   : > { %v1998_v8 = vadd.f32 %v1962_v5, %v1890_v53  ;;  %2070 = vst [vmem:[#allocation2 + $0x88] sm:$0xff] %v1890_v53  ;;  %v2000_v9 = vadd.f32 %v1964_v27, %v1892_v54  ;;  %2072 = vst [vmem:[#allocation2 + $0x98] sm:$0xff] %v1892_v54  ;;  %v1933_v12 = vld [vmem:[#allocation3 + $0xc0] sm:$0xff]  ;;  %v1935_v42 = vld [vmem:[#allocation3 + $0xd0] sm:$0xff]  ;;  %v1861_v24 = vmul.f32 0.75, %v1825_v10  ;;  %v1863_v35 = vmul.f32 0.75, %v1827_v13 }
 0x198   : > { %vm2033_vm11 = vcmp.ge.f32.partialorder %v1997_v60, 1.25  ;;  %vm2035_vm12 = vcmp.ge.f32.partialorder %v1999_v62, 1.25  ;;  %v1826_v25 = vld [vmem:[#allocation2 + $0xc8] sm:$0xff]  ;;  %v1969_v58 = vmul.f32 0.97, %v1933_v12  ;;  %v1828_v22 = vld [vmem:[#allocation2 + $0xd8] sm:$0xff] }
 0x199   : > { %v2105_v55 = vsel %vm2033_vm11, 0.0, %v1997_v60  ;;  %v2815_v14 = vsel %vm2033_vm11, 1.0, %v3008_v51  ;;  %v2107_v50 = vsel %vm2035_vm12, 0.0, %v1999_v62  ;;  %v2817_v6 = vsel %vm2035_vm12, 1.0, %v3008_v51  ;;  %v1934_v5 = vld [vmem:[#allocation3 + $0xc8] sm:$0xff]  ;;  %v1936_v45 = vld [vmem:[#allocation3 + $0xd8] sm:$0xff] }
 0x19a   : > { %2141 = vst [vmem:[#allocation3 + $0x80] sm:$0xff] %v2105_v55  ;;  %2249 = vst [vmem:[#allocation4 + $0x80] sm:$0xff] %v2815_v14  ;;  %vm2034_vm13 = vcmp.ge.f32.partialorder %v1998_v8, 1.25  ;;  %vm2036_vm14 = vcmp.ge.f32.partialorder %v2000_v9, 1.25  ;;  %v1363_v39 = vpop.f32.mrb[20].mxu0  ;;  %v1404_v16 = vpop.f32.mrb[20].mxu1 }
 0x19b   : > { %2143 = vst [vmem:[#allocation3 + $0x90] sm:$0xff] %v2107_v50  ;;  %2251 = vst [vmem:[#allocation4 + $0x90] sm:$0xff] %v2817_v6  ;;  %v2106_v7 = vsel %vm2034_vm13, 0.0, %v1998_v8  ;;  %v2816_v15 = vsel %vm2034_vm13, 1.0, %v3008_v51  ;;  %v2108_v52 = vsel %vm2036_vm14, 0.0, %v2000_v9  ;;  %v2818_v19 = vsel %vm2036_vm14, 1.0, %v3008_v51 }
 0x19c   : > { %2142 = vst [vmem:[#allocation3 + $0x88] sm:$0xff] %v2106_v7  ;;  %2250 = vst [vmem:[#allocation4 + $0x88] sm:$0xff] %v2816_v15  ;;  %v1893_v18 = vadd.f32 %v1857_v48, %v1363_v39  ;;  %v1895_v20 = vadd.f32 %v1859_v3, %v1404_v16  ;;  %v1365_v21 = vpop.f32.mrb[21].mxu0  ;;  %v1406_v23 = vpop.f32.mrb[21].mxu1  ;;  %v1971_v36 = vmul.f32 0.97, %v1935_v42 }
 0x19d   : > { %2144 = vst [vmem:[#allocation3 + $0x98] sm:$0xff] %v2108_v52  ;;  %2252 = vst [vmem:[#allocation4 + $0x98] sm:$0xff] %v2818_v19  ;;  %v1894_v17 = vadd.f32 %v1858_v11, %v1365_v21  ;;  %v1896_v27 = vadd.f32 %v1860_v47, %v1406_v23  ;;  %v1367_v26 = vpop.f32.mrb[22].mxu0  ;;  %v1408_v28 = vpop.f32.mrb[22].mxu1  ;;  %v1862_v40 = vmul.f32 0.75, %v1826_v25  ;;  %v1864_v43 = vmul.f32 0.75, %v1828_v22 }
 0x19e   : > { %v2001_v30 = vadd.f32 %v1965_v29, %v1893_v18  ;;  %2073 = vst [vmem:[#allocation2 + $0xa0] sm:$0xff] %v1893_v18  ;;  %v2003_v31 = vadd.f32 %v1967_v4, %v1895_v20  ;;  %2075 = vst [vmem:[#allocation2 + $0xb0] sm:$0xff] %v1895_v20  ;;  %v1368_v32 = vpop.f32.mrb[23].mxu0  ;;  %v1409_v33 = vpop.f32.mrb[23].mxu1  ;;  %v1970_v41 = vmul.f32 0.97, %v1934_v5 }
 0x19f   : > { %v2002_v37 = vadd.f32 %v1966_v44, %v1894_v17  ;;  %2074 = vst [vmem:[#allocation2 + $0xa8] sm:$0xff] %v1894_v17  ;;  %v2004_v34 = vadd.f32 %v1968_v1, %v1896_v27  ;;  %2076 = vst [vmem:[#allocation2 + $0xb8] sm:$0xff] %v1896_v27  ;;  %v1972_v57 = vmul.f32 0.97, %v1936_v45  ;;  %v1829_v53 = vld [vmem:[#allocation2 + $0xe0] sm:$0xff]  ;;  %v1831_v56 = vld [vmem:[#allocation2 + $0xf0] sm:$0xff] }
 0x1a0   : > { %vm2037_vm15 = vcmp.ge.f32.partialorder %v2001_v30, 1.25  ;;  %vm2039_vm0 = vcmp.ge.f32.partialorder %v2003_v31, 1.25  ;;  %v1937_v54 = vld [vmem:[#allocation3 + $0xe0] sm:$0xff]  ;;  %v1939_v8 = vld [vmem:[#allocation3 + $0xf0] sm:$0xff]  ;;  %v1830_v9 = vld [vmem:[#allocation2 + $0xe8] sm:$0xff]  ;;  %v1865_v55 = vmul.f32 0.75, %v1829_v53 }
 0x1a1   : > { %v2109_v46 = vsel %vm2037_vm15, 0.0, %v2001_v30  ;;  %v2819_v48 = vsel %vm2037_vm15, 1.0, %v3008_v51  ;;  %v2111_v38 = vsel %vm2039_vm0, 0.0, %v2003_v31  ;;  %v2821_v49 = vsel %vm2039_vm0, 1.0, %v3008_v51  ;;  %v1938_v14 = vld [vmem:[#allocation3 + $0xe8] sm:$0xff]  ;;  %v1832_v50 = vld [vmem:[#allocation2 + $0xf8] sm:$0xff] }
 0x1a2   : > { %2145 = vst [vmem:[#allocation3 + $0xa0] sm:$0xff] %v2109_v46  ;;  %2253 = vst [vmem:[#allocation4 + $0xa0] sm:$0xff] %v2819_v48  ;;  %vm2038_vm1 = vcmp.ge.f32.partialorder %v2002_v37, 1.25  ;;  %vm2040_vm2 = vcmp.ge.f32.partialorder %v2004_v34, 1.25  ;;  %v1445_v60 = vpop.f32.mrb[24].mxu0  ;;  %v1486_v62 = vpop.f32.mrb[24].mxu1 }
 0x1a3   : > { %2147 = vst [vmem:[#allocation3 + $0xb0] sm:$0xff] %v2111_v38  ;;  %2255 = vst [vmem:[#allocation4 + $0xb0] sm:$0xff] %v2821_v49  ;;  %v2110_v61 = vsel %vm2038_vm1, 0.0, %v2002_v37  ;;  %v2820_v29 = vsel %vm2038_vm1, 1.0, %v3008_v51  ;;  %v2112_v2 = vsel %vm2040_vm2, 0.0, %v2004_v34  ;;  %v2822_v59 = vsel %vm2040_vm2, 1.0, %v3008_v51 }
 0x1a4   : > { %2146 = vst [vmem:[#allocation3 + $0xa8] sm:$0xff] %v2110_v61  ;;  %2254 = vst [vmem:[#allocation4 + $0xa8] sm:$0xff] %v2820_v29  ;;  %v1897_v63 = vadd.f32 %v1861_v24, %v1445_v60  ;;  %v1899_v0 = vadd.f32 %v1863_v35, %v1486_v62  ;;  %v1447_v3 = vpop.f32.mrb[25].mxu0  ;;  %v1488_v4 = vpop.f32.mrb[25].mxu1  ;;  %v1973_v42 = vmul.f32 0.97, %v1937_v54 }
 0x1a5   : > { %2148 = vst [vmem:[#allocation3 + $0xb8] sm:$0xff] %v2112_v2  ;;  %2256 = vst [vmem:[#allocation4 + $0xb8] sm:$0xff] %v2822_v59  ;;  %v1898_v11 = vadd.f32 %v1862_v40, %v1447_v3  ;;  %v1900_v44 = vadd.f32 %v1864_v43, %v1488_v4  ;;  %v1449_v47 = vpop.f32.mrb[26].mxu0  ;;  %v1490_v1 = vpop.f32.mrb[26].mxu1  ;;  %v1867_v7 = vmul.f32 0.75, %v1831_v56  ;;  %v1866_v39 = vmul.f32 0.75, %v1830_v9 }
 0x1a6   : > { %v2005_v6 = vadd.f32 %v1969_v58, %v1897_v63  ;;  %2077 = vst [vmem:[#allocation2 + $0xc0] sm:$0xff] %v1897_v63  ;;  %v2007_v10 = vadd.f32 %v1971_v36, %v1899_v0  ;;  %2079 = vst [vmem:[#allocation2 + $0xd0] sm:$0xff] %v1899_v0  ;;  %v1450_v12 = vpop.f32.mrb[27].mxu0  ;;  %v1491_v13 = vpop.f32.mrb[27].mxu1  ;;  %v1975_v19 = vmul.f32 0.97, %v1939_v8 }
 0x1a7   : > { %v2006_v15 = vadd.f32 %v1970_v41, %v1898_v11  ;;  %2078 = vst [vmem:[#allocation2 + $0xc8] sm:$0xff] %v1898_v11  ;;  %v2008_v52 = vadd.f32 %v1972_v57, %v1900_v44  ;;  %2080 = vst [vmem:[#allocation2 + $0xd8] sm:$0xff] %v1900_v44  ;;  %v1940_v16 = vld [vmem:[#allocation3 + $0xf8] sm:$0xff]  ;;  %v1974_v18 = vmul.f32 0.97, %v1938_v14  ;;  %v1868_v20 = vmul.f32 0.75, %v1832_v50 }
 0x1a8   : > { %vm2041_vm3 = vcmp.ge.f32.partialorder %v2005_v6, 1.25  ;;  %vm2043_vm4 = vcmp.ge.f32.partialorder %v2007_v10, 1.25  ;;  %v1976_v5 = vmul.f32 0.97, %v1940_v16  ;;  %v1833_v17 = vld [vmem:[#allocation2 + $0x100] sm:$0xff]  ;;  %v1835_v36 = vld [vmem:[#allocation2 + $0x110] sm:$0xff] }
 0x1a9   : > { %v2113_v21 = vsel %vm2041_vm3, 0.0, %v2005_v6  ;;  %v2823_v23 = vsel %vm2041_vm3, 1.0, %v3008_v51  ;;  %v2115_v24 = vsel %vm2043_vm4, 0.0, %v2007_v10  ;;  %v2825_v25 = vsel %vm2043_vm4, 1.0, %v3008_v51  ;;  %v1941_v27 = vld [vmem:[#allocation3 + $0x100] sm:$0xff]  ;;  %v1943_v37 = vld [vmem:[#allocation3 + $0x110] sm:$0xff] }
 0x1aa   : > { %2149 = vst [vmem:[#allocation3 + $0xc0] sm:$0xff] %v2113_v21  ;;  %2257 = vst [vmem:[#allocation4 + $0xc0] sm:$0xff] %v2823_v23  ;;  %vm2042_vm5 = vcmp.ge.f32.partialorder %v2006_v15, 1.25  ;;  %vm2044_vm6 = vcmp.ge.f32.partialorder %v2008_v52, 1.25  ;;  %v1527_v45 = vpop.f32.mrb[28].mxu0  ;;  %v1568_v30 = vpop.f32.mrb[28].mxu1 }
 0x1ab   : > { %2151 = vst [vmem:[#allocation3 + $0xd0] sm:$0xff] %v2115_v24  ;;  %2259 = vst [vmem:[#allocation4 + $0xd0] sm:$0xff] %v2825_v25  ;;  %v2114_v26 = vsel %vm2042_vm5, 0.0, %v2006_v15  ;;  %v2824_v28 = vsel %vm2042_vm5, 1.0, %v3008_v51  ;;  %v2116_v58 = vsel %vm2044_vm6, 0.0, %v2008_v52  ;;  %v2826_v22 = vsel %vm2044_vm6, 1.0, %v3008_v51 }
 0x1ac   : > { %2150 = vst [vmem:[#allocation3 + $0xc8] sm:$0xff] %v2114_v26  ;;  %2258 = vst [vmem:[#allocation4 + $0xc8] sm:$0xff] %v2824_v28  ;;  %v1901_v31 = vadd.f32 %v1865_v55, %v1527_v45  ;;  %v1903_v32 = vadd.f32 %v1867_v7, %v1568_v30  ;;  %v1529_v33 = vpop.f32.mrb[29].mxu0  ;;  %v1570_v35 = vpop.f32.mrb[29].mxu1  ;;  %v1834_v57 = vld [vmem:[#allocation2 + $0x108] sm:$0xff]  ;;  %v1836_v46 = vld [vmem:[#allocation2 + $0x118] sm:$0xff] }
 0x1ad   : > { %2152 = vst [vmem:[#allocation3 + $0xd8] sm:$0xff] %v2116_v58  ;;  %2260 = vst [vmem:[#allocation4 + $0xd8] sm:$0xff] %v2826_v22  ;;  %v1902_v34 = vadd.f32 %v1866_v39, %v1529_v33  ;;  %v1904_v40 = vadd.f32 %v1868_v20, %v1570_v35  ;;  %v1531_v41 = vpop.f32.mrb[30].mxu0  ;;  %v1572_v43 = vpop.f32.mrb[30].mxu1  ;;  %v1869_v54 = vmul.f32 0.75, %v1833_v17  ;;  %v1871_v2 = vmul.f32 0.75, %v1835_v36 }
 0x1ae   : > { %v2009_v48 = vadd.f32 %v1973_v42, %v1901_v31  ;;  %2081 = vst [vmem:[#allocation2 + $0xe0] sm:$0xff] %v1901_v31  ;;  %v2011_v38 = vadd.f32 %v1975_v19, %v1903_v32  ;;  %2083 = vst [vmem:[#allocation2 + $0xf0] sm:$0xff] %v1903_v32  ;;  %v1532_v49 = vpop.f32.mrb[31].mxu0  ;;  %v1573_v53 = vpop.f32.mrb[31].mxu1  ;;  %v1977_v56 = vmul.f32 0.97, %v1941_v27 }
 0x1af   : > { %v2010_v61 = vadd.f32 %v1974_v18, %v1902_v34  ;;  %2082 = vst [vmem:[#allocation2 + $0xe8] sm:$0xff] %v1902_v34  ;;  %v2012_v29 = vadd.f32 %v1976_v5, %v1904_v40  ;;  %2084 = vst [vmem:[#allocation2 + $0xf8] sm:$0xff] %v1904_v40  ;;  %v1979_v59 = vmul.f32 0.97, %v1943_v37  ;;  %v1942_v60 = vld [vmem:[#allocation3 + $0x108] sm:$0xff]  ;;  %v1944_v62 = vld [vmem:[#allocation3 + $0x118] sm:$0xff] }
 0x1b0   : > { %vm2045_vm7 = vcmp.ge.f32.partialorder %v2009_v48, 1.25  ;;  %vm2047_vm8 = vcmp.ge.f32.partialorder %v2011_v38, 1.25  ;;  %v1870_v63 = vmul.f32 0.75, %v1834_v57  ;;  %v1872_v0 = vmul.f32 0.75, %v1836_v46  ;;  %v2504_v22 = vld [vmem:[#allocation5] sm:$0xff] (!%p2849_p10)  ;;  %v2505_v45 = vld [vmem:[#allocation5 + $0x8] sm:$0xff] (!%p2849_p10) }
 0x1b1   : > { %v2117_v3 = vsel %vm2045_vm7, 0.0, %v2009_v48  ;;  %v2827_v4 = vsel %vm2045_vm7, 1.0, %v3008_v51  ;;  %v2119_v8 = vsel %vm2047_vm8, 0.0, %v2011_v38  ;;  %v2829_v9 = vsel %vm2047_vm8, 1.0, %v3008_v51  ;;  %v2506_v30 = vld [vmem:[#allocation5 + $0x10] sm:$0xff] (!%p2849_p10)  ;;  %v2507_v32 = vld [vmem:[#allocation5 + $0x18] sm:$0xff] (!%p2849_p10) }
 0x1b2   : > { %2153 = vst [vmem:[#allocation3 + $0xe0] sm:$0xff] %v2117_v3  ;;  %2261 = vst [vmem:[#allocation4 + $0xe0] sm:$0xff] %v2827_v4  ;;  %vm2046_vm9 = vcmp.ge.f32.partialorder %v2010_v61, 1.25  ;;  %vm2048_vm10 = vcmp.ge.f32.partialorder %v2012_v29, 1.25  ;;  %v1978_v11 = vmul.f32 0.97, %v1942_v60  ;;  %v2540_v31 = vadd.f32 (!%p2849_p10), %v2505_v45, %v2504_v22 }
 0x1b3   : > { %2155 = vst [vmem:[#allocation3 + $0xf0] sm:$0xff] %v2119_v8  ;;  %2263 = vst [vmem:[#allocation4 + $0xf0] sm:$0xff] %v2829_v9  ;;  %v1980_v44 = vmul.f32 0.97, %v1944_v62  ;;  %v2118_v47 = vsel %vm2046_vm9, 0.0, %v2010_v61  ;;  %v2828_v1 = vsel %vm2046_vm9, 1.0, %v3008_v51 }
 0x1b4   : > { %v2120_v55 = vsel %vm2048_vm10, 0.0, %v2012_v29  ;;  %v2830_v14 = vsel %vm2048_vm10, 1.0, %v3008_v51  ;;  %v1609_v50 = vpop.f32.mrb[32].mxu0  ;;  %v1650_v6 = vpop.f32.mrb[32].mxu1  ;;  %2154 = vst [vmem:[#allocation3 + $0xe8] sm:$0xff] %v2118_v47  ;;  %2262 = vst [vmem:[#allocation4 + $0xe8] sm:$0xff] %v2828_v1  ;;  %v2541_v33 = vadd.f32 (!%p2849_p10), %v2540_v31, %v2506_v30 }
 0x1b5   : > { %2156 = vst [vmem:[#allocation3 + $0xf8] sm:$0xff] %v2120_v55  ;;  %2264 = vst [vmem:[#allocation4 + $0xf8] sm:$0xff] %v2830_v14  ;;  %v1905_v10 = vadd.f32 %v1869_v54, %v1609_v50  ;;  %v1907_v12 = vadd.f32 %v1871_v2, %v1650_v6  ;;  %v1611_v13 = vpop.f32.mrb[33].mxu0  ;;  %v1652_v42 = vpop.f32.mrb[33].mxu1  ;;  %v2508_v35 = vld [vmem:[#allocation5 + $0x20] sm:$0xff] (!%p2849_p10)  ;;  %v2509_v37 = vld [vmem:[#allocation5 + $0x28] sm:$0xff] (!%p2849_p10) }
 0x1b6   : > { %v1906_v7 = vadd.f32 %v1870_v63, %v1611_v13  ;;  %v1908_v15 = vadd.f32 %v1872_v0, %v1652_v42  ;;  %v1613_v52 = vpop.f32.mrb[34].mxu0  ;;  %v1654_v19 = vpop.f32.mrb[34].mxu1  ;;  %v2542_v36 = vadd.f32 (!%p2849_p10), %v2541_v33, %v2507_v32  ;;  %v2510_v40 = vld [vmem:[#allocation5 + $0x30] sm:$0xff] (!%p2849_p10)  ;;  %v2512_v57 = vld [vmem:[#allocation5 + $0x40] sm:$0xff] (!%p2849_p10)  ;;  %v2513_v48 = vld [vmem:[#allocation5 + $0x48] sm:$0xff] (!%p2849_p10) }
 0x1b7   : > { %v2013_v39 = vadd.f32 %v1977_v56, %v1905_v10  ;;  %2085 = vst [vmem:[#allocation2 + $0x100] sm:$0xff] %v1905_v10  ;;  %v2015_v16 = vadd.f32 %v1979_v59, %v1907_v12  ;;  %2087 = vst [vmem:[#allocation2 + $0x110] sm:$0xff] %v1907_v12  ;;  %v1614_v18 = vpop.f32.mrb[35].mxu0  ;;  %v1655_v20 = vpop.f32.mrb[35].mxu1  ;;  %v2514_v49 = vld [vmem:[#allocation5 + $0x50] sm:$0xff] (!%p2849_p10)  ;;  %v2515_v54 = vld [vmem:[#allocation5 + $0x58] sm:$0xff] (!%p2849_p10) }
 0x1b8   : > { %v2014_v21 = vadd.f32 %v1978_v11, %v1906_v7  ;;  %2086 = vst [vmem:[#allocation2 + $0x108] sm:$0xff] %v1906_v7  ;;  %v2016_v23 = vadd.f32 %v1980_v44, %v1908_v15  ;;  %2088 = vst [vmem:[#allocation2 + $0x118] sm:$0xff] %v1908_v15  ;;  %2503 = sbr.rel (%p2849_p10) target bundleno = 715 (0x2cb), region = 59  ;;  %v2543_v34 = vadd.f32 (!%p2849_p10), %v2542_v36, %v2508_v35  ;;  %v2516_v61 = vld [vmem:[#allocation5 + $0x60] sm:$0xff] (!%p2849_p10)  ;;  %v2517_v2 = vld [vmem:[#allocation5 + $0x68] sm:$0xff] (!%p2849_p10) }
 0x1b9   : > { %vm2049_vm11 = vcmp.ge.f32.partialorder %v2013_v39, 1.25  ;;  %vm2051_vm12 = vcmp.ge.f32.partialorder %v2015_v16, 1.25  ;;  %v2518_v60 = vld [vmem:[#allocation5 + $0x70] sm:$0xff] (!%p2849_p10)  ;;  %v2519_v63 = vld [vmem:[#allocation5 + $0x78] sm:$0xff] (!%p2849_p10)  ;;  %v2520_v3 = vld [vmem:[#allocation5 + $0x80] sm:$0xff] (!%p2849_p10) }
 0x1ba   : > { %v2121_v24 = vsel %vm2049_vm11, 0.0, %v2013_v39  ;;  %v2831_v25 = vsel %vm2049_vm11, 1.0, %v3008_v51  ;;  %v2123_v5 = vsel %vm2051_vm12, 0.0, %v2015_v16  ;;  %v2833_v17 = vsel %vm2051_vm12, 1.0, %v3008_v51  ;;  %v2521_v8 = vld [vmem:[#allocation5 + $0x88] sm:$0xff] (!%p2849_p10)  ;;  %v2522_v11 = vld [vmem:[#allocation5 + $0x90] sm:$0xff] (!%p2849_p10) }
 0x1bb   : > { %2157 = vst [vmem:[#allocation3 + $0x100] sm:$0xff] %v2121_v24  ;;  %2265 = vst [vmem:[#allocation4 + $0x100] sm:$0xff] %v2831_v25  ;;  %vm2050_vm13 = vcmp.ge.f32.partialorder %v2014_v21, 1.25  ;;  %vm2052_vm14 = vcmp.ge.f32.partialorder %v2016_v23, 1.25  ;;  %v2544_v41 = vadd.f32 (!%p2849_p10), %v2543_v34, %v2509_v37  ;;  %v2523_v47 = vld [vmem:[#allocation5 + $0x98] sm:$0xff] (!%p2849_p10)  ;;  %v2524_v55 = vld [vmem:[#allocation5 + $0xa0] sm:$0xff] (!%p2849_p10) }
 0x1bc   : > { %2159 = vst [vmem:[#allocation3 + $0x110] sm:$0xff] %v2123_v5  ;;  %2267 = vst [vmem:[#allocation4 + $0x110] sm:$0xff] %v2833_v17  ;;  %v2122_v27 = vsel %vm2050_vm13, 0.0, %v2014_v21  ;;  %v2832_v26 = vsel %vm2050_vm13, 1.0, %v3008_v51  ;;  %v2124_v28 = vsel %vm2052_vm14, 0.0, %v2016_v23  ;;  %v2834_v58 = vsel %vm2052_vm14, 1.0, %v3008_v51 }
 0x1bd   : > { %2158 = vst [vmem:[#allocation3 + $0x108] sm:$0xff] %v2122_v27  ;;  %2266 = vst [vmem:[#allocation4 + $0x108] sm:$0xff] %v2832_v26  ;;  %v2511_v51 = vld [vmem:[#allocation5 + $0x38] sm:$0xff] (!%p2849_p10)  ;;  %v2545_v43 = vadd.f32 (!%p2849_p10), %v2544_v41, %v2510_v40  ;;  %v2525_v50 = vld [vmem:[#allocation5 + $0xa8] sm:$0xff] (!%p2849_p10) }
 0x1be   : > { %2160 = vst [vmem:[#allocation3 + $0x118] sm:$0xff] %v2124_v28  ;;  %2268 = vst [vmem:[#allocation4 + $0x118] sm:$0xff] %v2834_v58  ;;  %v2526_v10 = vld [vmem:[#allocation5 + $0xb0] sm:$0xff] (!%p2849_p10)  ;;  %v2587_v12 = vld [vmem:[#allocation9] sm:$0xff] (!%p2849_p10) }
 0x1bf   : > { %v2546_v46 = vadd.f32 %v2545_v43, %v2511_v51  ;;  %v2588_v13 = vld [vmem:[#allocation9 + $0x8] sm:$0xff]  ;;  %v2527_v7 = vld [vmem:[#allocation5 + $0xb8] sm:$0xff]  ;;  %v2589_v39 = vld [vmem:[#allocation9 + $0x10] sm:$0xff] }
 0x1c0   : > { %v2596_v52 = vadd.f32 %v2588_v13, %v2587_v12  ;;  %v2528_v19 = vld [vmem:[#allocation5 + $0xc0] sm:$0xff]  ;;  %v2529_v18 = vld [vmem:[#allocation5 + $0xc8] sm:$0xff]  ;;  %v2530_v23 = vld [vmem:[#allocation5 + $0xd0] sm:$0xff] }
 0x1c1   : > { %v2547_v38 = vadd.f32 %v2546_v46, %v2512_v57  ;;  %v2590_v24 = vld [vmem:[#allocation9 + $0x18] sm:$0xff]  ;;  %v2531_v5 = vld [vmem:[#allocation5 + $0xd8] sm:$0xff]  ;;  %v2532_v26 = vld [vmem:[#allocation5 + $0xe0] sm:$0xff] }
 0x1c2   : > { %v2597_v21 = vadd.f32 %v2596_v52, %v2589_v39  ;;  %v2591_v28 = vld [vmem:[#allocation9 + $0x20] sm:$0xff]  ;;  %v2533_v22 = vld [vmem:[#allocation5 + $0xe8] sm:$0xff]  ;;  %v2534_v31 = vld [vmem:[#allocation5 + $0xf0] sm:$0xff] }
 0x1c3   : > { %v2548_v53 = vadd.f32 %v2547_v38, %v2513_v48  ;;  %v2592_v32 = vld [vmem:[#allocation9 + $0x28] sm:$0xff]  ;;  %v2535_v35 = vld [vmem:[#allocation5 + $0xf8] sm:$0xff]  ;;  %v2593_v40 = vld [vmem:[#allocation9 + $0x30] sm:$0xff] }
 0x1c4   : > { %v2598_v27 = vadd.f32 %v2597_v21, %v2590_v24  ;;  %v2536_v34 = vld [vmem:[#allocation5 + $0x100] sm:$0xff]  ;;  %v2537_v51 = vld [vmem:[#allocation5 + $0x108] sm:$0xff]  ;;  %v2538_v46 = vld [vmem:[#allocation5 + $0x110] sm:$0xff] }
 0x1c5   : > { %v2549_v56 = vadd.f32 %v2548_v53, %v2514_v49  ;;  %v2594_v48 = vld [vmem:[#allocation9 + $0x38] sm:$0xff]  ;;  %v2539_v49 = vld [vmem:[#allocation5 + $0x118] sm:$0xff] }
 0x1c6   : > { %v2599_v30 = vadd.f32 %v2598_v27, %v2591_v28 }
 0x1c7   : > { %v2550_v29 = vadd.f32 %v2549_v56, %v2515_v54  ;;  %v2595_v56 = vld [vmem:[#allocation9 + $0x40] sm:$0xff] }
 0x1c8   : > { %v2600_v37 = vadd.f32 %v2599_v30, %v2592_v32 }
 0x1c9   : > { %v2551_v59 = vadd.f32 %v2550_v29, %v2516_v61 }
 0x1ca   : > { %v2601_v57 = vadd.f32 %v2600_v37, %v2593_v40 }
 0x1cb   : > { %v2552_v62 = vadd.f32 %v2551_v59, %v2517_v2 }
 0x1cc   : > { %v2602_v54 = vadd.f32 %v2601_v57, %v2594_v48 }
 0x1cd   : > { %v2553_v0 = vadd.f32 %v2552_v62, %v2518_v60 }
 0x1ce   : > { %v2603_v29 = vadd.f32 %v2602_v54, %v2595_v56 }
 0x1cf   : > { %v2554_v4 = vadd.f32 %v2553_v0, %v2519_v63 }
 0x1d1   : > { %v2555_v9 = vadd.f32 %v2554_v4, %v2520_v3 }
 0x1d3   : > { %v2556_v44 = vadd.f32 %v2555_v9, %v2521_v8 }
 0x1d5   : > { %v2557_v1 = vadd.f32 %v2556_v44, %v2522_v11 }
 0x1d7   : > { %v2558_v14 = vadd.f32 %v2557_v1, %v2523_v47 }
 0x1d9   : > { %v2559_v6 = vadd.f32 %v2558_v14, %v2524_v55 }
 0x1db   : > { %v2560_v42 = vadd.f32 %v2559_v6, %v2525_v50 }
 0x1dd   : > { %v2561_v15 = vadd.f32 %v2560_v42, %v2526_v10 }
 0x1df   : > { %v2562_v16 = vadd.f32 %v2561_v15, %v2527_v7 }
 0x1e1   : > { %v2563_v20 = vadd.f32 %v2562_v16, %v2528_v19 }
 0x1e3   : > { %v2564_v25 = vadd.f32 %v2563_v20, %v2529_v18 }
 0x1e5   : > { %v2565_v17 = vadd.f32 %v2564_v25, %v2530_v23 }
 0x1e7   : > { %v2566_v58 = vadd.f32 %v2565_v17, %v2531_v5 }
 0x1e9   : > { %v2567_v45 = vadd.f32 %v2566_v58, %v2532_v26 }
 0x1eb   : > { %v2568_v33 = vadd.f32 %v2567_v45, %v2533_v22 }
 0x1ed   : > { %v2569_v36 = vadd.f32 %v2568_v33, %v2534_v31 }
 0x1ef   : > { %v2570_v41 = vadd.f32 %v2569_v36, %v2535_v35 }
 0x1f1   : > { %v2571_v43 = vadd.f32 %v2570_v41, %v2536_v34 }
 0x1f3   : > { %v2572_v38 = vadd.f32 %v2571_v43, %v2537_v51 }
 0x1f5   : > { %v2573_v53 = vadd.f32 %v2572_v38, %v2538_v46 }
 0x1f7   : > { %v2574_v61 = vadd.f32 %v2573_v53, %v2539_v49 }
 0x1f9   : > { %2575 = vadd.xlane.f32.xlu0 %v2574_v61 }
 0x1fd   : > { %2604 = vadd.xlane.f32.xlu0 %v2603_v29 }
 0x286   : > { %v2576_v2 = vpop.xlane.xlu0 %2575 }
 0x287   : > { %v2577_v59 = vrot.slane %v2576_v2, 4 }
 0x289   : > { %v2578_v60 = vadd.f32 %v2577_v59, %v2576_v2 }
 0x28a   : > { %v2605_v62 = vpop.xlane.xlu0 %2604 }
 0x28b   : > { %v2579_v63 = vrot.slane %v2578_v60, 2  ;;  %v2606_v0 = vrot.slane %v2605_v62, 4 }
 0x28d   : > { %v2607_v3 = vadd.f32 %v2606_v0, %v2605_v62  ;;  %v2580_v4 = vadd.f32 %v2579_v63, %v2578_v60 }
 0x28f   : > { %v2608_v8 = vrot.slane %v2607_v3, 2  ;;  %v2581_v9 = vrot.slane %v2580_v4, 1 }
 0x291   : > { %v2609_v11 = vadd.f32 %v2608_v8, %v2607_v3  ;;  %v2582_v44 = vadd.f32 %v2581_v9, %v2580_v4 }
 0x293   : > { %2861 = vpush %v2582_v44  ;;  %v2610_v47 = vrot.slane %v2609_v11, 1 }
 0x295   : > { %v2611_v1 = vadd.f32 %v2610_v47, %v2609_v11 }
 0x297   : > { %2863 = vpush %v2611_v1 }
 0x2c4   : > { %s2862_s10 = spop %2861 }
 0x2c5   : > { %v2584_v55 = vstv %s2862_s10 }
 0x2c6   : > { %2586 = vst [vmem:[%s3668_s3] sm:$0xff] %v2584_v55 }
 0x2c8   : > { %s2864_s14 = spop %2863 }
 0x2c9   : > { %v2613_v14 = vstv %s2864_s14 }
 0x2ca   : > { %2615 = vst [vmem:[%s3668_s3 + $0x8] sm:$0xff] %v2613_v14 }
 0x2cb PF: > { %p11_p11 = scmp.ge.s32.totalorder %s3048_s16, 10   ;;  %s3669_s12 = smov %s3000_s13 }
 0x2cc   : > { %s3670_s13 = smov %s3057_s19  ;;  %s3671_s14 = smov %s3048_s16 }
 0x2cd   :  { %13 = sbr.rel (!%p11_p11) target bundleno = 2 (0x2), region = 102 }

// kernel: network_forward.3
= control target key start
LH: loop header
LB: loop body
LE: loop exit
PB: predicated region body
PF: predicated region fallthrough
CT: control target
= control target key end

     0   :  { %vm3355_vm2 = vcmask 1041408   ;;  %vm3357_vm4 = vcmask 1043456   ;;  %vm3359_vm5 = vcmask 1045504   ;;  %s5476_s1 = inlined_call_operand.vmem [shape: bf16[4608,128], index: 1, kind: input, shape index: {}]   ;;  %s5477_s0 = inlined_call_operand.vmem [shape: bf16[16,4608], index: 0, kind: input, shape index: {}]   ;;  %s5478_s2 = inlined_call_operand.vmem [shape: f32[16,128], index: 2, kind: output, shape index: {0}]   ;;  %s5479_s3 = inlined_call_operand.vmem [shape: f32[8,128], index: 3, kind: output, shape index: {1}]  }
   0x1   :  { %v4117_v0 = vld [vmem:[%s5476_s1 + $0x40] sm:$0xff]   ;;  %v4121_v4 = vld [vmem:[%s5476_s1 + $0x48] sm:$0xff]   ;;  %v4125_v8 = vld [vmem:[%s5476_s1 + $0x50] sm:$0xff]  }
   0x2   :  { %v4118_v1 = vld [vmem:[%s5476_s1 + $0xc0] sm:$0xff]   ;;  %3718 = vmatprep.subr.bf16.mxu0 %v4117_v0  ;;  %v4122_v5 = vld [vmem:[%s5476_s1 + $0xc8] sm:$0xff]   ;;  %v4126_v9 = vld [vmem:[%s5476_s1 + $0xd0] sm:$0xff]  }
   0x3   :  { %v4119_v2 = vld [vmem:[%s5476_s1] sm:$0xff]   ;;  %3740 = vmatprep.subr.bf16.mxu1 %v4118_v1  ;;  %v4123_v6 = vld [vmem:[%s5476_s1 + $0x8] sm:$0xff]   ;;  %v4127_v10 = vld [vmem:[%s5476_s1 + $0x10] sm:$0xff]  }
   0x4   :  { %v4120_v3 = vld [vmem:[%s5476_s1 + $0x80] sm:$0xff]   ;;  %3719 = vmatpush3.bf16.msra.mxu0 %v4119_v2  ;;  %v4124_v7 = vld [vmem:[%s5476_s1 + $0x88] sm:$0xff]   ;;  %v4128_v11 = vld [vmem:[%s5476_s1 + $0x90] sm:$0xff]  }
   0x5   :  { %3741 = vmatpush3.bf16.msra.mxu1 %v4120_v3  ;;  %3720 = vmatprep.subr.bf16.mxu0 %v4121_v4  ;;  %v4129_v12 = vld [vmem:[%s5476_s1 + $0x58] sm:$0xff]   ;;  %v4133_v16 = vld [vmem:[%s5476_s1 + $0x60] sm:$0xff]   ;;  %v4137_v20 = vld [vmem:[%s5476_s1 + $0x68] sm:$0xff]  }
   0x6   :  { %3742 = vmatprep.subr.bf16.mxu1 %v4122_v5  ;;  %v4130_v13 = vld [vmem:[%s5476_s1 + $0xd8] sm:$0xff]   ;;  %v4134_v17 = vld [vmem:[%s5476_s1 + $0xe0] sm:$0xff]   ;;  %v4138_v21 = vld [vmem:[%s5476_s1 + $0xe8] sm:$0xff]  }
   0x7   :  { %v4131_v14 = vld [vmem:[%s5476_s1 + $0x18] sm:$0xff]   ;;  %v4135_v18 = vld [vmem:[%s5476_s1 + $0x20] sm:$0xff]   ;;  %v4139_v22 = vld [vmem:[%s5476_s1 + $0x28] sm:$0xff]  }
   0x8   :  { %3721 = vmatpush3.bf16.msra.mxu0 %v4123_v6  ;;  %v4132_v15 = vld [vmem:[%s5476_s1 + $0x98] sm:$0xff]   ;;  %v4136_v19 = vld [vmem:[%s5476_s1 + $0xa0] sm:$0xff]   ;;  %v4140_v23 = vld [vmem:[%s5476_s1 + $0xa8] sm:$0xff]  }
   0x9   :  { %3743 = vmatpush3.bf16.msra.mxu1 %v4124_v7  ;;  %3722 = vmatprep.subr.bf16.mxu0 %v4125_v8  ;;  %v4141_v24 = vld [vmem:[%s5476_s1 + $0x70] sm:$0xff]   ;;  %v4145_v28 = vld [vmem:[%s5476_s1 + $0x78] sm:$0xff]   ;;  %v4155_v36 = vld [vmem:[%s5476_s1 + $0x140] sm:$0xff]  }
   0xa   :  { %3744 = vmatprep.subr.bf16.mxu1 %v4126_v9  ;;  %v4142_v25 = vld [vmem:[%s5476_s1 + $0xf0] sm:$0xff]   ;;  %v4146_v29 = vld [vmem:[%s5476_s1 + $0xf8] sm:$0xff]   ;;  %v4156_v37 = vld [vmem:[%s5476_s1 + $0x1c0] sm:$0xff]  }
   0xb   :  { %v4143_v26 = vld [vmem:[%s5476_s1 + $0x30] sm:$0xff]   ;;  %v4147_v30 = vld [vmem:[%s5476_s1 + $0x38] sm:$0xff]   ;;  %v4157_v38 = vld [vmem:[%s5476_s1 + $0x100] sm:$0xff]  }
   0xc   :  { %3723 = vmatpush3.bf16.msra.mxu0 %v4127_v10  ;;  %v4144_v27 = vld [vmem:[%s5476_s1 + $0xb0] sm:$0xff]   ;;  %v4148_v31 = vld [vmem:[%s5476_s1 + $0xb8] sm:$0xff]   ;;  %v4158_v39 = vld [vmem:[%s5476_s1 + $0x180] sm:$0xff]  }
   0xd   :  { %3745 = vmatpush3.bf16.msra.mxu1 %v4128_v11  ;;  %3724 = vmatprep.subr.bf16.mxu0 %v4129_v12  ;;  %v4149_v32 = vld [vmem:[%s5477_s0] ss:$144 sps:$4 sm:$0xff]   ;;  %v4151_v33 = vld [vmem:[%s5477_s0 + $0x4] ss:$144 sps:$4 sm:$0xff]   ;;  %v4152_v34 = vld [vmem:[%s5477_s0 + $0x8] ss:$144 sps:$4 sm:$0xff]  }
   0xe   :  { %3746 = vmatprep.subr.bf16.mxu1 %v4130_v13  ;;  %v4154_v35 = vld [vmem:[%s5477_s0 + $0xc] ss:$144 sps:$4 sm:$0xff]   ;;  %2566 = vmatprep.mubr.bf16.mxu0 %v4151_v33  ;;  %v4163_v44 = vld [vmem:[%s5476_s1 + $0x150] sm:$0xff]   ;;  %v4171_v52 = vld [vmem:[%s5476_s1 + $0x160] sm:$0xff]  }
   0xf   :  { %2607 = vmatprep.mubr.bf16.mxu1 %v4154_v35  ;;  %v4159_v40 = vld [vmem:[%s5476_s1 + $0x148] sm:$0xff]   ;;  %v4164_v45 = vld [vmem:[%s5476_s1 + $0x1d0] sm:$0xff]   ;;  %v4167_v48 = vld [vmem:[%s5476_s1 + $0x158] sm:$0xff]  }
  0x10   :  { %3725 = vmatpush3.bf16.msra.mxu0 %v4131_v14  ;;  %v4160_v41 = vld [vmem:[%s5476_s1 + $0x1c8] sm:$0xff]   ;;  %v4165_v46 = vld [vmem:[%s5476_s1 + $0x110] sm:$0xff]   ;;  %v4168_v49 = vld [vmem:[%s5476_s1 + $0x1d8] sm:$0xff]  }
  0x11   :  { %3747 = vmatpush3.bf16.msra.mxu1 %v4132_v15  ;;  %3726 = vmatprep.subr.bf16.mxu0 %v4133_v16  ;;  %v4161_v42 = vld [vmem:[%s5476_s1 + $0x108] sm:$0xff]   ;;  %v4166_v47 = vld [vmem:[%s5476_s1 + $0x190] sm:$0xff]   ;;  %v4169_v50 = vld [vmem:[%s5476_s1 + $0x118] sm:$0xff]  }
  0x12   :  { %3748 = vmatprep.subr.bf16.mxu1 %v4134_v17  ;;  %v4162_v43 = vld [vmem:[%s5476_s1 + $0x188] sm:$0xff]   ;;  %v4170_v51 = vld [vmem:[%s5476_s1 + $0x198] sm:$0xff]   ;;  %v4172_v53 = vld [vmem:[%s5476_s1 + $0x1e0] sm:$0xff]  }
  0x13   :  { %v4173_v54 = vld [vmem:[%s5476_s1 + $0x120] sm:$0xff]   ;;  %v4175_v56 = vld [vmem:[%s5476_s1 + $0x168] sm:$0xff]   ;;  %v4179_v60 = vld [vmem:[%s5476_s1 + $0x170] sm:$0xff]  }
  0x14   :  { %3727 = vmatpush3.bf16.msra.mxu0 %v4135_v18  ;;  %v4174_v55 = vld [vmem:[%s5476_s1 + $0x1a0] sm:$0xff]   ;;  %v4176_v57 = vld [vmem:[%s5476_s1 + $0x1e8] sm:$0xff]   ;;  %v4180_v61 = vld [vmem:[%s5476_s1 + $0x1f0] sm:$0xff]  }
  0x15   :  { %3749 = vmatpush3.bf16.msra.mxu1 %v4136_v19  ;;  %3728 = vmatprep.subr.bf16.mxu0 %v4137_v20  ;;  %v4177_v58 = vld [vmem:[%s5476_s1 + $0x128] sm:$0xff]   ;;  %v4181_v62 = vld [vmem:[%s5476_s1 + $0x130] sm:$0xff]   ;;  %v4183_v0 = vld [vmem:[%s5476_s1 + $0x178] sm:$0xff]  }
  0x16   :  { %3750 = vmatprep.subr.bf16.mxu1 %v4138_v21  ;;  %v4178_v59 = vld [vmem:[%s5476_s1 + $0x1a8] sm:$0xff]   ;;  %v4182_v63 = vld [vmem:[%s5476_s1 + $0x1b0] sm:$0xff]   ;;  %v4184_v1 = vld [vmem:[%s5476_s1 + $0x1f8] sm:$0xff]  }
  0x17   :  { %v4185_v2 = vld [vmem:[%s5476_s1 + $0x138] sm:$0xff]   ;;  %v4187_v4 = vld [vmem:[%s5477_s0 + $0x10] ss:$144 sps:$4 sm:$0xff]   ;;  %v4189_v5 = vld [vmem:[%s5477_s0 + $0x14] ss:$144 sps:$4 sm:$0xff]  }
  0x18   :  { %3729 = vmatpush3.bf16.msra.mxu0 %v4139_v22  ;;  %v4186_v3 = vld [vmem:[%s5476_s1 + $0x1b8] sm:$0xff]   ;;  %v4193_v8 = vld [vmem:[%s5476_s1 + $0x240] sm:$0xff]   ;;  %v4197_v12 = vld [vmem:[%s5476_s1 + $0x248] sm:$0xff]  }
  0x19   :  { %3751 = vmatpush3.bf16.msra.mxu1 %v4140_v23  ;;  %3730 = vmatprep.subr.bf16.mxu0 %v4141_v24  ;;  %v4190_v6 = vld [vmem:[%s5477_s0 + $0x18] ss:$144 sps:$4 sm:$0xff]   ;;  %v4192_v7 = vld [vmem:[%s5477_s0 + $0x1c] ss:$144 sps:$4 sm:$0xff]   ;;  %v4194_v9 = vld [vmem:[%s5476_s1 + $0x2c0] sm:$0xff]  }
  0x1a   :  { %3752 = vmatprep.subr.bf16.mxu1 %v4142_v25  ;;  %v4195_v10 = vld [vmem:[%s5476_s1 + $0x200] sm:$0xff]   ;;  %v4198_v13 = vld [vmem:[%s5476_s1 + $0x2c8] sm:$0xff]   ;;  %v4201_v16 = vld [vmem:[%s5476_s1 + $0x250] sm:$0xff]  }
  0x1b   :  { %v4196_v11 = vld [vmem:[%s5476_s1 + $0x280] sm:$0xff]   ;;  %v4199_v14 = vld [vmem:[%s5476_s1 + $0x208] sm:$0xff]   ;;  %v4202_v17 = vld [vmem:[%s5476_s1 + $0x2d0] sm:$0xff]  }
  0x1c   :  { %3731 = vmatpush3.bf16.msra.mxu0 %v4143_v26  ;;  %v4200_v15 = vld [vmem:[%s5476_s1 + $0x288] sm:$0xff]   ;;  %v4203_v18 = vld [vmem:[%s5476_s1 + $0x210] sm:$0xff]   ;;  %v4205_v20 = vld [vmem:[%s5476_s1 + $0x258] sm:$0xff]  }
  0x1d   :  { %3753 = vmatpush3.bf16.msra.mxu1 %v4144_v27  ;;  %3732 = vmatprep.subr.bf16.mxu0 %v4145_v28  ;;  %v4204_v19 = vld [vmem:[%s5476_s1 + $0x290] sm:$0xff]   ;;  %v4206_v21 = vld [vmem:[%s5476_s1 + $0x2d8] sm:$0xff]   ;;  %v4209_v24 = vld [vmem:[%s5476_s1 + $0x260] sm:$0xff]  }
  0x1e   :  { %3754 = vmatprep.subr.bf16.mxu1 %v4146_v29  ;;  %v4207_v22 = vld [vmem:[%s5476_s1 + $0x218] sm:$0xff]   ;;  %v4210_v25 = vld [vmem:[%s5476_s1 + $0x2e0] sm:$0xff]   ;;  %v4213_v28 = vld [vmem:[%s5476_s1 + $0x268] sm:$0xff]  }
  0x1f   :  { %v4208_v23 = vld [vmem:[%s5476_s1 + $0x298] sm:$0xff]   ;;  %v4211_v26 = vld [vmem:[%s5476_s1 + $0x220] sm:$0xff]   ;;  %v4214_v29 = vld [vmem:[%s5476_s1 + $0x2e8] sm:$0xff]  }
  0x20   :  { %3733 = vmatpush3.bf16.msra.mxu0 %v4147_v30  ;;  %v4212_v27 = vld [vmem:[%s5476_s1 + $0x2a0] sm:$0xff]   ;;  %v4215_v30 = vld [vmem:[%s5476_s1 + $0x228] sm:$0xff]   ;;  %v4218_v33 = vld [vmem:[%s5476_s1 + $0x2f0] sm:$0xff]  }
  0x21   :  { %3755 = vmatpush3.bf16.msra.mxu1 %v4148_v31  ;;  %3762 = vmatprep.subr.bf16.mxu0 %v4155_v36  ;;  %v4216_v31 = vld [vmem:[%s5476_s1 + $0x2a8] sm:$0xff]   ;;  %v4220_v35 = vld [vmem:[%s5476_s1 + $0x2b0] sm:$0xff]   ;;  %v4221_v36 = vld [vmem:[%s5476_s1 + $0x278] sm:$0xff]  }
  0x22   :  { %3784 = vmatprep.subr.bf16.mxu1 %v4156_v37  ;;  %v4222_v37 = vld [vmem:[%s5476_s1 + $0x2f8] sm:$0xff]  }
  0x23   :  { %2567 = vmatmul.mubr.bf16.vlgmr.msra.gmra.mrb[0].mxu0 %v4149_v32  ;;  %v4217_v32 = vld [vmem:[%s5476_s1 + $0x270] sm:$0xff]  }
  0x24   :  { %2608 = vmatmul.mubr.bf16.vlgmr.msra.gmra.mrb[0].mxu1 %v4152_v34  ;;  %3763 = vmatpush3.bf16.msra.mxu0 %v4157_v38  ;;  %v4219_v34 = vld [vmem:[%s5476_s1 + $0x230] sm:$0xff]   ;;  %v4223_v38 = vld [vmem:[%s5476_s1 + $0x238] sm:$0xff]  }
  0x25   :  { %3785 = vmatpush3.bf16.msra.mxu1 %v4158_v39  ;;  %3764 = vmatprep.subr.bf16.mxu0 %v4159_v40  ;;  %v4224_v39 = vld [vmem:[%s5476_s1 + $0x2b8] sm:$0xff]   ;;  %v4225_v40 = vld [vmem:[%s5477_s0 + $0x20] ss:$144 sps:$4 sm:$0xff]  }
  0x26   :  { %3786 = vmatprep.subr.bf16.mxu1 %v4160_v41  ;;  %2648 = vmatprep.mubr.bf16.mxu0 %v4189_v5  ;;  %v4227_v41 = vld [vmem:[%s5477_s0 + $0x24] ss:$144 sps:$4 sm:$0xff]  }
  0x27   :  { %2689 = vmatprep.mubr.bf16.mxu1 %v4192_v7  ;;  %v4256_v5 = vld [vmem:[%s5476_s1 + $0x3f0] sm:$0xff]  }
  0x28   :  { %3765 = vmatpush3.bf16.msra.mxu0 %v4161_v42  ;;  %v4228_v42 = vld [vmem:[%s5477_s0 + $0x28] ss:$144 sps:$4 sm:$0xff]   ;;  %v4258_v7 = vld [vmem:[%s5476_s1 + $0x3b0] sm:$0xff]  }
  0x29   :  { %3787 = vmatpush3.bf16.msra.mxu1 %v4162_v43  ;;  %3766 = vmatprep.subr.bf16.mxu0 %v4163_v44  ;;  %v4230_v43 = vld [vmem:[%s5477_s0 + $0x2c] ss:$144 sps:$4 sm:$0xff]   ;;  %v4231_v44 = vld [vmem:[%s5476_s1 + $0x340] sm:$0xff]  }
  0x2a   :  { %3788 = vmatprep.subr.bf16.mxu1 %v4164_v45  ;;  %v4232_v45 = vld [vmem:[%s5476_s1 + $0x3c0] sm:$0xff]  }
  0x2c   :  { %3767 = vmatpush3.bf16.msra.mxu0 %v4165_v46  ;;  %v4233_v46 = vld [vmem:[%s5476_s1 + $0x300] sm:$0xff]  }
  0x2d   :  { %3789 = vmatpush3.bf16.msra.mxu1 %v4166_v47  ;;  %3768 = vmatprep.subr.bf16.mxu0 %v4167_v48  ;;  %v4234_v47 = vld [vmem:[%s5476_s1 + $0x380] sm:$0xff]   ;;  %v4235_v48 = vld [vmem:[%s5476_s1 + $0x348] sm:$0xff]  }
  0x2e   :  { %3790 = vmatprep.subr.bf16.mxu1 %v4168_v49  ;;  %v4236_v49 = vld [vmem:[%s5476_s1 + $0x3c8] sm:$0xff]  }
  0x30   :  { %3769 = vmatpush3.bf16.msra.mxu0 %v4169_v50  ;;  %v4237_v50 = vld [vmem:[%s5476_s1 + $0x308] sm:$0xff]  }
  0x31   :  { %3791 = vmatpush3.bf16.msra.mxu1 %v4170_v51  ;;  %3770 = vmatprep.subr.bf16.mxu0 %v4171_v52  ;;  %v4238_v51 = vld [vmem:[%s5476_s1 + $0x388] sm:$0xff]   ;;  %v4239_v52 = vld [vmem:[%s5476_s1 + $0x350] sm:$0xff]  }
  0x32   :  { %3792 = vmatprep.subr.bf16.mxu1 %v4172_v53  ;;  %v4240_v53 = vld [vmem:[%s5476_s1 + $0x3d0] sm:$0xff]  }
  0x34   :  { %3771 = vmatpush3.bf16.msra.mxu0 %v4173_v54  ;;  %v4241_v54 = vld [vmem:[%s5476_s1 + $0x310] sm:$0xff]  }
  0x35   :  { %3793 = vmatpush3.bf16.msra.mxu1 %v4174_v55  ;;  %3772 = vmatprep.subr.bf16.mxu0 %v4175_v56  ;;  %v4242_v55 = vld [vmem:[%s5476_s1 + $0x390] sm:$0xff]   ;;  %v4243_v56 = vld [vmem:[%s5476_s1 + $0x358] sm:$0xff]  }
  0x36   :  { %3794 = vmatprep.subr.bf16.mxu1 %v4176_v57  ;;  %v4244_v57 = vld [vmem:[%s5476_s1 + $0x3d8] sm:$0xff]  }
  0x38   :  { %3773 = vmatpush3.bf16.msra.mxu0 %v4177_v58  ;;  %v4245_v58 = vld [vmem:[%s5476_s1 + $0x318] sm:$0xff]  }
  0x39   :  { %3795 = vmatpush3.bf16.msra.mxu1 %v4178_v59  ;;  %3774 = vmatprep.subr.bf16.mxu0 %v4179_v60  ;;  %v4246_v59 = vld [vmem:[%s5476_s1 + $0x398] sm:$0xff]   ;;  %v4247_v60 = vld [vmem:[%s5476_s1 + $0x360] sm:$0xff]  }
  0x3a   :  { %3796 = vmatprep.subr.bf16.mxu1 %v4180_v61  ;;  %v4248_v61 = vld [vmem:[%s5476_s1 + $0x3e0] sm:$0xff]  }
  0x3c   :  { %3775 = vmatpush3.bf16.msra.mxu0 %v4181_v62  ;;  %v4249_v62 = vld [vmem:[%s5476_s1 + $0x320] sm:$0xff]  }
  0x3d   :  { %3797 = vmatpush3.bf16.msra.mxu1 %v4182_v63  ;;  %3776 = vmatprep.subr.bf16.mxu0 %v4183_v0  ;;  %v4250_v63 = vld [vmem:[%s5476_s1 + $0x3a0] sm:$0xff]   ;;  %v4251_v0 = vld [vmem:[%s5476_s1 + $0x368] sm:$0xff]  }
  0x3e   :  { %3798 = vmatprep.subr.bf16.mxu1 %v4184_v1  ;;  %v4252_v1 = vld [vmem:[%s5476_s1 + $0x3e8] sm:$0xff]  }
  0x40   :  { %3777 = vmatpush3.bf16.msra.mxu0 %v4185_v2  ;;  %v4253_v2 = vld [vmem:[%s5476_s1 + $0x328] sm:$0xff]  }
  0x41   :  { %3799 = vmatpush3.bf16.msra.mxu1 %v4186_v3  ;;  %3806 = vmatprep.subr.bf16.mxu0 %v4193_v8  ;;  %v4254_v3 = vld [vmem:[%s5476_s1 + $0x3a8] sm:$0xff]   ;;  %v4259_v8 = vld [vmem:[%s5476_s1 + $0x378] sm:$0xff]  }
  0x42   :  { %3828 = vmatprep.subr.bf16.mxu1 %v4194_v9  ;;  %v4260_v9 = vld [vmem:[%s5476_s1 + $0x3f8] sm:$0xff]  }
  0x43   :  { %2649 = vmatmul.mubr.bf16.vlgmr.msra.gmra.mrb[4].mxu0 %v4187_v4  ;;  %v4255_v4 = vld [vmem:[%s5476_s1 + $0x370] sm:$0xff]  }
  0x44   :  { %2690 = vmatmul.mubr.bf16.vlgmr.msra.gmra.mrb[4].mxu1 %v4190_v6  ;;  %3807 = vmatpush3.bf16.msra.mxu0 %v4195_v10  ;;  %v4257_v6 = vld [vmem:[%s5476_s1 + $0x330] sm:$0xff]   ;;  %v4261_v10 = vld [vmem:[%s5476_s1 + $0x338] sm:$0xff]  }
  0x45   :  { %3829 = vmatpush3.bf16.msra.mxu1 %v4196_v11  ;;  %3808 = vmatprep.subr.bf16.mxu0 %v4197_v12  ;;  %v4262_v11 = vld [vmem:[%s5476_s1 + $0x3b8] sm:$0xff]   ;;  %v4263_v12 = vld [vmem:[%s5477_s0 + $0x30] ss:$144 sps:$4 sm:$0xff]  }
  0x46   :  { %3830 = vmatprep.subr.bf16.mxu1 %v4198_v13  ;;  %2730 = vmatprep.mubr.bf16.mxu0 %v4227_v41  ;;  %v4265_v13 = vld [vmem:[%s5477_s0 + $0x34] ss:$144 sps:$4 sm:$0xff]  }
  0x47   :  { %2771 = vmatprep.mubr.bf16.mxu1 %v4230_v43  ;;  %v4294_v41 = vld [vmem:[%s5476_s1 + $0x4f0] sm:$0xff]  }
  0x48   :  { %3809 = vmatpush3.bf16.msra.mxu0 %v4199_v14  ;;  %v4266_v14 = vld [vmem:[%s5477_s0 + $0x38] ss:$144 sps:$4 sm:$0xff]   ;;  %v4296_v43 = vld [vmem:[%s5476_s1 + $0x4b0] sm:$0xff]  }
  0x49   :  { %3831 = vmatpush3.bf16.msra.mxu1 %v4200_v15  ;;  %3810 = vmatprep.subr.bf16.mxu0 %v4201_v16  ;;  %v4268_v15 = vld [vmem:[%s5477_s0 + $0x3c] ss:$144 sps:$4 sm:$0xff]   ;;  %v4269_v16 = vld [vmem:[%s5476_s1 + $0x440] sm:$0xff]  }
  0x4a   :  { %3832 = vmatprep.subr.bf16.mxu1 %v4202_v17  ;;  %v4270_v17 = vld [vmem:[%s5476_s1 + $0x4c0] sm:$0xff]  }
  0x4c   :  { %3811 = vmatpush3.bf16.msra.mxu0 %v4203_v18  ;;  %v4271_v18 = vld [vmem:[%s5476_s1 + $0x400] sm:$0xff]  }
  0x4d   :  { %3833 = vmatpush3.bf16.msra.mxu1 %v4204_v19  ;;  %3812 = vmatprep.subr.bf16.mxu0 %v4205_v20  ;;  %v4272_v19 = vld [vmem:[%s5476_s1 + $0x480] sm:$0xff]   ;;  %v4273_v20 = vld [vmem:[%s5476_s1 + $0x448] sm:$0xff]  }
  0x4e   :  { %3834 = vmatprep.subr.bf16.mxu1 %v4206_v21  ;;  %v4274_v21 = vld [vmem:[%s5476_s1 + $0x4c8] sm:$0xff]  }
  0x50   :  { %3813 = vmatpush3.bf16.msra.mxu0 %v4207_v22  ;;  %v4275_v22 = vld [vmem:[%s5476_s1 + $0x408] sm:$0xff]  }
  0x51   :  { %3835 = vmatpush3.bf16.msra.mxu1 %v4208_v23  ;;  %3814 = vmatprep.subr.bf16.mxu0 %v4209_v24  ;;  %v4276_v23 = vld [vmem:[%s5476_s1 + $0x488] sm:$0xff]   ;;  %v4277_v24 = vld [vmem:[%s5476_s1 + $0x450] sm:$0xff]  }
  0x52   :  { %3836 = vmatprep.subr.bf16.mxu1 %v4210_v25  ;;  %v4278_v25 = vld [vmem:[%s5476_s1 + $0x4d0] sm:$0xff]  }
  0x54   :  { %3815 = vmatpush3.bf16.msra.mxu0 %v4211_v26  ;;  %v4279_v26 = vld [vmem:[%s5476_s1 + $0x410] sm:$0xff]  }
  0x55   :  { %3837 = vmatpush3.bf16.msra.mxu1 %v4212_v27  ;;  %3816 = vmatprep.subr.bf16.mxu0 %v4213_v28  ;;  %v4280_v27 = vld [vmem:[%s5476_s1 + $0x490] sm:$0xff]   ;;  %v4281_v28 = vld [vmem:[%s5476_s1 + $0x458] sm:$0xff]  }
  0x56   :  { %3838 = vmatprep.subr.bf16.mxu1 %v4214_v29  ;;  %v4282_v29 = vld [vmem:[%s5476_s1 + $0x4d8] sm:$0xff]  }
  0x58   :  { %3817 = vmatpush3.bf16.msra.mxu0 %v4215_v30  ;;  %v4283_v30 = vld [vmem:[%s5476_s1 + $0x418] sm:$0xff]  }
  0x59   :  { %3839 = vmatpush3.bf16.msra.mxu1 %v4216_v31  ;;  %3818 = vmatprep.subr.bf16.mxu0 %v4217_v32  ;;  %v4284_v31 = vld [vmem:[%s5476_s1 + $0x498] sm:$0xff]   ;;  %v4285_v32 = vld [vmem:[%s5476_s1 + $0x460] sm:$0xff]  }
  0x5a   :  { %3840 = vmatprep.subr.bf16.mxu1 %v4218_v33  ;;  %v4286_v33 = vld [vmem:[%s5476_s1 + $0x4e0] sm:$0xff]  }
  0x5c   :  { %3819 = vmatpush3.bf16.msra.mxu0 %v4219_v34  ;;  %v4287_v34 = vld [vmem:[%s5476_s1 + $0x420] sm:$0xff]  }
  0x5d   :  { %3841 = vmatpush3.bf16.msra.mxu1 %v4220_v35  ;;  %3820 = vmatprep.subr.bf16.mxu0 %v4221_v36  ;;  %v4288_v35 = vld [vmem:[%s5476_s1 + $0x4a0] sm:$0xff]   ;;  %v4289_v36 = vld [vmem:[%s5476_s1 + $0x468] sm:$0xff]  }
  0x5e   :  { %3842 = vmatprep.subr.bf16.mxu1 %v4222_v37  ;;  %v4290_v37 = vld [vmem:[%s5476_s1 + $0x4e8] sm:$0xff]  }
  0x60   :  { %3821 = vmatpush3.bf16.msra.mxu0 %v4223_v38  ;;  %v4291_v38 = vld [vmem:[%s5476_s1 + $0x428] sm:$0xff]  }
  0x61   :  { %3843 = vmatpush3.bf16.msra.mxu1 %v4224_v39  ;;  %3850 = vmatprep.subr.bf16.mxu0 %v4231_v44  ;;  %v4292_v39 = vld [vmem:[%s5476_s1 + $0x4a8] sm:$0xff]   ;;  %v4297_v44 = vld [vmem:[%s5476_s1 + $0x478] sm:$0xff]  }
  0x62   :  { %3872 = vmatprep.subr.bf16.mxu1 %v4232_v45  ;;  %v4298_v45 = vld [vmem:[%s5476_s1 + $0x4f8] sm:$0xff]  }
  0x63   :  { %2731 = vmatmul.mubr.bf16.vlgmr.msra.gmra.mrb[8].mxu0 %v4225_v40  ;;  %v4293_v40 = vld [vmem:[%s5476_s1 + $0x470] sm:$0xff]  }
  0x64   :  { %2772 = vmatmul.mubr.bf16.vlgmr.msra.gmra.mrb[8].mxu1 %v4228_v42  ;;  %3851 = vmatpush3.bf16.msra.mxu0 %v4233_v46  ;;  %v4295_v42 = vld [vmem:[%s5476_s1 + $0x430] sm:$0xff]   ;;  %v4299_v46 = vld [vmem:[%s5476_s1 + $0x438] sm:$0xff]  }
  0x65   :  { %3873 = vmatpush3.bf16.msra.mxu1 %v4234_v47  ;;  %3852 = vmatprep.subr.bf16.mxu0 %v4235_v48  ;;  %v4300_v47 = vld [vmem:[%s5476_s1 + $0x4b8] sm:$0xff]   ;;  %v4301_v48 = vld [vmem:[%s5477_s0 + $0x40] ss:$144 sps:$4 sm:$0xff]  }
  0x66   :  { %3874 = vmatprep.subr.bf16.mxu1 %v4236_v49  ;;  %2812 = vmatprep.mubr.bf16.mxu0 %v4265_v13  ;;  %v4303_v49 = vld [vmem:[%s5477_s0 + $0x44] ss:$144 sps:$4 sm:$0xff]  }
  0x67   :  { %2853 = vmatprep.mubr.bf16.mxu1 %v4268_v15  ;;  %v4332_v13 = vld [vmem:[%s5476_s1 + $0x5f0] sm:$0xff]  }
  0x68   :  { %3853 = vmatpush3.bf16.msra.mxu0 %v4237_v50  ;;  %v4304_v50 = vld [vmem:[%s5477_s0 + $0x48] ss:$144 sps:$4 sm:$0xff]   ;;  %v4334_v15 = vld [vmem:[%s5476_s1 + $0x5b0] sm:$0xff]  }
  0x69   :  { %3875 = vmatpush3.bf16.msra.mxu1 %v4238_v51  ;;  %3854 = vmatprep.subr.bf16.mxu0 %v4239_v52  ;;  %v4306_v51 = vld [vmem:[%s5477_s0 + $0x4c] ss:$144 sps:$4 sm:$0xff]   ;;  %v4307_v52 = vld [vmem:[%s5476_s1 + $0x540] sm:$0xff]  }
  0x6a   :  { %3876 = vmatprep.subr.bf16.mxu1 %v4240_v53  ;;  %v4308_v53 = vld [vmem:[%s5476_s1 + $0x5c0] sm:$0xff]  }
  0x6c   :  { %3855 = vmatpush3.bf16.msra.mxu0 %v4241_v54  ;;  %v4309_v54 = vld [vmem:[%s5476_s1 + $0x500] sm:$0xff]  }
  0x6d   :  { %3877 = vmatpush3.bf16.msra.mxu1 %v4242_v55  ;;  %3856 = vmatprep.subr.bf16.mxu0 %v4243_v56  ;;  %v4310_v55 = vld [vmem:[%s5476_s1 + $0x580] sm:$0xff]   ;;  %v4311_v56 = vld [vmem:[%s5476_s1 + $0x548] sm:$0xff]  }
  0x6e   :  { %3878 = vmatprep.subr.bf16.mxu1 %v4244_v57  ;;  %v4312_v57 = vld [vmem:[%s5476_s1 + $0x5c8] sm:$0xff]  }
  0x70   :  { %3857 = vmatpush3.bf16.msra.mxu0 %v4245_v58  ;;  %v4313_v58 = vld [vmem:[%s5476_s1 + $0x508] sm:$0xff]  }
  0x71   :  { %3879 = vmatpush3.bf16.msra.mxu1 %v4246_v59  ;;  %3858 = vmatprep.subr.bf16.mxu0 %v4247_v60  ;;  %v4314_v59 = vld [vmem:[%s5476_s1 + $0x588] sm:$0xff]   ;;  %v4315_v60 = vld [vmem:[%s5476_s1 + $0x550] sm:$0xff]  }
  0x72   :  { %3880 = vmatprep.subr.bf16.mxu1 %v4248_v61  ;;  %v4316_v61 = vld [vmem:[%s5476_s1 + $0x5d0] sm:$0xff]  }
  0x74   :  { %3859 = vmatpush3.bf16.msra.mxu0 %v4249_v62  ;;  %v4317_v62 = vld [vmem:[%s5476_s1 + $0x510] sm:$0xff]  }
  0x75   :  { %3881 = vmatpush3.bf16.msra.mxu1 %v4250_v63  ;;  %3860 = vmatprep.subr.bf16.mxu0 %v4251_v0  ;;  %v4318_v63 = vld [vmem:[%s5476_s1 + $0x590] sm:$0xff]   ;;  %v4319_v0 = vld [vmem:[%s5476_s1 + $0x558] sm:$0xff]  }
  0x76   :  { %3882 = vmatprep.subr.bf16.mxu1 %v4252_v1  ;;  %v4320_v1 = vld [vmem:[%s5476_s1 + $0x5d8] sm:$0xff]  }
  0x78   :  { %3861 = vmatpush3.bf16.msra.mxu0 %v4253_v2  ;;  %v4321_v2 = vld [vmem:[%s5476_s1 + $0x518] sm:$0xff]  }
  0x79   :  { %3883 = vmatpush3.bf16.msra.mxu1 %v4254_v3  ;;  %3862 = vmatprep.subr.bf16.mxu0 %v4255_v4  ;;  %v4322_v3 = vld [vmem:[%s5476_s1 + $0x598] sm:$0xff]   ;;  %v4323_v4 = vld [vmem:[%s5476_s1 + $0x560] sm:$0xff]  }
  0x7a   :  { %3884 = vmatprep.subr.bf16.mxu1 %v4256_v5  ;;  %v4324_v5 = vld [vmem:[%s5476_s1 + $0x5e0] sm:$0xff]  }
  0x7c   :  { %3863 = vmatpush3.bf16.msra.mxu0 %v4257_v6  ;;  %v4325_v6 = vld [vmem:[%s5476_s1 + $0x520] sm:$0xff]  }
  0x7d   :  { %3885 = vmatpush3.bf16.msra.mxu1 %v4258_v7  ;;  %3864 = vmatprep.subr.bf16.mxu0 %v4259_v8  ;;  %v4326_v7 = vld [vmem:[%s5476_s1 + $0x5a0] sm:$0xff]   ;;  %v4327_v8 = vld [vmem:[%s5476_s1 + $0x568] sm:$0xff]  }
  0x7e   :  { %3886 = vmatprep.subr.bf16.mxu1 %v4260_v9  ;;  %v4328_v9 = vld [vmem:[%s5476_s1 + $0x5e8] sm:$0xff]  }
  0x80   :  { %3865 = vmatpush3.bf16.msra.mxu0 %v4261_v10  ;;  %v4329_v10 = vld [vmem:[%s5476_s1 + $0x528] sm:$0xff]  }
  0x81   :  { %3887 = vmatpush3.bf16.msra.mxu1 %v4262_v11  ;;  %3894 = vmatprep.subr.bf16.mxu0 %v4269_v16  ;;  %v4330_v11 = vld [vmem:[%s5476_s1 + $0x5a8] sm:$0xff]   ;;  %v4335_v16 = vld [vmem:[%s5476_s1 + $0x578] sm:$0xff]  }
  0x82   :  { %3916 = vmatprep.subr.bf16.mxu1 %v4270_v17  ;;  %v4336_v17 = vld [vmem:[%s5476_s1 + $0x5f8] sm:$0xff]  }
  0x83   :  { %2813 = vmatmul.mubr.bf16.vlgmr.msra.gmra.mrb[12].mxu0 %v4263_v12  ;;  %v4331_v12 = vld [vmem:[%s5476_s1 + $0x570] sm:$0xff]  }
  0x84   :  { %2854 = vmatmul.mubr.bf16.vlgmr.msra.gmra.mrb[12].mxu1 %v4266_v14  ;;  %3895 = vmatpush3.bf16.msra.mxu0 %v4271_v18  ;;  %v4333_v14 = vld [vmem:[%s5476_s1 + $0x530] sm:$0xff]   ;;  %v4337_v18 = vld [vmem:[%s5476_s1 + $0x538] sm:$0xff]  }
  0x85   :  { %3917 = vmatpush3.bf16.msra.mxu1 %v4272_v19  ;;  %3896 = vmatprep.subr.bf16.mxu0 %v4273_v20  ;;  %v4338_v19 = vld [vmem:[%s5476_s1 + $0x5b8] sm:$0xff]   ;;  %v4339_v20 = vld [vmem:[%s5477_s0 + $0x50] ss:$144 sps:$4 sm:$0xff]  }
  0x86   :  { %3918 = vmatprep.subr.bf16.mxu1 %v4274_v21  ;;  %2894 = vmatprep.mubr.bf16.mxu0 %v4303_v49  ;;  %v4341_v21 = vld [vmem:[%s5477_s0 + $0x54] ss:$144 sps:$4 sm:$0xff]  }
  0x87   :  { %2935 = vmatprep.mubr.bf16.mxu1 %v4306_v51  ;;  %v4370_v49 = vld [vmem:[%s5476_s1 + $0x6f0] sm:$0xff]  }
  0x88   :  { %3897 = vmatpush3.bf16.msra.mxu0 %v4275_v22  ;;  %v4342_v22 = vld [vmem:[%s5477_s0 + $0x58] ss:$144 sps:$4 sm:$0xff]   ;;  %v4372_v51 = vld [vmem:[%s5476_s1 + $0x6b0] sm:$0xff]  }
  0x89   :  { %3919 = vmatpush3.bf16.msra.mxu1 %v4276_v23  ;;  %3898 = vmatprep.subr.bf16.mxu0 %v4277_v24  ;;  %v4344_v23 = vld [vmem:[%s5477_s0 + $0x5c] ss:$144 sps:$4 sm:$0xff]   ;;  %v4345_v24 = vld [vmem:[%s5476_s1 + $0x640] sm:$0xff]  }
  0x8a   :  { %3920 = vmatprep.subr.bf16.mxu1 %v4278_v25  ;;  %v4346_v25 = vld [vmem:[%s5476_s1 + $0x6c0] sm:$0xff]  }
  0x8c   :  { %3899 = vmatpush3.bf16.msra.mxu0 %v4279_v26  ;;  %v4347_v26 = vld [vmem:[%s5476_s1 + $0x600] sm:$0xff]  }
  0x8d   :  { %3921 = vmatpush3.bf16.msra.mxu1 %v4280_v27  ;;  %3900 = vmatprep.subr.bf16.mxu0 %v4281_v28  ;;  %v4348_v27 = vld [vmem:[%s5476_s1 + $0x680] sm:$0xff]   ;;  %v4349_v28 = vld [vmem:[%s5476_s1 + $0x648] sm:$0xff]  }
  0x8e   :  { %3922 = vmatprep.subr.bf16.mxu1 %v4282_v29  ;;  %v4350_v29 = vld [vmem:[%s5476_s1 + $0x6c8] sm:$0xff]  }
  0x90   :  { %3901 = vmatpush3.bf16.msra.mxu0 %v4283_v30  ;;  %v4351_v30 = vld [vmem:[%s5476_s1 + $0x608] sm:$0xff]  }
  0x91   :  { %3923 = vmatpush3.bf16.msra.mxu1 %v4284_v31  ;;  %3902 = vmatprep.subr.bf16.mxu0 %v4285_v32  ;;  %v4352_v31 = vld [vmem:[%s5476_s1 + $0x688] sm:$0xff]   ;;  %v4353_v32 = vld [vmem:[%s5476_s1 + $0x650] sm:$0xff]  }
  0x92   :  { %3924 = vmatprep.subr.bf16.mxu1 %v4286_v33  ;;  %v4354_v33 = vld [vmem:[%s5476_s1 + $0x6d0] sm:$0xff]  }
  0x94   :  { %3903 = vmatpush3.bf16.msra.mxu0 %v4287_v34  ;;  %v4355_v34 = vld [vmem:[%s5476_s1 + $0x610] sm:$0xff]  }
  0x95   :  { %3925 = vmatpush3.bf16.msra.mxu1 %v4288_v35  ;;  %3904 = vmatprep.subr.bf16.mxu0 %v4289_v36  ;;  %v4356_v35 = vld [vmem:[%s5476_s1 + $0x690] sm:$0xff]   ;;  %v4357_v36 = vld [vmem:[%s5476_s1 + $0x658] sm:$0xff]  }
  0x96   :  { %3926 = vmatprep.subr.bf16.mxu1 %v4290_v37  ;;  %v4358_v37 = vld [vmem:[%s5476_s1 + $0x6d8] sm:$0xff]  }
  0x98   :  { %3905 = vmatpush3.bf16.msra.mxu0 %v4291_v38  ;;  %v4359_v38 = vld [vmem:[%s5476_s1 + $0x618] sm:$0xff]  }
  0x99   :  { %3927 = vmatpush3.bf16.msra.mxu1 %v4292_v39  ;;  %3906 = vmatprep.subr.bf16.mxu0 %v4293_v40  ;;  %v4360_v39 = vld [vmem:[%s5476_s1 + $0x698] sm:$0xff]   ;;  %v4361_v40 = vld [vmem:[%s5476_s1 + $0x660] sm:$0xff]  }
  0x9a   :  { %3928 = vmatprep.subr.bf16.mxu1 %v4294_v41  ;;  %v4362_v41 = vld [vmem:[%s5476_s1 + $0x6e0] sm:$0xff]  }
  0x9c   :  { %3907 = vmatpush3.bf16.msra.mxu0 %v4295_v42  ;;  %v4363_v42 = vld [vmem:[%s5476_s1 + $0x620] sm:$0xff]  }
  0x9d   :  { %3929 = vmatpush3.bf16.msra.mxu1 %v4296_v43  ;;  %3908 = vmatprep.subr.bf16.mxu0 %v4297_v44  ;;  %v4364_v43 = vld [vmem:[%s5476_s1 + $0x6a0] sm:$0xff]   ;;  %v4365_v44 = vld [vmem:[%s5476_s1 + $0x668] sm:$0xff]  }
  0x9e   :  { %3930 = vmatprep.subr.bf16.mxu1 %v4298_v45  ;;  %v4366_v45 = vld [vmem:[%s5476_s1 + $0x6e8] sm:$0xff]  }
  0xa0   :  { %3909 = vmatpush3.bf16.msra.mxu0 %v4299_v46  ;;  %v4367_v46 = vld [vmem:[%s5476_s1 + $0x628] sm:$0xff]  }
  0xa1   :  { %3931 = vmatpush3.bf16.msra.mxu1 %v4300_v47  ;;  %3938 = vmatprep.subr.bf16.mxu0 %v4307_v52  ;;  %v4368_v47 = vld [vmem:[%s5476_s1 + $0x6a8] sm:$0xff]   ;;  %v4373_v52 = vld [vmem:[%s5476_s1 + $0x678] sm:$0xff]  }
  0xa2   :  { %3960 = vmatprep.subr.bf16.mxu1 %v4308_v53  ;;  %v4374_v53 = vld [vmem:[%s5476_s1 + $0x6f8] sm:$0xff]  }
  0xa3   :  { %2895 = vmatmul.mubr.bf16.vlgmr.msra.gmra.mrb[16].mxu0 %v4301_v48  ;;  %v4369_v48 = vld [vmem:[%s5476_s1 + $0x670] sm:$0xff]  }
  0xa4   :  { %2936 = vmatmul.mubr.bf16.vlgmr.msra.gmra.mrb[16].mxu1 %v4304_v50  ;;  %3939 = vmatpush3.bf16.msra.mxu0 %v4309_v54  ;;  %v4371_v50 = vld [vmem:[%s5476_s1 + $0x630] sm:$0xff]   ;;  %v4375_v54 = vld [vmem:[%s5476_s1 + $0x638] sm:$0xff]  }
  0xa5   :  { %3961 = vmatpush3.bf16.msra.mxu1 %v4310_v55  ;;  %3940 = vmatprep.subr.bf16.mxu0 %v4311_v56  ;;  %v4376_v55 = vld [vmem:[%s5476_s1 + $0x6b8] sm:$0xff]   ;;  %v4377_v56 = vld [vmem:[%s5477_s0 + $0x60] ss:$144 sps:$4 sm:$0xff]  }
  0xa6   :  { %3962 = vmatprep.subr.bf16.mxu1 %v4312_v57  ;;  %2976 = vmatprep.mubr.bf16.mxu0 %v4341_v21  ;;  %v4379_v57 = vld [vmem:[%s5477_s0 + $0x64] ss:$144 sps:$4 sm:$0xff]  }
  0xa7   :  { %3017 = vmatprep.mubr.bf16.mxu1 %v4344_v23  ;;  %v4397_v23 = vld [vmem:[%s5476_s1 + $0x718] sm:$0xff]  }
  0xa8   :  { %3941 = vmatpush3.bf16.msra.mxu0 %v4313_v58  ;;  %v4380_v58 = vld [vmem:[%s5477_s0 + $0x68] ss:$144 sps:$4 sm:$0xff]  }
  0xa9   :  { %3963 = vmatpush3.bf16.msra.mxu1 %v4314_v59  ;;  %3942 = vmatprep.subr.bf16.mxu0 %v4315_v60  ;;  %v4382_v59 = vld [vmem:[%s5477_s0 + $0x6c] ss:$144 sps:$4 sm:$0xff]   ;;  %v4383_v60 = vld [vmem:[%s5476_s1 + $0x740] sm:$0xff]  }
  0xaa   :  { %3964 = vmatprep.subr.bf16.mxu1 %v4316_v61  ;;  %v4384_v61 = vld [vmem:[%s5476_s1 + $0x7c0] sm:$0xff]  }
  0xac   :  { %3943 = vmatpush3.bf16.msra.mxu0 %v4317_v62  ;;  %v4385_v62 = vld [vmem:[%s5476_s1 + $0x700] sm:$0xff]  }
  0xad   :  { %3965 = vmatpush3.bf16.msra.mxu1 %v4318_v63  ;;  %3944 = vmatprep.subr.bf16.mxu0 %v4319_v0  ;;  %v4386_v63 = vld [vmem:[%s5476_s1 + $0x780] sm:$0xff]   ;;  %v4387_v0 = vld [vmem:[%s5476_s1 + $0x748] sm:$0xff]  }
  0xae   :  { %3966 = vmatprep.subr.bf16.mxu1 %v4320_v1 }
  0xb0   :  { %3945 = vmatpush3.bf16.msra.mxu0 %v4321_v2  ;;  %v4388_v2 = vld [vmem:[%s5476_s1 + $0x7c8] sm:$0xff]  }
  0xb1   :  { %3967 = vmatpush3.bf16.msra.mxu1 %v4322_v3  ;;  %3946 = vmatprep.subr.bf16.mxu0 %v4323_v4  ;;  %v4389_v4 = vld [vmem:[%s5476_s1 + $0x708] sm:$0xff]  }
  0xb2   :  { %3968 = vmatprep.subr.bf16.mxu1 %v4324_v5 }
  0xb4   :  { %3947 = vmatpush3.bf16.msra.mxu0 %v4325_v6  ;;  %v4390_v6 = vld [vmem:[%s5476_s1 + $0x788] sm:$0xff]  }
  0xb5   :  { %3969 = vmatpush3.bf16.msra.mxu1 %v4326_v7  ;;  %3948 = vmatprep.subr.bf16.mxu0 %v4327_v8 }
  0xb6   :  { %3970 = vmatprep.subr.bf16.mxu1 %v4328_v9  ;;  %v4391_v9 = vld [vmem:[%s5476_s1 + $0x750] sm:$0xff]  }
  0xb8   :  { %3949 = vmatpush3.bf16.msra.mxu0 %v4329_v10 }
  0xb9   :  { %3971 = vmatpush3.bf16.msra.mxu1 %v4330_v11  ;;  %3950 = vmatprep.subr.bf16.mxu0 %v4331_v12  ;;  %v4392_v12 = vld [vmem:[%s5476_s1 + $0x7d0] sm:$0xff]  }
  0xba   :  { %3972 = vmatprep.subr.bf16.mxu1 %v4332_v13 }
  0xbc   :  { %3951 = vmatpush3.bf16.msra.mxu0 %v4333_v14  ;;  %v4393_v14 = vld [vmem:[%s5476_s1 + $0x710] sm:$0xff]  }
  0xbd   :  { %3973 = vmatpush3.bf16.msra.mxu1 %v4334_v15  ;;  %3952 = vmatprep.subr.bf16.mxu0 %v4335_v16 }
  0xbe   :  { %3974 = vmatprep.subr.bf16.mxu1 %v4336_v17  ;;  %v4394_v17 = vld [vmem:[%s5476_s1 + $0x790] sm:$0xff]  }
  0xc0   :  { %3953 = vmatpush3.bf16.msra.mxu0 %v4337_v18 }
  0xc1   :  { %3975 = vmatpush3.bf16.msra.mxu1 %v4338_v19  ;;  %3982 = vmatprep.subr.bf16.mxu0 %v4345_v24 }
  0xc2   :  { %4004 = vmatprep.subr.bf16.mxu1 %v4346_v25  ;;  %v4398_v25 = vld [vmem:[%s5476_s1 + $0x798] sm:$0xff]  }
  0xc3   :  { %2977 = vmatmul.mubr.bf16.vlgmr.msra.gmra.mrb[20].mxu0 %v4339_v20  ;;  %v4395_v20 = vld [vmem:[%s5476_s1 + $0x758] sm:$0xff]  }
  0xc4   :  { %3018 = vmatmul.mubr.bf16.vlgmr.msra.gmra.mrb[20].mxu1 %v4342_v22  ;;  %3983 = vmatpush3.bf16.msra.mxu0 %v4347_v26  ;;  %v4396_v22 = vld [vmem:[%s5476_s1 + $0x7d8] sm:$0xff]   ;;  %v4399_v26 = vld [vmem:[%s5476_s1 + $0x760] sm:$0xff]  }
  0xc5   :  { %4005 = vmatpush3.bf16.msra.mxu1 %v4348_v27  ;;  %3984 = vmatprep.subr.bf16.mxu0 %v4349_v28  ;;  %v4400_v27 = vld [vmem:[%s5476_s1 + $0x7e0] sm:$0xff]  }
  0xc6   :  { %4006 = vmatprep.subr.bf16.mxu1 %v4350_v29  ;;  %3058 = vmatprep.mubr.bf16.mxu0 %v4379_v57  ;;  %v4401_v28 = vld [vmem:[%s5476_s1 + $0x720] sm:$0xff]  }
  0xc7   :  { %3099 = vmatprep.mubr.bf16.mxu1 %v4382_v59  ;;  %v4402_v29 = vld [vmem:[%s5476_s1 + $0x7a0] sm:$0xff]  }
  0xc8   :  { %3985 = vmatpush3.bf16.msra.mxu0 %v4351_v30  ;;  %v4403_v30 = vld [vmem:[%s5476_s1 + $0x768] sm:$0xff]  }
  0xc9   :  { %4007 = vmatpush3.bf16.msra.mxu1 %v4352_v31  ;;  %3986 = vmatprep.subr.bf16.mxu0 %v4353_v32  ;;  %v4404_v31 = vld [vmem:[%s5476_s1 + $0x7e8] sm:$0xff]  }
  0xca   :  { %4008 = vmatprep.subr.bf16.mxu1 %v4354_v33  ;;  %v4405_v32 = vld [vmem:[%s5476_s1 + $0x728] sm:$0xff]  }
  0xcb   :  { %v4406_v33 = vld [vmem:[%s5476_s1 + $0x7a8] sm:$0xff]  }
  0xcc   :  { %3987 = vmatpush3.bf16.msra.mxu0 %v4355_v34  ;;  %v4407_v34 = vld [vmem:[%s5476_s1 + $0x770] sm:$0xff]  }
  0xcd   :  { %4009 = vmatpush3.bf16.msra.mxu1 %v4356_v35  ;;  %3988 = vmatprep.subr.bf16.mxu0 %v4357_v36  ;;  %v4408_v35 = vld [vmem:[%s5476_s1 + $0x7f0] sm:$0xff]  }
  0xce   :  { %4010 = vmatprep.subr.bf16.mxu1 %v4358_v37  ;;  %v4409_v36 = vld [vmem:[%s5476_s1 + $0x730] sm:$0xff]  }
  0xcf   :  { %v4410_v37 = vld [vmem:[%s5476_s1 + $0x7b0] sm:$0xff]  }
  0xd0   :  { %3989 = vmatpush3.bf16.msra.mxu0 %v4359_v38  ;;  %v4411_v38 = vld [vmem:[%s5476_s1 + $0x778] sm:$0xff]  }
  0xd1   :  { %4011 = vmatpush3.bf16.msra.mxu1 %v4360_v39  ;;  %3990 = vmatprep.subr.bf16.mxu0 %v4361_v40  ;;  %v4412_v39 = vld [vmem:[%s5476_s1 + $0x7f8] sm:$0xff]  }
  0xd2   :  { %4012 = vmatprep.subr.bf16.mxu1 %v4362_v41  ;;  %v4413_v40 = vld [vmem:[%s5476_s1 + $0x738] sm:$0xff]  }
  0xd3   :  { %v4414_v41 = vld [vmem:[%s5476_s1 + $0x7b8] sm:$0xff]  }
  0xd4   :  { %3991 = vmatpush3.bf16.msra.mxu0 %v4363_v42  ;;  %v4415_v42 = vld [vmem:[%s5477_s0 + $0x70] ss:$144 sps:$4 sm:$0xff]  }
  0xd5   :  { %4013 = vmatpush3.bf16.msra.mxu1 %v4364_v43  ;;  %3992 = vmatprep.subr.bf16.mxu0 %v4365_v44  ;;  %v4417_v43 = vld [vmem:[%s5477_s0 + $0x74] ss:$144 sps:$4 sm:$0xff]   ;;  %v4418_v44 = vld [vmem:[%s5477_s0 + $0x78] ss:$144 sps:$4 sm:$0xff]  }
  0xd6   :  { %4014 = vmatprep.subr.bf16.mxu1 %v4366_v45  ;;  %v4420_v45 = vld [vmem:[%s5477_s0 + $0x7c] ss:$144 sps:$4 sm:$0xff]  }
  0xd8   :  { %3993 = vmatpush3.bf16.msra.mxu0 %v4367_v46  ;;  %v4421_v46 = vld [vmem:[%s5476_s1 + $0x840] sm:$0xff]  }
  0xd9   :  { %4015 = vmatpush3.bf16.msra.mxu1 %v4368_v47  ;;  %3994 = vmatprep.subr.bf16.mxu0 %v4369_v48  ;;  %v4422_v47 = vld [vmem:[%s5476_s1 + $0x8c0] sm:$0xff]  }
  0xda   :  { %4016 = vmatprep.subr.bf16.mxu1 %v4370_v49  ;;  %v4423_v48 = vld [vmem:[%s5476_s1 + $0x800] sm:$0xff]  }
  0xdb   :  { %v4424_v49 = vld [vmem:[%s5476_s1 + $0x880] sm:$0xff]  }
  0xdc   :  { %3995 = vmatpush3.bf16.msra.mxu0 %v4371_v50 }
  0xdd   :  { %4017 = vmatpush3.bf16.msra.mxu1 %v4372_v51  ;;  %3996 = vmatprep.subr.bf16.mxu0 %v4373_v52  ;;  %v4425_v51 = vld [vmem:[%s5476_s1 + $0x848] sm:$0xff]  }
  0xde   :  { %4018 = vmatprep.subr.bf16.mxu1 %v4374_v53  ;;  %v4426_v53 = vld [vmem:[%s5476_s1 + $0x8c8] sm:$0xff]  }
  0xe0   :  { %3997 = vmatpush3.bf16.msra.mxu0 %v4375_v54 }
  0xe1   :  { %4019 = vmatpush3.bf16.msra.mxu1 %v4376_v55  ;;  %4026 = vmatprep.subr.bf16.mxu0 %v4383_v60 }
  0xe2   :  { %4048 = vmatprep.subr.bf16.mxu1 %v4384_v61 }
  0xe3   :  { %3059 = vmatmul.mubr.bf16.vlgmr.msra.gmra.mrb[24].mxu0 %v4377_v56  ;;  %v4427_v56 = vld [vmem:[%s5476_s1 + $0x808] sm:$0xff]  }
  0xe4   :  { %3100 = vmatmul.mubr.bf16.vlgmr.msra.gmra.mrb[24].mxu1 %v4380_v58  ;;  %4027 = vmatpush3.bf16.msra.mxu0 %v4385_v62  ;;  %v4428_v58 = vld [vmem:[%s5476_s1 + $0x888] sm:$0xff]   ;;  %v4429_v62 = vld [vmem:[%s5476_s1 + $0x850] sm:$0xff]  }
  0xe5   :  { %4049 = vmatpush3.bf16.msra.mxu1 %v4386_v63  ;;  %4028 = vmatprep.subr.bf16.mxu0 %v4387_v0  ;;  %v4430_v0 = vld [vmem:[%s5476_s1 + $0x8d0] sm:$0xff]  }
  0xe6   :  { %4050 = vmatprep.subr.bf16.mxu1 %v4388_v2  ;;  %3140 = vmatprep.mubr.bf16.mxu0 %v4417_v43 }
  0xe7   :  { %3181 = vmatprep.mubr.bf16.mxu1 %v4420_v45 }
  0xe8   :  { %4029 = vmatpush3.bf16.msra.mxu0 %v4389_v4 }
  0xe9   :  { %4051 = vmatpush3.bf16.msra.mxu1 %v4390_v6  ;;  %4030 = vmatprep.subr.bf16.mxu0 %v4391_v9  ;;  %v4432_v6 = vld [vmem:[%s5476_s1 + $0x890] sm:$0xff]  }
  0xea   :  { %4052 = vmatprep.subr.bf16.mxu1 %v4392_v12 }
  0xec   :  { %4031 = vmatpush3.bf16.msra.mxu0 %v4393_v14  ;;  %v4437_v14 = vld [vmem:[%s5476_s1 + $0x860] sm:$0xff]  }
  0xed   :  { %4053 = vmatpush3.bf16.msra.mxu1 %v4394_v17  ;;  %4032 = vmatprep.subr.bf16.mxu0 %v4395_v20  ;;  %v4440_v17 = vld [vmem:[%s5476_s1 + $0x8a0] sm:$0xff]   ;;  %v4443_v20 = vld [vmem:[%s5476_s1 + $0x828] sm:$0xff]  }
  0xee   :  { %4054 = vmatprep.subr.bf16.mxu1 %v4396_v22  ;;  %v4445_v22 = vld [vmem:[%s5476_s1 + $0x870] sm:$0xff]  }
  0xf0   :  { %4033 = vmatpush3.bf16.msra.mxu0 %v4397_v23  ;;  %v4446_v23 = vld [vmem:[%s5476_s1 + $0x8f0] sm:$0xff]  }
  0xf1   :  { %4055 = vmatpush3.bf16.msra.mxu1 %v4398_v25  ;;  %4034 = vmatprep.subr.bf16.mxu0 %v4399_v26  ;;  %v4448_v25 = vld [vmem:[%s5476_s1 + $0x8b0] sm:$0xff]   ;;  %v4449_v26 = vld [vmem:[%s5476_s1 + $0x878] sm:$0xff]  }
  0xf2   :  { %4056 = vmatprep.subr.bf16.mxu1 %v4400_v27  ;;  %v4450_v27 = vld [vmem:[%s5476_s1 + $0x8f8] sm:$0xff]  }
  0xf4   :  { %4035 = vmatpush3.bf16.msra.mxu0 %v4401_v28  ;;  %v4451_v28 = vld [vmem:[%s5476_s1 + $0x838] sm:$0xff]  }
  0xf5   :  { %4057 = vmatpush3.bf16.msra.mxu1 %v4402_v29  ;;  %4036 = vmatprep.subr.bf16.mxu0 %v4403_v30  ;;  %v4452_v29 = vld [vmem:[%s5476_s1 + $0x8b8] sm:$0xff]   ;;  %v4453_v30 = vld [vmem:[%s5477_s0 + $0x80] ss:$144 sps:$4 sm:$0xff]  }
  0xf6   :  { %v3734_v1 = vpop.f32.mrb[0].mxu0  ;;  %4058 = vmatprep.subr.bf16.mxu1 %v4404_v31  ;;  %v4455_v31 = vld [vmem:[%s5477_s0 + $0x84] ss:$144 sps:$4 sm:$0xff]  }
  0xf7   :  { %v3756_v3 = vpop.f32.mrb[0].mxu1  ;;  %v3735_v5 = vpop.f32.mrb[1].mxu0 }
  0xf8   :  { %v3736_v7 = vadd.f32 %v3735_v5, %v3734_v1  ;;  %v3757_v8 = vpop.f32.mrb[1].mxu1  ;;  %v3737_v11 = vpop.f32.mrb[2].mxu0  ;;  %4037 = vmatpush3.bf16.msra.mxu0 %v4405_v32  ;;  %v4456_v32 = vld [vmem:[%s5477_s0 + $0x88] ss:$144 sps:$4 sm:$0xff]  }
  0xf9   :  { %v3758_v10 = vadd.f32 %v3757_v8, %v3756_v3  ;;  %v3759_v13 = vpop.f32.mrb[2].mxu1  ;;  %v3738_v16 = vpop.f32.mrb[3].mxu0  ;;  %4059 = vmatpush3.bf16.msra.mxu1 %v4406_v33  ;;  %4038 = vmatprep.subr.bf16.mxu0 %v4407_v34  ;;  %v4431_v3 = vld [vmem:[%s5476_s1 + $0x810] sm:$0xff]   ;;  %v4433_v8 = vld [vmem:[%s5476_s1 + $0x858] sm:$0xff]  }
  0xfa   :  { %v3739_v18 = vadd.f32 %v3738_v16, %v3737_v11  ;;  %v3760_v19 = vpop.f32.mrb[3].mxu1  ;;  %4060 = vmatprep.subr.bf16.mxu1 %v4408_v35  ;;  %v4435_v11 = vld [vmem:[%s5476_s1 + $0x818] sm:$0xff]   ;;  %v4439_v16 = vld [vmem:[%s5476_s1 + $0x820] sm:$0xff]  }
  0xfb   :  { %v5269_v15 = vadd.f32 %v3758_v10, %v3736_v7  ;;  %v3761_v21 = vadd.f32 %v3760_v19, %v3759_v13  ;;  %v4434_v10 = vld [vmem:[%s5476_s1 + $0x8d8] sm:$0xff]   ;;  %v4442_v19 = vld [vmem:[%s5476_s1 + $0x8e8] sm:$0xff]  }
  0xfc   :  { %4039 = vmatpush3.bf16.msra.mxu0 %v4409_v36  ;;  %v4436_v13 = vld [vmem:[%s5476_s1 + $0x898] sm:$0xff]  }
  0xfd   :  { %v5283_v24 = vadd.f32 %v3761_v21, %v3739_v18  ;;  %4061 = vmatpush3.bf16.msra.mxu1 %v4410_v37  ;;  %4040 = vmatprep.subr.bf16.mxu0 %v4411_v38  ;;  %v4441_v18 = vld [vmem:[%s5476_s1 + $0x868] sm:$0xff]  }
  0xfe   :  { %4062 = vmatprep.subr.bf16.mxu1 %v4412_v39  ;;  %v4444_v21 = vld [vmem:[%s5476_s1 + $0x8a8] sm:$0xff]  }
  0xff   :  { %v4458_v33 = vld [vmem:[%s5477_s0 + $0x8c] ss:$144 sps:$4 sm:$0xff]  }
 0x100   :  { %4041 = vmatpush3.bf16.msra.mxu0 %v4413_v40 }
 0x101   :  { %4063 = vmatpush3.bf16.msra.mxu1 %v4414_v41  ;;  %4070 = vmatprep.subr.bf16.mxu0 %v4421_v46 }
 0x102   :  { %4092 = vmatprep.subr.bf16.mxu1 %v4422_v47 }
 0x103   :  { %3141 = vmatmul.mubr.bf16.vlgmr.msra.gmra.mrb[28].mxu0 %v4415_v42 }
 0x104   :  { %3182 = vmatmul.mubr.bf16.vlgmr.msra.gmra.mrb[28].mxu1 %v4418_v44  ;;  %4071 = vmatpush3.bf16.msra.mxu0 %v4423_v48 }
 0x105   :  { %4093 = vmatpush3.bf16.msra.mxu1 %v4424_v49  ;;  %4072 = vmatprep.subr.bf16.mxu0 %v4425_v51 }
 0x106   :  { %4094 = vmatprep.subr.bf16.mxu1 %v4426_v53  ;;  %3222 = vmatprep.mubr.bf16.mxu0 %v4455_v31 }
 0x107   :  { %3263 = vmatprep.mubr.bf16.mxu1 %v4458_v33 }
 0x108   :  { %4073 = vmatpush3.bf16.msra.mxu0 %v4427_v56 }
 0x109   :  { %4095 = vmatpush3.bf16.msra.mxu1 %v4428_v58  ;;  %4074 = vmatprep.subr.bf16.mxu0 %v4429_v62 }
 0x10a   :  { %4096 = vmatprep.subr.bf16.mxu1 %v4430_v0 }
 0x10c   :  { %4075 = vmatpush3.bf16.msra.mxu0 %v4431_v3 }
 0x10d   :  { %4097 = vmatpush3.bf16.msra.mxu1 %v4432_v6  ;;  %4076 = vmatprep.subr.bf16.mxu0 %v4433_v8 }
 0x10e   :  { %4098 = vmatprep.subr.bf16.mxu1 %v4434_v10 }
 0x110   :  { %4077 = vmatpush3.bf16.msra.mxu0 %v4435_v11 }
 0x111   :  { %4099 = vmatpush3.bf16.msra.mxu1 %v4436_v13  ;;  %4078 = vmatprep.subr.bf16.mxu0 %v4437_v14 }
 0x114   :  { %4079 = vmatpush3.bf16.msra.mxu0 %v4439_v16 }
 0x115   :  { %4080 = vmatprep.subr.bf16.mxu0 %v4441_v18 }
 0x116   :  { %v3778_v50 = vpop.f32.mrb[4].mxu0 }
 0x117   :  { %v3779_v52 = vpop.f32.mrb[5].mxu0  ;;  %v3800_v54 = vpop.f32.mrb[4].mxu1 }
 0x118   :  { %v3780_v55 = vadd.f32 %v3779_v52, %v3778_v50  ;;  %v3801_v57 = vpop.f32.mrb[5].mxu1  ;;  %v3781_v61 = vpop.f32.mrb[6].mxu0  ;;  %4081 = vmatpush3.bf16.msra.mxu0 %v4443_v20 }
 0x119   :  { %v3802_v60 = vadd.f32 %v3801_v57, %v3800_v54  ;;  %v3803_v63 = vpop.f32.mrb[6].mxu1  ;;  %v3782_v2 = vpop.f32.mrb[7].mxu0  ;;  %4082 = vmatprep.subr.bf16.mxu0 %v4445_v22 }
 0x11a   :  { %v2651_v59 = vadd.f32 %v3780_v55, %v5269_v15  ;;  %v3783_v4 = vadd.f32 %v3782_v2, %v3781_v61  ;;  %v3804_v5 = vpop.f32.mrb[7].mxu1  ;;  %v4438_v15 = vld [vmem:[%s5476_s1 + $0x8e0] sm:$0xff]  }
 0x11b   :  { %v3805_v7 = vadd.f32 %v3804_v5, %v3803_v63  ;;  %4100 = vmatprep.subr.bf16.mxu1 %v4438_v15 }
 0x11c   :  { %v5379_v1 = vadd.f32 %v3802_v60, %v2651_v59  ;;  %v2654_v9 = vadd.f32 %v3783_v4, %v5283_v24  ;;  %4101 = vmatpush3.bf16.msra.mxu1 %v4440_v17  ;;  %v4447_v24 = vld [vmem:[%s5476_s1 + $0x830] sm:$0xff]  }
 0x11d   :  { %4102 = vmatprep.subr.bf16.mxu1 %v4442_v19  ;;  %4083 = vmatpush3.bf16.msra.mxu0 %v4447_v24 }
 0x11e   :  { %v2695_v12 = vadd.f32 %v3805_v7, %v2654_v9  ;;  %4084 = vmatprep.subr.bf16.mxu0 %v4449_v26 }
 0x120   :  { %4103 = vmatpush3.bf16.msra.mxu1 %v4444_v21 }
 0x121   :  { %4104 = vmatprep.subr.bf16.mxu1 %v4446_v23  ;;  %4085 = vmatpush3.bf16.msra.mxu0 %v4451_v28 }
 0x124   :  { %4105 = vmatpush3.bf16.msra.mxu1 %v4448_v25  ;;  %3223 = vmatmul.mubr.bf16.vlgmr.msra.gmra.mrb[32].mxu0 %v4453_v30 }
 0x125   :  { %4106 = vmatprep.subr.bf16.mxu1 %v4450_v27 }
 0x128   :  { %4107 = vmatpush3.bf16.msra.mxu1 %v4452_v29 }
 0x12b   :  { %3264 = vmatmul.mubr.bf16.vlgmr.msra.gmra.mrb[32].mxu1 %v4456_v32 }
 0x136   :  { %v3822_v34 = vpop.f32.mrb[8].mxu0 }
 0x137   :  { %v3844_v35 = vpop.f32.mrb[8].mxu1  ;;  %v3823_v36 = vpop.f32.mrb[9].mxu0 }
 0x138   :  { %v3824_v37 = vadd.f32 %v3823_v36, %v3822_v34  ;;  %v3845_v38 = vpop.f32.mrb[9].mxu1  ;;  %v3825_v39 = vpop.f32.mrb[10].mxu0 }
 0x139   :  { %v3846_v40 = vadd.f32 %v3845_v38, %v3844_v35  ;;  %v3847_v41 = vpop.f32.mrb[10].mxu1  ;;  %v3826_v42 = vpop.f32.mrb[11].mxu0 }
 0x13a   :  { %v2733_v43 = vadd.f32 %v3824_v37, %v5379_v1  ;;  %v3827_v44 = vadd.f32 %v3826_v42, %v3825_v39  ;;  %v3848_v45 = vpop.f32.mrb[11].mxu1 }
 0x13b   :  { %v3849_v46 = vadd.f32 %v3848_v45, %v3847_v41 }
 0x13c   :  { %v2774_v47 = vadd.f32 %v3846_v40, %v2733_v43  ;;  %v2736_v48 = vadd.f32 %v3827_v44, %v2695_v12 }
 0x13e   :  { %v2777_v49 = vadd.f32 %v3849_v46, %v2736_v48 }
 0x156   :  { %v3866_v50 = vpop.f32.mrb[12].mxu0 }
 0x157   :  { %v3888_v51 = vpop.f32.mrb[12].mxu1  ;;  %v3867_v52 = vpop.f32.mrb[13].mxu0 }
 0x158   :  { %v3868_v53 = vadd.f32 %v3867_v52, %v3866_v50  ;;  %v3889_v54 = vpop.f32.mrb[13].mxu1  ;;  %v3869_v55 = vpop.f32.mrb[14].mxu0 }
 0x159   :  { %v3890_v56 = vadd.f32 %v3889_v54, %v3888_v51  ;;  %v3891_v57 = vpop.f32.mrb[14].mxu1  ;;  %v3870_v58 = vpop.f32.mrb[15].mxu0 }
 0x15a   :  { %v2815_v59 = vadd.f32 %v3868_v53, %v2774_v47  ;;  %v3871_v60 = vadd.f32 %v3870_v58, %v3869_v55  ;;  %v3892_v61 = vpop.f32.mrb[15].mxu1 }
 0x15b   :  { %v3893_v62 = vadd.f32 %v3892_v61, %v3891_v57 }
 0x15c   :  { %v2856_v63 = vadd.f32 %v3890_v56, %v2815_v59  ;;  %v2818_v0 = vadd.f32 %v3871_v60, %v2777_v49 }
 0x15e   :  { %v2859_v1 = vadd.f32 %v3893_v62, %v2818_v0 }
 0x176   :  { %v3910_v2 = vpop.f32.mrb[16].mxu0 }
 0x177   :  { %v3911_v3 = vpop.f32.mrb[17].mxu0  ;;  %v3932_v4 = vpop.f32.mrb[16].mxu1 }
 0x178   :  { %v3912_v5 = vadd.f32 %v3911_v3, %v3910_v2  ;;  %v3913_v6 = vpop.f32.mrb[18].mxu0  ;;  %v3933_v7 = vpop.f32.mrb[17].mxu1 }
 0x179   :  { %v3914_v8 = vpop.f32.mrb[19].mxu0  ;;  %v3934_v10 = vadd.f32 %v3933_v7, %v3932_v4  ;;  %v3935_v11 = vpop.f32.mrb[18].mxu1 }
 0x17a   :  { %v2897_v9 = vadd.f32 %v3912_v5, %v2856_v63  ;;  %v3915_v12 = vadd.f32 %v3914_v8, %v3913_v6  ;;  %v3936_v13 = vpop.f32.mrb[19].mxu1 }
 0x17b   :  { %v3937_v16 = vadd.f32 %v3936_v13, %v3935_v11 }
 0x17c   :  { %v2938_v14 = vadd.f32 %v3934_v10, %v2897_v9  ;;  %v2900_v15 = vadd.f32 %v3915_v12, %v2859_v1 }
 0x17e   :  { %v2941_v17 = vadd.f32 %v3937_v16, %v2900_v15 }
 0x196   :  { %v3954_v18 = vpop.f32.mrb[20].mxu0 }
 0x197   :  { %v3976_v19 = vpop.f32.mrb[20].mxu1  ;;  %v3955_v20 = vpop.f32.mrb[21].mxu0 }
 0x198   :  { %v3956_v21 = vadd.f32 %v3955_v20, %v3954_v18  ;;  %v3977_v22 = vpop.f32.mrb[21].mxu1  ;;  %v3957_v23 = vpop.f32.mrb[22].mxu0 }
 0x199   :  { %v3978_v24 = vadd.f32 %v3977_v22, %v3976_v19  ;;  %v3979_v25 = vpop.f32.mrb[22].mxu1  ;;  %v3958_v26 = vpop.f32.mrb[23].mxu0 }
 0x19a   :  { %v2979_v27 = vadd.f32 %v3956_v21, %v2938_v14  ;;  %v3959_v28 = vadd.f32 %v3958_v26, %v3957_v23  ;;  %v3980_v29 = vpop.f32.mrb[23].mxu1 }
 0x19b   :  { %v3981_v30 = vadd.f32 %v3980_v29, %v3979_v25  ;;  %v4459_v29 = vmov 0.0  }
 0x19c   :  { %v3020_v31 = vadd.f32 %v3978_v24, %v2979_v27  ;;  %v2982_v32 = vadd.f32 %v3959_v28, %v2941_v17 }
 0x19e   :  { %v3023_v33 = vadd.f32 %v3981_v30, %v2982_v32 }
 0x1b6   :  { %v3998_v34 = vpop.f32.mrb[24].mxu0 }
 0x1b7   :  { %v4020_v35 = vpop.f32.mrb[24].mxu1  ;;  %v3999_v36 = vpop.f32.mrb[25].mxu0 }
 0x1b8   :  { %v4000_v37 = vadd.f32 %v3999_v36, %v3998_v34  ;;  %v4021_v38 = vpop.f32.mrb[25].mxu1  ;;  %v4001_v39 = vpop.f32.mrb[26].mxu0 }
 0x1b9   :  { %v4022_v40 = vadd.f32 %v4021_v38, %v4020_v35  ;;  %v4023_v41 = vpop.f32.mrb[26].mxu1  ;;  %v4002_v42 = vpop.f32.mrb[27].mxu0 }
 0x1ba   :  { %v3061_v43 = vadd.f32 %v4000_v37, %v3020_v31  ;;  %v4003_v44 = vadd.f32 %v4002_v42, %v4001_v39  ;;  %v4024_v45 = vpop.f32.mrb[27].mxu1 }
 0x1bb   :  { %v4025_v46 = vadd.f32 %v4024_v45, %v4023_v41 }
 0x1bc   :  { %v3102_v47 = vadd.f32 %v4022_v40, %v3061_v43  ;;  %v3064_v48 = vadd.f32 %v4003_v44, %v3023_v33 }
 0x1be   :  { %v3105_v49 = vadd.f32 %v4025_v46, %v3064_v48 }
 0x1d6   :  { %v4042_v50 = vpop.f32.mrb[28].mxu0 }
 0x1d7   :  { %v4043_v51 = vpop.f32.mrb[29].mxu0  ;;  %v4064_v52 = vpop.f32.mrb[28].mxu1 }
 0x1d8   :  { %v4044_v53 = vadd.f32 %v4043_v51, %v4042_v50  ;;  %v4045_v54 = vpop.f32.mrb[30].mxu0  ;;  %v4065_v55 = vpop.f32.mrb[29].mxu1 }
 0x1d9   :  { %v4046_v56 = vpop.f32.mrb[31].mxu0  ;;  %v4066_v58 = vadd.f32 %v4065_v55, %v4064_v52  ;;  %v4067_v59 = vpop.f32.mrb[30].mxu1 }
 0x1da   :  { %v3143_v57 = vadd.f32 %v4044_v53, %v3102_v47  ;;  %v4047_v60 = vadd.f32 %v4046_v56, %v4045_v54  ;;  %v4068_v61 = vpop.f32.mrb[31].mxu1 }
 0x1db   :  { %v4069_v0 = vadd.f32 %v4068_v61, %v4067_v59 }
 0x1dc   :  { %v3184_v62 = vadd.f32 %v4066_v58, %v3143_v57  ;;  %v3146_v63 = vadd.f32 %v4047_v60, %v3105_v49 }
 0x1de   :  { %v3187_v1 = vadd.f32 %v4069_v0, %v3146_v63 }
 0x1f7   :  { %v4086_v2 = vpop.f32.mrb[32].mxu0 }
 0x1f8   :  { %v4087_v4 = vpop.f32.mrb[33].mxu0 }
 0x1f9   :  { %v4088_v5 = vadd.f32 %v4087_v4, %v4086_v2  ;;  %v4089_v7 = vpop.f32.mrb[34].mxu0 }
 0x1fa   :  { %v4090_v10 = vpop.f32.mrb[35].mxu0 }
 0x1fb   :  { %v3225_v11 = vadd.f32 %v4088_v5, %v3184_v62  ;;  %v4091_v12 = vadd.f32 %v4090_v10, %v4089_v7 }
 0x1fd   :  { %v3228_v16 = vadd.f32 %v4091_v12, %v3187_v1 }
 0x1fe   :  { %v4108_v3 = vpop.f32.mrb[32].mxu1 }
 0x1ff   :  { %v4109_v6 = vpop.f32.mrb[33].mxu1 }
 0x200   :  { %v4110_v8 = vadd.f32 %v4109_v6, %v4108_v3  ;;  %v4111_v9 = vpop.f32.mrb[34].mxu1 }
 0x201   :  { %v4112_v13 = vpop.f32.mrb[35].mxu1 }
 0x202   :  { %v4113_v14 = vadd.f32 %v4112_v13, %v4111_v9  ;;  %v3266_v15 = vadd.f32 %v4110_v8, %v3225_v11 }
 0x204   :  { %v3278_v17 = vmul.f32 0.75, %v3266_v15  ;;  %v3280_v18 = vrot.slane %v3266_v15, 2  ;;  %v3269_v19 = vadd.f32 %v4113_v14, %v3228_v16  ;;  %vm3274_vm0 = vcmp.ge.f32.partialorder %v3266_v15, 1.25 }
 0x205   :  { %v3275_v21 = vsel %vm3274_vm0, 0.0, %v3266_v15  ;;  %v3290_v24 = vrot.slane %v3266_v15, 4  ;;  %v3300_v28 = vrot.slane %v3266_v15, 6  ;;  %v3711_v30 = vsel %vm3274_vm0, 1.0, %v4459_v29 }
 0x206   :  { %v3282_v20 = vadd.f32 %v3280_v18, %v3278_v17  ;;  %v3283_v22 = vmul.f32 0.97, %v3275_v21  ;;  %v3338_v36 = vrot.slane %v3711_v30, 6  ;;  %v3319_v46 = vrot.slane %v3269_v19, 2 }
 0x207   :  { %v3329_v52 = vrot.slane %v3269_v19, 4 }
 0x208   :  { %v3289_v23 = vmul.f32 0.75, %v3282_v20  ;;  %v3284_v25 = vadd.f32 %v3283_v22, %v3282_v20  ;;  %v3356_v44 = vsel %vm3355_vm2, 0.0, %v3338_v36 }
 0x20a   :  { %v3292_v26 = vadd.f32 %v3290_v24, %v3289_v23  ;;  %vm3285_vm1 = vcmp.ge.f32.partialorder %v3284_v25, 1.25 }
 0x20b   :  { %v3286_v31 = vsel %vm3285_vm1, 0.0, %v3284_v25  ;;  %v3712_v32 = vsel %vm3285_vm1, 1.0, %v4459_v29 }
 0x20c   :  { %v3299_v27 = vmul.f32 0.75, %v3292_v26  ;;  %v3293_v33 = vmul.f32 0.97, %v3286_v31  ;;  %v3341_v38 = vrot.slane %v3712_v32, 4 }
 0x20e   :  { %v3302_v34 = vadd.f32 %v3300_v28, %v3299_v27  ;;  %v3294_v35 = vadd.f32 %v3293_v33, %v3292_v26  ;;  %v3358_v47 = vsel %vm3357_vm4, %v3356_v44, %v3341_v38 }
 0x210   :  { %v3309_v37 = vmul.f32 0.75, %v3302_v34  ;;  %vm3295_vm3 = vcmp.ge.f32.partialorder %v3294_v35, 1.25 }
 0x211   :  { %v3296_v40 = vsel %vm3295_vm3, 0.0, %v3294_v35  ;;  %v3713_v41 = vsel %vm3295_vm3, 1.0, %v4459_v29 }
 0x212   :  { %v3310_v39 = vadd.f32 %v3309_v37, %v3269_v19  ;;  %v3303_v42 = vmul.f32 0.97, %v3296_v40  ;;  %v3344_v43 = vrot.slane %v3713_v41, 2 }
 0x214   :  { %v3317_v45 = vmul.f32 0.75, %v3310_v39  ;;  %v3304_v48 = vadd.f32 %v3303_v42, %v3302_v34  ;;  %v3360_v49 = vsel %vm3359_vm5, %v3358_v47, %v3344_v43 }
 0x215   :  { %3364 = vst [vmem:[%s5478_s2] sm:$0xff] %v3360_v49 }
 0x216   :  { %v3321_v50 = vadd.f32 %v3319_v46, %v3317_v45  ;;  %vm3305_vm6 = vcmp.ge.f32.partialorder %v3304_v48, 1.25 }
 0x217   :  { %v3306_v53 = vsel %vm3305_vm6, 0.0, %v3304_v48  ;;  %v3714_v61 = vsel %vm3305_vm6, 1.0, %v4459_v29 }
 0x218   :  { %v3328_v51 = vmul.f32 0.75, %v3321_v50  ;;  %v3311_v54 = vmul.f32 0.97, %v3306_v53 }
 0x21a   :  { %v3331_v55 = vadd.f32 %v3329_v52, %v3328_v51  ;;  %v3312_v56 = vadd.f32 %v3311_v54, %v3310_v39 }
 0x21c   :  { %vm3313_vm7 = vcmp.ge.f32.partialorder %v3312_v56, 1.25 }
 0x21d   :  { %v3314_v57 = vsel %vm3313_vm7, 0.0, %v3312_v56  ;;  %v3715_v58 = vsel %vm3313_vm7, 1.0, %v4459_v29 }
 0x21e   :  { %v3322_v59 = vmul.f32 0.97, %v3314_v57  ;;  %v3347_v60 = vrot.slane %v3715_v58, 6 }
 0x220   :  { %v3323_v62 = vadd.f32 %v3322_v59, %v3321_v50  ;;  %v3361_v63 = vsel %vm3355_vm2, %v3714_v61, %v3347_v60 }
 0x222   :  { %vm3324_vm8 = vcmp.ge.f32.partialorder %v3323_v62, 1.25 }
 0x223   :  { %v3325_v0 = vsel %vm3324_vm8, 0.0, %v3323_v62  ;;  %v3716_v1 = vsel %vm3324_vm8, 1.0, %v4459_v29 }
 0x224   :  { %v3332_v2 = vmul.f32 0.97, %v3325_v0  ;;  %v3350_v3 = vrot.slane %v3716_v1, 4 }
 0x226   :  { %v3333_v4 = vadd.f32 %v3332_v2, %v3331_v55  ;;  %v3362_v5 = vsel %vm3357_vm4, %v3361_v63, %v3350_v3 }
 0x228   :  { %vm3334_vm9 = vcmp.ge.f32.partialorder %v3333_v4, 1.25 }
 0x229   :  { %v3717_v6 = vsel %vm3334_vm9, 1.0, %v4459_v29 }
 0x22a   :  { %v3353_v7 = vrot.slane %v3717_v6, 2 }
 0x22c   :  { %v3363_v8 = vsel %vm3359_vm5, %v3362_v5, %v3353_v7 }
 0x22d   :  { %3365 = vst [vmem:[%s5478_s2 + $0x8] sm:$0xff] %v3363_v8  ;;  %v3366_v9 = vadd.f32 %v3363_v8, %v3360_v49 }
 0x22f   :  { %3367 = vadd.xlane.f32.xlu0 %v3366_v9 }
 0x2bc   :  { %v3368_v10 = vpop.xlane.xlu0 %3367 }
 0x2bd   :  { %v3369_v11 = vrot.slane %v3368_v10, 4 }
 0x2bf   :  { %v3370_v12 = vadd.f32 %v3369_v11, %v3368_v10 }
 0x2c1   :  { %v3371_v13 = vrot.slane %v3370_v12, 2 }
 0x2c3   :  { %v3372_v14 = vadd.f32 %v3371_v13, %v3370_v12 }
 0x2c5   :  { %v3373_v15 = vrot.slane %v3372_v14, 1 }
 0x2c7   :  { %v3374_v16 = vadd.f32 %v3373_v15, %v3372_v14 }
 0x2c9   :  { %4114 = vpush %v3374_v16 }
 0x2fa   :  { %s4115_s14 = spop %4114 }
 0x2fb   :  { %v3376_v17 = vstv %s4115_s14 }
 0x2fc   :  { %3378 = vst [vmem:[%s5479_s3] sm:$0xff] %v3376_v17 }

</bundles_post_ra>
